<compile_context>
chip_gen: v5e
topology: v5e:2x2
jax: 0.10.0
libtpu: 0.0.40
codegen_flags: <defaults>
</compile_context>

<pallas_src>
import jax
import jax.numpy as jnp
from jax import lax
from jax.experimental import pallas as pl
from jax.experimental.pallas import tpu as pltpu

# ----------------------------- synthetic config ------------------------------
D = 32            # cfg.query_en_dim
HEADS = 4         # cfg.query_en_heads
NL = 2            # cfg.query_en_layers
FF = 64           # TransformerDecoderLayer dim_feedforward (kept small)
HW = 4            # spatial h = w
L = HW * HW       # cfg.query_en_bev_length = h*w
B = 2             # batch
BL = B * L        # folded batch*token axis
DH = D // HEADS   # head dim
EPS = 1e-5        # layer_norm_eps


# ------------------------- packed weight layout -------------------------------
def _round_up(n, m):
    return ((n + m - 1) // m) * m


# (name, rows, cols) -- each slot starts on a 16-row boundary (bf16 sublane tile).
_PACK_ENTRIES = (
    ("sa_in_w", D, 3 * D), ("sa_in_b", 1, 3 * D),
    ("sa_out_w", D, D), ("sa_out_b", 1, D),
    ("n1_w", 1, D), ("n1_b", 1, D),
    ("ca_q_w", D, D), ("ca_q_b", 1, D),
    ("ca_kv_w", D, 2 * D), ("ca_kv_b", 1, 2 * D),
    ("ca_out_w", D, D), ("ca_out_b", 1, D),
    ("n2_w", 1, D), ("n2_b", 1, D),
    ("lin1_w", D, FF), ("lin1_b", 1, FF),
    ("lin2_w", FF, D), ("lin2_b", 1, D),
    ("n3_w", 1, D), ("n3_b", 1, D),
)
ROW_ALIGN = 16        # bf16 (16, 128) tile
PACK_COLS = 128       # lane-dense slab
PACK_OFFSETS = {}
_off = 0
for _name, _rows, _cols in _PACK_ENTRIES:
    assert _cols <= PACK_COLS
    PACK_OFFSETS[_name] = (_off, _rows, _cols)
    _off += _round_up(_rows, ROW_ALIGN)
PACK_ROWS = _round_up(_off, ROW_ALIGN)


# ------------------------------ shared math -----------------------------------
def _mm(a, w_bf16):
    """activation @ pre-packed-bf16-weight with f32 MXU accumulation."""
    return jnp.dot(a.astype(jnp.bfloat16), w_bf16,
                   preferred_element_type=jnp.float32)


def _layernorm(x, w, b):
    mu = jnp.mean(x, axis=-1, keepdims=True)
    xc = x - mu
    var = jnp.mean(xc * xc, axis=-1, keepdims=True)
    return xc * lax.rsqrt(var + EPS) * w + b


def _attn_core(q, k, v, w_out, b_out, batch_mask, head_masks):
    """q/k/v: [B*L, D] f32 with 1/sqrt(DH) pre-folded into q.

    Heads are selected with 0/1 lane masks (no width-8 lane slices); batches
    stay independent via a block-diagonal additive -inf mask; per-head PV
    results accumulate directly into the concatenated layout."""
    q16 = q.astype(jnp.bfloat16)
    k16 = k.astype(jnp.bfloat16)
    v16 = v.astype(jnp.bfloat16)
    ctx = jnp.zeros((BL, D), jnp.float32)
    for m in head_masks:
        # (q * m_h) @ k^T == Q_h @ K_h^T (masked lanes contribute exact zeros)
        s = lax.dot_general(q16 * m, k16, (((1,), (1,)), ((), ())),
                            preferred_element_type=jnp.float32)   # [BL, BL]
        s = s + batch_mask
        s = s - jnp.max(s, axis=-1, keepdims=True)
        p = jnp.exp(s)
        p = p * pl.reciprocal(jnp.sum(p, axis=-1, keepdims=True), approx=True)
        # p @ (v * m_h) fills only this head's output columns -> accumulation
        # over heads reproduces the concatenated head layout with no shuffles.
        ctx = ctx + jnp.dot(p.astype(jnp.bfloat16), v16 * m,
                            preferred_element_type=jnp.float32)
    return _mm(ctx, w_out) + b_out


def _decoder_stack(x, mem, w_ref):
    """x, mem: [B*L, D] f32.  w_ref: packed bf16 weights [NL, PACK_ROWS, PACK_COLS]."""
    # --- compile-time constant masks, built once and reused by all layers ---
    lane = lax.broadcasted_iota(jnp.int32, (1, D), 1)
    head_masks = [
        jnp.where((lane >= h * DH) & (lane < (h + 1) * DH), 1.0, 0.0
                  ).astype(jnp.bfloat16)
        for h in range(HEADS)
    ]
    if B > 1:
        r_pos = lax.broadcasted_iota(jnp.int32, (BL, BL), 0)
        c_pos = lax.broadcasted_iota(jnp.int32, (BL, BL), 1)
        rb = sum(jnp.where(r_pos >= bb * L, 1, 0) for bb in range(1, B))
        cb = sum(jnp.where(c_pos >= bb * L, 1, 0) for bb in range(1, B))
        batch_mask = jnp.where(rb == cb, 0.0, -1e30).astype(jnp.float32)
    else:
        batch_mask = jnp.zeros((BL, BL), jnp.float32)

    for l in range(NL):
        def g(name, _l=l):
            off, r, c = PACK_OFFSETS[name]
            return w_ref[_l, off:off + r, 0:c]          # static slice, bf16

        # --- self attention (fused QKV projection) ---
        qkv = _mm(x, g("sa_in_w")) + g("sa_in_b")        # [BL, 3D]
        sa = _attn_core(qkv[:, 0:D], qkv[:, D:2 * D], qkv[:, 2 * D:3 * D],
                        g("sa_out_w"), g("sa_out_b"), batch_mask, head_masks)
        x = _layernorm(x + sa, g("n1_w"), g("n1_b"))

        # --- cross attention (fused KV projection) ---
        q = _mm(x, g("ca_q_w")) + g("ca_q_b")            # [BL, D]
        kv = _mm(mem, g("ca_kv_w")) + g("ca_kv_b")       # [BL, 2D]
        ca = _attn_core(q, kv[:, 0:D], kv[:, D:2 * D],
                        g("ca_out_w"), g("ca_out_b"), batch_mask, head_masks)
        x = _layernorm(x + ca, g("n2_w"), g("n2_b"))

        # --- feed forward ---
        h1 = jnp.maximum(_mm(x, g("lin1_w")) + g("lin1_b"), 0.0)
        ff = _mm(h1, g("lin2_w")) + g("lin2_b")
        x = _layernorm(x + ff, g("n3_w"), g("n3_b"))
    return x


# ------------------------------ Pallas kernel ---------------------------------
def bev_query_kernel(tgt_ref, img_ref, pos_ref, w_ref, out_ref):
    pos = pos_ref[...]                                   # [L, D]
    pos_bl = jnp.concatenate([pos] * B, axis=0)          # [B*L, D] sublane bcast
    x = tgt_ref[...] + pos_bl
    mem = img_ref[...] + pos_bl
    out_ref[...] = _decoder_stack(x, mem, w_ref)


# --------------------------- weight packing (init-time) ------------------------
def pack_params(params):
    """Pack all per-layer weights into one [NL, PACK_ROWS, PACK_COLS] bf16 buffer.
    Runs ONCE at init (not in the per-call forward path).
    1/sqrt(DH) is folded into the Q projection weights/bias here."""
    scale = 1.0 / (DH ** 0.5)
    layers = []
    for l in range(NL):
        t = {
            "sa_in_w": params["sa_in_w"][l].at[:, :D].multiply(scale),
            "sa_in_b": params["sa_in_b"][l].at[:, :D].multiply(scale),
            "sa_out_w": params["sa_out_w"][l], "sa_out_b": params["sa_out_b"][l],
            "n1_w": params["n1_w"][l], "n1_b": params["n1_b"][l],
            "ca_q_w": params["ca_in_w"][l][:, :D] * scale,
            "ca_q_b": params["ca_in_b"][l][:, :D] * scale,
            "ca_kv_w": params["ca_in_w"][l][:, D:],
            "ca_kv_b": params["ca_in_b"][l][:, D:],
            "ca_out_w": params["ca_out_w"][l], "ca_out_b": params["ca_out_b"][l],
            "n2_w": params["n2_w"][l], "n2_b": params["n2_b"][l],
            "lin1_w": params["lin1_w"][l], "lin1_b": params["lin1_b"][l],
            "lin2_w": params["lin2_w"][l], "lin2_b": params["lin2_b"][l],
            "n3_w": params["n3_w"][l], "n3_b": params["n3_b"][l],
        }
        buf = jnp.zeros((PACK_ROWS, PACK_COLS), jnp.float32)
        for name, (off, r, c) in PACK_OFFSETS.items():
            buf = buf.at[off:off + r, 0:c].set(t[name].astype(jnp.float32))
        layers.append(buf)
    return jnp.stack(layers, axis=0).astype(jnp.bfloat16)


# ------------------------------- Pallas wrapper ---------------------------------
@jax.jit
def bev_query_pallas(tgt_nchw, img_nchw, packed_w, pos_embed_ld):
    b, c, h, w = tgt_nchw.shape
    assert (b, c, h * w) == (B, D, L)
    # NCHW -> tokens-major [B*L, D]; tiny fused XLA copies inside this jit.
    tgt = tgt_nchw.reshape(B, D, L).transpose(0, 2, 1).reshape(BL, D)
    img = img_nchw.reshape(B, D, L).transpose(0, 2, 1).reshape(BL, D)

    def full_spec(a):
        nd = a.ndim
        return pl.BlockSpec(a.shape, lambda *_args, _nd=nd: (0,) * _nd)

    out = pl.pallas_call(
        bev_query_kernel,
        out_shape=jax.ShapeDtypeStruct((BL, D), jnp.float32),
        grid=(1,),  # single step: whole [B*L, D] slab fits trivially in VMEM
        in_specs=[full_spec(tgt), full_spec(img),
                  full_spec(pos_embed_ld), full_spec(packed_w)],
        out_specs=pl.BlockSpec((BL, D), lambda i: (0, 0)),
        compiler_params=pltpu.CompilerParams(dimension_semantics=("arbitrary",)),
    )(tgt, img, pos_embed_ld, packed_w)

    return out.reshape(B, L, D).transpose(0, 2, 1).reshape(B, D, HW, HW)


# ---------------------------- pure-JAX references -------------------------------
def bev_query_ref(tgt_nchw, img_nchw, params, *, bf16_matmul):
    """Independent formulation (unpacked params, per-batch/per-head loops with
    explicit slices, scale on scores, exact softmax division).
    bf16_matmul=True  -> matches the kernel's bf16 MXU numerics (validates the
                         packing / masking / fusion identities).
    bf16_matmul=False -> true f32 semantics of the PyTorch module (documents the
                         bf16 + approx-reciprocal deviation)."""
    if bf16_matmul:
        def mm(a, b):
            return jnp.dot(a.astype(jnp.bfloat16), b.astype(jnp.bfloat16),
                           preferred_element_type=jnp.float32)
    else:
        def mm(a, b):
            return jnp.dot(a.astype(jnp.float32), b.astype(jnp.float32),
                           preferred_element_type=jnp.float32,
                           precision=jax.lax.Precision.HIGHEST)

    def mha(q_in, kv_in, w_in, b_in, w_out, b_out):
        q = mm(q_in, w_in[:, 0:D]) + b_in[:, 0:D]
        k = mm(kv_in, w_in[:, D:2 * D]) + b_in[:, D:2 * D]
        v = mm(kv_in, w_in[:, 2 * D:3 * D]) + b_in[:, 2 * D:3 * D]
        scale = 1.0 / (DH ** 0.5)
        heads = []
        for hd in range(HEADS):
            sl = slice(hd * DH, (hd + 1) * DH)
            s = mm(q[:, sl], k[:, sl].T) * scale
            s = s - jnp.max(s, axis=-1, keepdims=True)
            p = jnp.exp(s)
            p = p / jnp.sum(p, axis=-1, keepdims=True)
            heads.append(mm(p, v[:, sl]))
        o = jnp.concatenate(heads, axis=-1)
        return mm(o, w_out) + b_out

    b, c, h, w = tgt_nchw.shape
    tgt = tgt_nchw.reshape(b, c, h * w).transpose(0, 2, 1) + params["pos_embed"]
    img = img_nchw.reshape(b, c, h * w).transpose(0, 2, 1) + params["pos_embed"]
    outs = []
    for bi in range(b):
        x, mem = tgt[bi], img[bi]
        for l in range(NL):
            sa = mha(x, x, params["sa_in_w"][l], params["sa_in_b"][l],
                     params["sa_out_w"][l], params["sa_out_b"][l])
            x = _layernorm(x + sa, params["n1_w"][l], params["n1_b"][l])
            ca = mha(x, mem, params["ca_in_w"][l], params["ca_in_b"][l],
                     params["ca_out_w"][l], params["ca_out_b"][l])
            x = _layernorm(x + ca, params["n2_w"][l], params["n2_b"][l])
            h1 = jnp.maximum(mm(x, params["lin1_w"][l]) + params["lin1_b"][l], 0.0)
            ff = mm(h1, params["lin2_w"][l]) + params["lin2_b"][l]
            x = _layernorm(x + ff, params["n3_w"][l], params["n3_b"][l])
        outs.append(x)
    out = jnp.stack(outs, axis=0)
    return out.transpose(0, 2, 1).reshape(b, c, h, w)


# ------------------------------- parameters ------------------------------------
def _xavier(key, shape, fan_in, fan_out):
    bound = (6.0 / (fan_in + fan_out)) ** 0.5
    return jax.random.uniform(key, shape, jnp.float32, -bound, bound)


def init_params(key):
    ks = iter(jax.random.split(key, 64))
    p = {}
    # pos_embed: trunc_normal(std=0.02) -> plain normal*0.02 (synthetic init)
    p["pos_embed"] = 0.02 * jax.random.normal(next(ks), (1, L, D), jnp.float32)
    # Attention in/out projections stored pre-transposed as [in_dim, out_dim].
    p["sa_in_w"] = _xavier(next(ks), (NL, D, 3 * D), D, 3 * D)
    p["sa_in_b"] = jnp.zeros((NL, 1, 3 * D), jnp.float32)
    p["sa_out_w"] = _xavier(next(ks), (NL, D, D), D, D)
    p["sa_out_b"] = jnp.zeros((NL, 1, D), jnp.float32)
    p["ca_in_w"] = _xavier(next(ks), (NL, D, 3 * D), D, 3 * D)
    p["ca_in_b"] = jnp.zeros((NL, 1, 3 * D), jnp.float32)
    p["ca_out_w"] = _xavier(next(ks), (NL, D, D), D, D)
    p["ca_out_b"] = jnp.zeros((NL, 1, D), jnp.float32)
    p["lin1_w"] = _xavier(next(ks), (NL, D, FF), D, FF)
    p["lin1_b"] = 0.01 * jax.random.normal(next(ks), (NL, 1, FF), jnp.float32)
    p["lin2_w"] = _xavier(next(ks), (NL, FF, D), FF, D)
    p["lin2_b"] = 0.01 * jax.random.normal(next(ks), (NL, 1, D), jnp.float32)
    for n in ("n1", "n2", "n3"):
        p[f"{n}_w"] = jnp.ones((NL, 1, D), jnp.float32)
        p[f"{n}_b"] = jnp.zeros((NL, 1, D), jnp.float32)
    return p


# ----------------------------------- main ---------------------------------------
if __name__ == "__main__":
    key = jax.random.PRNGKey(0)
    kp, kt, ki = jax.random.split(key, 3)
    params = init_params(kp)
    tgt_feature = jax.random.normal(kt, (B, D, HW, HW), jnp.float32)
    img_feature = jax.random.normal(ki, (B, D, HW, HW), jnp.float32)

    # --- one-time init work (hoisted out of the per-call forward path) ---
    packed_w = jax.block_until_ready(pack_params(params))      # [NL, 464, 128] bf16
    pos_ld = params["pos_embed"][0]                             # [L, D] f32

    out = jax.block_until_ready(
        bev_query_pallas(tgt_feature, img_feature, packed_w, pos_ld))

    ref_bf16 = jax.block_until_ready(
        bev_query_ref(tgt_feature, img_feature, params, bf16_matmul=True))
    ref_f32 = jax.block_until_ready(
        bev_query_ref(tgt_feature, img_feature, params, bf16_matmul=False))

    assert out.shape == (B, D, HW, HW)
    assert bool(jnp.all(jnp.isfinite(out)))

    # Structural identity check vs matched-bf16 reference (tight-ish tolerance).
    err16 = float(jnp.max(jnp.abs(out - ref_bf16)))
    assert jnp.allclose(out, ref_bf16, atol=2e-2, rtol=2e-2), err16
    # True-f32 semantics check: bounds the bf16 + approx-reciprocal deviation.
    err32 = float(jnp.max(jnp.abs(out - ref_f32)))
    assert jnp.allclose(out, ref_f32, atol=1e-1, rtol=1e-1), err32

    print("KERNEL_OK")
</pallas_src>

<mosaic_0001>
module attributes {stable_mosaic.version = 11 : i64} {
  func.func @bev_query_kernel(%arg0: i32, %arg1: memref<32x32xf32, #tpu.memory_space<vmem>>, %arg2: memref<32x32xf32, #tpu.memory_space<vmem>>, %arg3: memref<16x32xf32, #tpu.memory_space<vmem>>, %arg4: memref<2x464x128xbf16, #tpu.memory_space<vmem>>, %arg5: memref<32x32xf32, #tpu.memory_space<vmem>>) attributes {dimension_semantics = [#tpu.dimension_semantics<arbitrary>], iteration_bounds = array<i64: 1>, scalar_prefetch = 0 : i64, scratch_operands = 0 : i64, tpu.core_type = #tpu.core_type<tc>, window_params = [{pipeline_mode = #tpu.pipeline_mode<synchronous>, transform_indices = @transform_0, window_bounds = array<i64: 32, 32>}, {pipeline_mode = #tpu.pipeline_mode<synchronous>, transform_indices = @transform_1, window_bounds = array<i64: 32, 32>}, {pipeline_mode = #tpu.pipeline_mode<synchronous>, transform_indices = @transform_2, window_bounds = array<i64: 16, 32>}, {pipeline_mode = #tpu.pipeline_mode<synchronous>, transform_indices = @transform_3, window_bounds = array<i64: 2, 464, 128>}, {pipeline_mode = #tpu.pipeline_mode<synchronous>, transform_indices = @transform_4, window_bounds = array<i64: 32, 32>}]} {
    %c0 = arith.constant 0 : index
    %c0_0 = arith.constant 0 : index
    %0 = vector.load %arg3[%c0, %c0_0] : memref<16x32xf32, #tpu.memory_space<vmem>>, vector<16x32xf32>
    %1 = tpu.concatenate %0, %0 in 0 : vector<16x32xf32>, vector<16x32xf32> -> vector<32x32xf32>
    %c0_1 = arith.constant 0 : index
    %c0_2 = arith.constant 0 : index
    %2 = vector.load %arg1[%c0_1, %c0_2] : memref<32x32xf32, #tpu.memory_space<vmem>>, vector<32x32xf32>
    %3 = arith.addf %2, %1 : vector<32x32xf32>
    %c0_3 = arith.constant 0 : index
    %c0_4 = arith.constant 0 : index
    %4 = vector.load %arg2[%c0_3, %c0_4] : memref<32x32xf32, #tpu.memory_space<vmem>>, vector<32x32xf32>
    %5 = arith.addf %4, %1 : vector<32x32xf32>
    %6 = tpu.iota {dimensions = array<i32: 1>} : vector<1x32xi32>
    %c0_i32 = arith.constant 0 : i32
    %7 = vector.broadcast %c0_i32 : i32 to vector<1x32xi32>
    %8 = arith.cmpi sge, %6, %7 : vector<1x32xi32>
    %c8_i32 = arith.constant 8 : i32
    %9 = vector.broadcast %c8_i32 : i32 to vector<1x32xi32>
    %10 = arith.cmpi slt, %6, %9 : vector<1x32xi32>
    %11 = arith.andi %8, %10 : vector<1x32xi1>
    %cst = arith.constant 1.000000e+00 : f32
    %cst_5 = arith.constant 0.000000e+00 : f32
    %12 = vector.broadcast %cst : f32 to vector<1x32xf32>
    %13 = vector.broadcast %cst_5 : f32 to vector<1x32xf32>
    %14 = arith.select %11, %12, %13 : vector<1x32xi1>, vector<1x32xf32>
    %15 = arith.truncf %14 : vector<1x32xf32> to vector<1x32xbf16>
    %c8_i32_6 = arith.constant 8 : i32
    %16 = vector.broadcast %c8_i32_6 : i32 to vector<1x32xi32>
    %17 = arith.cmpi sge, %6, %16 : vector<1x32xi32>
    %c16_i32 = arith.constant 16 : i32
    %18 = vector.broadcast %c16_i32 : i32 to vector<1x32xi32>
    %19 = arith.cmpi slt, %6, %18 : vector<1x32xi32>
    %20 = arith.andi %17, %19 : vector<1x32xi1>
    %cst_7 = arith.constant 1.000000e+00 : f32
    %cst_8 = arith.constant 0.000000e+00 : f32
    %21 = vector.broadcast %cst_7 : f32 to vector<1x32xf32>
    %22 = vector.broadcast %cst_8 : f32 to vector<1x32xf32>
    %23 = arith.select %20, %21, %22 : vector<1x32xi1>, vector<1x32xf32>
    %24 = arith.truncf %23 : vector<1x32xf32> to vector<1x32xbf16>
    %c16_i32_9 = arith.constant 16 : i32
    %25 = vector.broadcast %c16_i32_9 : i32 to vector<1x32xi32>
    %26 = arith.cmpi sge, %6, %25 : vector<1x32xi32>
    %c24_i32 = arith.constant 24 : i32
    %27 = vector.broadcast %c24_i32 : i32 to vector<1x32xi32>
    %28 = arith.cmpi slt, %6, %27 : vector<1x32xi32>
    %29 = arith.andi %26, %28 : vector<1x32xi1>
    %cst_10 = arith.constant 1.000000e+00 : f32
    %cst_11 = arith.constant 0.000000e+00 : f32
    %30 = vector.broadcast %cst_10 : f32 to vector<1x32xf32>
    %31 = vector.broadcast %cst_11 : f32 to vector<1x32xf32>
    %32 = arith.select %29, %30, %31 : vector<1x32xi1>, vector<1x32xf32>
    %33 = arith.truncf %32 : vector<1x32xf32> to vector<1x32xbf16>
    %c24_i32_12 = arith.constant 24 : i32
    %34 = vector.broadcast %c24_i32_12 : i32 to vector<1x32xi32>
    %35 = arith.cmpi sge, %6, %34 : vector<1x32xi32>
    %c32_i32 = arith.constant 32 : i32
    %36 = vector.broadcast %c32_i32 : i32 to vector<1x32xi32>
    %37 = arith.cmpi slt, %6, %36 : vector<1x32xi32>
    %38 = arith.andi %35, %37 : vector<1x32xi1>
    %cst_13 = arith.constant 1.000000e+00 : f32
    %cst_14 = arith.constant 0.000000e+00 : f32
    %39 = vector.broadcast %cst_13 : f32 to vector<1x32xf32>
    %40 = vector.broadcast %cst_14 : f32 to vector<1x32xf32>
    %41 = arith.select %38, %39, %40 : vector<1x32xi1>, vector<1x32xf32>
    %42 = arith.truncf %41 : vector<1x32xf32> to vector<1x32xbf16>
    %43 = tpu.iota {dimensions = array<i32: 0>} : vector<32x32xi32>
    %44 = tpu.iota {dimensions = array<i32: 1>} : vector<32x32xi32>
    %c16_i32_15 = arith.constant 16 : i32
    %45 = vector.broadcast %c16_i32_15 : i32 to vector<32x32xi32>
    %46 = arith.cmpi sge, %43, %45 : vector<32x32xi32>
    %c1_i32 = arith.constant 1 : i32
    %c0_i32_16 = arith.constant 0 : i32
    %47 = vector.broadcast %c1_i32 : i32 to vector<32x32xi32>
    %48 = vector.broadcast %c0_i32_16 : i32 to vector<32x32xi32>
    %49 = arith.select %46, %47, %48 : vector<32x32xi1>, vector<32x32xi32>
    %c0_i32_17 = arith.constant 0 : i32
    %50 = vector.broadcast %c0_i32_17 : i32 to vector<32x32xi32>
    %51 = arith.addi %50, %49 : vector<32x32xi32>
    %c16_i32_18 = arith.constant 16 : i32
    %52 = vector.broadcast %c16_i32_18 : i32 to vector<32x32xi32>
    %53 = arith.cmpi sge, %44, %52 : vector<32x32xi32>
    %c1_i32_19 = arith.constant 1 : i32
    %c0_i32_20 = arith.constant 0 : i32
    %54 = vector.broadcast %c1_i32_19 : i32 to vector<32x32xi32>
    %55 = vector.broadcast %c0_i32_20 : i32 to vector<32x32xi32>
    %56 = arith.select %53, %54, %55 : vector<32x32xi1>, vector<32x32xi32>
    %c0_i32_21 = arith.constant 0 : i32
    %57 = vector.broadcast %c0_i32_21 : i32 to vector<32x32xi32>
    %58 = arith.addi %57, %56 : vector<32x32xi32>
    %59 = arith.cmpi eq, %51, %58 : vector<32x32xi32>
    %cst_22 = arith.constant 0.000000e+00 : f32
    %cst_23 = arith.constant -1.000000e+30 : f32
    %60 = vector.broadcast %cst_22 : f32 to vector<32x32xf32>
    %61 = vector.broadcast %cst_23 : f32 to vector<32x32xf32>
    %62 = arith.select %59, %60, %61 : vector<32x32xi1>, vector<32x32xf32>
    %c0_24 = arith.constant 0 : index
    %c0_25 = arith.constant 0 : index
    %c0_26 = arith.constant 0 : index
    %63 = vector.load %arg4[%c0_24, %c0_25, %c0_26] : memref<2x464x128xbf16, #tpu.memory_space<vmem>>, vector<1x32x96xbf16>
    %64 = vector.shape_cast %63 : vector<1x32x96xbf16> to vector<32x96xbf16>
    %65 = arith.truncf %3 : vector<32x32xf32> to vector<32x32xbf16>
    %cst_27 = arith.constant dense<0.000000e+00> : vector<32x96xf32>
    %66 = tpu.matmul %65, %64, %cst_27 {dimension_numbers = #tpu.dot_dimension_numbers<[1], [0], [0], [1], [0, 0, 1, 1], [], []>} : vector<32x32xbf16>, vector<32x96xbf16>, vector<32x96xf32> -> vector<32x96xf32>
    %c0_28 = arith.constant 0 : index
    %c32 = arith.constant 32 : index
    %c0_29 = arith.constant 0 : index
    %67 = vector.load %arg4[%c0_28, %c32, %c0_29] : memref<2x464x128xbf16, #tpu.memory_space<vmem>>, vector<1x1x96xbf16>
    %68 = vector.shape_cast %67 : vector<1x1x96xbf16> to vector<1x96xbf16>
    %69 = arith.extf %68 : vector<1x96xbf16> to vector<1x96xf32>
    %70 = vector.broadcast %69 : vector<1x96xf32> to vector<32x96xf32>
    %71 = arith.addf %66, %70 : vector<32x96xf32>
    %72 = vector.extract_strided_slice %71 {offsets = [0, 0], sizes = [32, 32], strides = [1, 1]} : vector<32x96xf32> to vector<32x32xf32>
    %73 = vector.extract_strided_slice %71 {offsets = [0, 32], sizes = [32, 32], strides = [1, 1]} : vector<32x96xf32> to vector<32x32xf32>
    %74 = vector.extract_strided_slice %71 {offsets = [0, 64], sizes = [32, 32], strides = [1, 1]} : vector<32x96xf32> to vector<32x32xf32>
    %c0_30 = arith.constant 0 : index
    %c48 = arith.constant 48 : index
    %c0_31 = arith.constant 0 : index
    %75 = vector.load %arg4[%c0_30, %c48, %c0_31] : memref<2x464x128xbf16, #tpu.memory_space<vmem>>, vector<1x32x32xbf16>
    %76 = vector.shape_cast %75 : vector<1x32x32xbf16> to vector<32x32xbf16>
    %c0_32 = arith.constant 0 : index
    %c80 = arith.constant 80 : index
    %c0_33 = arith.constant 0 : index
    %77 = vector.load %arg4[%c0_32, %c80, %c0_33] : memref<2x464x128xbf16, #tpu.memory_space<vmem>>, vector<1x1x32xbf16>
    %78 = vector.shape_cast %77 : vector<1x1x32xbf16> to vector<1x32xbf16>
    %79 = arith.truncf %72 : vector<32x32xf32> to vector<32x32xbf16>
    %80 = arith.truncf %73 : vector<32x32xf32> to vector<32x32xbf16>
    %81 = arith.truncf %74 : vector<32x32xf32> to vector<32x32xbf16>
    %cst_34 = arith.constant 0.000000e+00 : f32
    %82 = vector.broadcast %cst_34 : f32 to vector<32x32xf32>
    %83 = vector.broadcast %15 : vector<1x32xbf16> to vector<32x32xbf16>
    %84 = arith.mulf %79, %83 : vector<32x32xbf16>
    %cst_35 = arith.constant dense<0.000000e+00> : vector<32x32xf32>
    %85 = tpu.matmul %84, %80, %cst_35 {dimension_numbers = #tpu.dot_dimension_numbers<[1], [1], [0], [0], [0, 0, 1, 0], [], []>} : vector<32x32xbf16>, vector<32x32xbf16>, vector<32x32xf32> -> vector<32x32xf32>
    %86 = arith.addf %85, %62 : vector<32x32xf32>
    %cst_36 = arith.constant dense<0xFF800000> : vector<32xf32>
    %87 = vector.multi_reduction <maximumf>, %86, %cst_36 [1] : vector<32x32xf32> to vector<32xf32>
    %88 = vector.shape_cast %87 : vector<32xf32> to vector<32x1xf32>
    %89 = vector.broadcast %88 : vector<32x1xf32> to vector<32x32xf32>
    %90 = arith.subf %86, %89 : vector<32x32xf32>
    %91 = math.exp %90 : vector<32x32xf32>
    %cst_37 = arith.constant dense<0.000000e+00> : vector<32xf32>
    %92 = vector.multi_reduction <add>, %91, %cst_37 [1] : vector<32x32xf32> to vector<32xf32>
    %93 = vector.shape_cast %92 : vector<32xf32> to vector<32x1xf32>
    %94 = tpu.reciprocal %93 {approx = true} : vector<32x1xf32> -> vector<32x1xf32>
    %95 = vector.broadcast %94 : vector<32x1xf32> to vector<32x32xf32>
    %96 = arith.mulf %91, %95 : vector<32x32xf32>
    %97 = arith.truncf %96 : vector<32x32xf32> to vector<32x32xbf16>
    %98 = vector.broadcast %15 : vector<1x32xbf16> to vector<32x32xbf16>
    %99 = arith.mulf %81, %98 : vector<32x32xbf16>
    %cst_38 = arith.constant dense<0.000000e+00> : vector<32x32xf32>
    %100 = tpu.matmul %97, %99, %cst_38 {dimension_numbers = #tpu.dot_dimension_numbers<[1], [0], [0], [1], [0, 0, 1, 1], [], []>} : vector<32x32xbf16>, vector<32x32xbf16>, vector<32x32xf32> -> vector<32x32xf32>
    %101 = arith.addf %82, %100 : vector<32x32xf32>
    %102 = vector.broadcast %24 : vector<1x32xbf16> to vector<32x32xbf16>
    %103 = arith.mulf %79, %102 : vector<32x32xbf16>
    %cst_39 = arith.constant dense<0.000000e+00> : vector<32x32xf32>
    %104 = tpu.matmul %103, %80, %cst_39 {dimension_numbers = #tpu.dot_dimension_numbers<[1], [1], [0], [0], [0, 0, 1, 0], [], []>} : vector<32x32xbf16>, vector<32x32xbf16>, vector<32x32xf32> -> vector<32x32xf32>
    %105 = arith.addf %104, %62 : vector<32x32xf32>
    %cst_40 = arith.constant dense<0xFF800000> : vector<32xf32>
    %106 = vector.multi_reduction <maximumf>, %105, %cst_40 [1] : vector<32x32xf32> to vector<32xf32>
    %107 = vector.shape_cast %106 : vector<32xf32> to vector<32x1xf32>
    %108 = vector.broadcast %107 : vector<32x1xf32> to vector<32x32xf32>
    %109 = arith.subf %105, %108 : vector<32x32xf32>
    %110 = math.exp %109 : vector<32x32xf32>
    %cst_41 = arith.constant dense<0.000000e+00> : vector<32xf32>
    %111 = vector.multi_reduction <add>, %110, %cst_41 [1] : vector<32x32xf32> to vector<32xf32>
    %112 = vector.shape_cast %111 : vector<32xf32> to vector<32x1xf32>
    %113 = tpu.reciprocal %112 {approx = true} : vector<32x1xf32> -> vector<32x1xf32>
    %114 = vector.broadcast %113 : vector<32x1xf32> to vector<32x32xf32>
    %115 = arith.mulf %110, %114 : vector<32x32xf32>
    %116 = arith.truncf %115 : vector<32x32xf32> to vector<32x32xbf16>
    %117 = vector.broadcast %24 : vector<1x32xbf16> to vector<32x32xbf16>
    %118 = arith.mulf %81, %117 : vector<32x32xbf16>
    %cst_42 = arith.constant dense<0.000000e+00> : vector<32x32xf32>
    %119 = tpu.matmul %116, %118, %cst_42 {dimension_numbers = #tpu.dot_dimension_numbers<[1], [0], [0], [1], [0, 0, 1, 1], [], []>} : vector<32x32xbf16>, vector<32x32xbf16>, vector<32x32xf32> -> vector<32x32xf32>
    %120 = arith.addf %101, %119 : vector<32x32xf32>
    %121 = vector.broadcast %33 : vector<1x32xbf16> to vector<32x32xbf16>
    %122 = arith.mulf %79, %121 : vector<32x32xbf16>
    %cst_43 = arith.constant dense<0.000000e+00> : vector<32x32xf32>
    %123 = tpu.matmul %122, %80, %cst_43 {dimension_numbers = #tpu.dot_dimension_numbers<[1], [1], [0], [0], [0, 0, 1, 0], [], []>} : vector<32x32xbf16>, vector<32x32xbf16>, vector<32x32xf32> -> vector<32x32xf32>
    %124 = arith.addf %123, %62 : vector<32x32xf32>
    %cst_44 = arith.constant dense<0xFF800000> : vector<32xf32>
    %125 = vector.multi_reduction <maximumf>, %124, %cst_44 [1] : vector<32x32xf32> to vector<32xf32>
    %126 = vector.shape_cast %125 : vector<32xf32> to vector<32x1xf32>
    %127 = vector.broadcast %126 : vector<32x1xf32> to vector<32x32xf32>
    %128 = arith.subf %124, %127 : vector<32x32xf32>
    %129 = math.exp %128 : vector<32x32xf32>
    %cst_45 = arith.constant dense<0.000000e+00> : vector<32xf32>
    %130 = vector.multi_reduction <add>, %129, %cst_45 [1] : vector<32x32xf32> to vector<32xf32>
    %131 = vector.shape_cast %130 : vector<32xf32> to vector<32x1xf32>
    %132 = tpu.reciprocal %131 {approx = true} : vector<32x1xf32> -> vector<32x1xf32>
    %133 = vector.broadcast %132 : vector<32x1xf32> to vector<32x32xf32>
    %134 = arith.mulf %129, %133 : vector<32x32xf32>
    %135 = arith.truncf %134 : vector<32x32xf32> to vector<32x32xbf16>
    %136 = vector.broadcast %33 : vector<1x32xbf16> to vector<32x32xbf16>
    %137 = arith.mulf %81, %136 : vector<32x32xbf16>
    %cst_46 = arith.constant dense<0.000000e+00> : vector<32x32xf32>
    %138 = tpu.matmul %135, %137, %cst_46 {dimension_numbers = #tpu.dot_dimension_numbers<[1], [0], [0], [1], [0, 0, 1, 1], [], []>} : vector<32x32xbf16>, vector<32x32xbf16>, vector<32x32xf32> -> vector<32x32xf32>
    %139 = arith.addf %120, %138 : vector<32x32xf32>
    %140 = vector.broadcast %42 : vector<1x32xbf16> to vector<32x32xbf16>
    %141 = arith.mulf %79, %140 : vector<32x32xbf16>
    %cst_47 = arith.constant dense<0.000000e+00> : vector<32x32xf32>
    %142 = tpu.matmul %141, %80, %cst_47 {dimension_numbers = #tpu.dot_dimension_numbers<[1], [1], [0], [0], [0, 0, 1, 0], [], []>} : vector<32x32xbf16>, vector<32x32xbf16>, vector<32x32xf32> -> vector<32x32xf32>
    %143 = arith.addf %142, %62 : vector<32x32xf32>
    %cst_48 = arith.constant dense<0xFF800000> : vector<32xf32>
    %144 = vector.multi_reduction <maximumf>, %143, %cst_48 [1] : vector<32x32xf32> to vector<32xf32>
    %145 = vector.shape_cast %144 : vector<32xf32> to vector<32x1xf32>
    %146 = vector.broadcast %145 : vector<32x1xf32> to vector<32x32xf32>
    %147 = arith.subf %143, %146 : vector<32x32xf32>
    %148 = math.exp %147 : vector<32x32xf32>
    %cst_49 = arith.constant dense<0.000000e+00> : vector<32xf32>
    %149 = vector.multi_reduction <add>, %148, %cst_49 [1] : vector<32x32xf32> to vector<32xf32>
    %150 = vector.shape_cast %149 : vector<32xf32> to vector<32x1xf32>
    %151 = tpu.reciprocal %150 {approx = true} : vector<32x1xf32> -> vector<32x1xf32>
    %152 = vector.broadcast %151 : vector<32x1xf32> to vector<32x32xf32>
    %153 = arith.mulf %148, %152 : vector<32x32xf32>
    %154 = arith.truncf %153 : vector<32x32xf32> to vector<32x32xbf16>
    %155 = vector.broadcast %42 : vector<1x32xbf16> to vector<32x32xbf16>
    %156 = arith.mulf %81, %155 : vector<32x32xbf16>
    %cst_50 = arith.constant dense<0.000000e+00> : vector<32x32xf32>
    %157 = tpu.matmul %154, %156, %cst_50 {dimension_numbers = #tpu.dot_dimension_numbers<[1], [0], [0], [1], [0, 0, 1, 1], [], []>} : vector<32x32xbf16>, vector<32x32xbf16>, vector<32x32xf32> -> vector<32x32xf32>
    %158 = arith.addf %139, %157 : vector<32x32xf32>
    %159 = arith.truncf %158 : vector<32x32xf32> to vector<32x32xbf16>
    %cst_51 = arith.constant dense<0.000000e+00> : vector<32x32xf32>
    %160 = tpu.matmul %159, %76, %cst_51 {dimension_numbers = #tpu.dot_dimension_numbers<[1], [0], [0], [1], [0, 0, 1, 1], [], []>} : vector<32x32xbf16>, vector<32x32xbf16>, vector<32x32xf32> -> vector<32x32xf32>
    %161 = arith.extf %78 : vector<1x32xbf16> to vector<1x32xf32>
    %162 = vector.broadcast %161 : vector<1x32xf32> to vector<32x32xf32>
    %163 = arith.addf %160, %162 : vector<32x32xf32>
    %164 = arith.addf %3, %163 : vector<32x32xf32>
    %c0_52 = arith.constant 0 : index
    %c96 = arith.constant 96 : index
    %c0_53 = arith.constant 0 : index
    %165 = vector.load %arg4[%c0_52, %c96, %c0_53] : memref<2x464x128xbf16, #tpu.memory_space<vmem>>, vector<1x1x32xbf16>
    %166 = vector.shape_cast %165 : vector<1x1x32xbf16> to vector<1x32xbf16>
    %c0_54 = arith.constant 0 : index
    %c112 = arith.constant 112 : index
    %c0_55 = arith.constant 0 : index
    %167 = vector.load %arg4[%c0_54, %c112, %c0_55] : memref<2x464x128xbf16, #tpu.memory_space<vmem>>, vector<1x1x32xbf16>
    %168 = vector.shape_cast %167 : vector<1x1x32xbf16> to vector<1x32xbf16>
    %cst_56 = arith.constant dense<0.000000e+00> : vector<32xf32>
    %169 = vector.multi_reduction <add>, %164, %cst_56 [1] : vector<32x32xf32> to vector<32xf32>
    %170 = vector.shape_cast %169 : vector<32xf32> to vector<32x1xf32>
    %cst_57 = arith.constant 3.200000e+01 : f32
    %171 = vector.broadcast %cst_57 : f32 to vector<32x1xf32>
    %172 = arith.divf %170, %171 : vector<32x1xf32>
    %173 = vector.broadcast %172 : vector<32x1xf32> to vector<32x32xf32>
    %174 = arith.subf %164, %173 : vector<32x32xf32>
    %175 = arith.mulf %174, %174 : vector<32x32xf32>
    %cst_58 = arith.constant dense<0.000000e+00> : vector<32xf32>
    %176 = vector.multi_reduction <add>, %175, %cst_58 [1] : vector<32x32xf32> to vector<32xf32>
    %177 = vector.shape_cast %176 : vector<32xf32> to vector<32x1xf32>
    %cst_59 = arith.constant 3.200000e+01 : f32
    %178 = vector.broadcast %cst_59 : f32 to vector<32x1xf32>
    %179 = arith.divf %177, %178 : vector<32x1xf32>
    %cst_60 = arith.constant 9.99999974E-6 : f32
    %180 = vector.broadcast %cst_60 : f32 to vector<32x1xf32>
    %181 = arith.addf %179, %180 : vector<32x1xf32>
    %182 = math.rsqrt %181 : vector<32x1xf32>
    %183 = vector.broadcast %182 : vector<32x1xf32> to vector<32x32xf32>
    %184 = arith.mulf %174, %183 : vector<32x32xf32>
    %185 = arith.extf %166 : vector<1x32xbf16> to vector<1x32xf32>
    %186 = vector.broadcast %185 : vector<1x32xf32> to vector<32x32xf32>
    %187 = arith.mulf %184, %186 : vector<32x32xf32>
    %188 = arith.extf %168 : vector<1x32xbf16> to vector<1x32xf32>
    %189 = vector.broadcast %188 : vector<1x32xf32> to vector<32x32xf32>
    %190 = arith.addf %187, %189 : vector<32x32xf32>
    %c0_61 = arith.constant 0 : index
    %c128 = arith.constant 128 : index
    %c0_62 = arith.constant 0 : index
    %191 = vector.load %arg4[%c0_61, %c128, %c0_62] : memref<2x464x128xbf16, #tpu.memory_space<vmem>>, vector<1x32x32xbf16>
    %192 = vector.shape_cast %191 : vector<1x32x32xbf16> to vector<32x32xbf16>
    %193 = arith.truncf %190 : vector<32x32xf32> to vector<32x32xbf16>
    %cst_63 = arith.constant dense<0.000000e+00> : vector<32x32xf32>
    %194 = tpu.matmul %193, %192, %cst_63 {dimension_numbers = #tpu.dot_dimension_numbers<[1], [0], [0], [1], [0, 0, 1, 1], [], []>} : vector<32x32xbf16>, vector<32x32xbf16>, vector<32x32xf32> -> vector<32x32xf32>
    %c0_64 = arith.constant 0 : index
    %c160 = arith.constant 160 : index
    %c0_65 = arith.constant 0 : index
    %195 = vector.load %arg4[%c0_64, %c160, %c0_65] : memref<2x464x128xbf16, #tpu.memory_space<vmem>>, vector<1x1x32xbf16>
    %196 = vector.shape_cast %195 : vector<1x1x32xbf16> to vector<1x32xbf16>
    %197 = arith.extf %196 : vector<1x32xbf16> to vector<1x32xf32>
    %198 = vector.broadcast %197 : vector<1x32xf32> to vector<32x32xf32>
    %199 = arith.addf %194, %198 : vector<32x32xf32>
    %c0_66 = arith.constant 0 : index
    %c176 = arith.constant 176 : index
    %c0_67 = arith.constant 0 : index
    %200 = vector.load %arg4[%c0_66, %c176, %c0_67] : memref<2x464x128xbf16, #tpu.memory_space<vmem>>, vector<1x32x64xbf16>
    %201 = vector.shape_cast %200 : vector<1x32x64xbf16> to vector<32x64xbf16>
    %202 = arith.truncf %5 : vector<32x32xf32> to vector<32x32xbf16>
    %cst_68 = arith.constant dense<0.000000e+00> : vector<32x64xf32>
    %203 = tpu.matmul %202, %201, %cst_68 {dimension_numbers = #tpu.dot_dimension_numbers<[1], [0], [0], [1], [0, 0, 1, 1], [], []>} : vector<32x32xbf16>, vector<32x64xbf16>, vector<32x64xf32> -> vector<32x64xf32>
    %c0_69 = arith.constant 0 : index
    %c208 = arith.constant 208 : index
    %c0_70 = arith.constant 0 : index
    %204 = vector.load %arg4[%c0_69, %c208, %c0_70] : memref<2x464x128xbf16, #tpu.memory_space<vmem>>, vector<1x1x64xbf16>
    %205 = vector.shape_cast %204 : vector<1x1x64xbf16> to vector<1x64xbf16>
    %206 = arith.extf %205 : vector<1x64xbf16> to vector<1x64xf32>
    %207 = vector.broadcast %206 : vector<1x64xf32> to vector<32x64xf32>
    %208 = arith.addf %203, %207 : vector<32x64xf32>
    %209 = vector.extract_strided_slice %208 {offsets = [0, 0], sizes = [32, 32], strides = [1, 1]} : vector<32x64xf32> to vector<32x32xf32>
    %210 = vector.extract_strided_slice %208 {offsets = [0, 32], sizes = [32, 32], strides = [1, 1]} : vector<32x64xf32> to vector<32x32xf32>
    %c0_71 = arith.constant 0 : index
    %c224 = arith.constant 224 : index
    %c0_72 = arith.constant 0 : index
    %211 = vector.load %arg4[%c0_71, %c224, %c0_72] : memref<2x464x128xbf16, #tpu.memory_space<vmem>>, vector<1x32x32xbf16>
    %212 = vector.shape_cast %211 : vector<1x32x32xbf16> to vector<32x32xbf16>
    %c0_73 = arith.constant 0 : index
    %c256 = arith.constant 256 : index
    %c0_74 = arith.constant 0 : index
    %213 = vector.load %arg4[%c0_73, %c256, %c0_74] : memref<2x464x128xbf16, #tpu.memory_space<vmem>>, vector<1x1x32xbf16>
    %214 = vector.shape_cast %213 : vector<1x1x32xbf16> to vector<1x32xbf16>
    %215 = arith.truncf %199 : vector<32x32xf32> to vector<32x32xbf16>
    %216 = arith.truncf %209 : vector<32x32xf32> to vector<32x32xbf16>
    %217 = arith.truncf %210 : vector<32x32xf32> to vector<32x32xbf16>
    %cst_75 = arith.constant 0.000000e+00 : f32
    %218 = vector.broadcast %cst_75 : f32 to vector<32x32xf32>
    %219 = vector.broadcast %15 : vector<1x32xbf16> to vector<32x32xbf16>
    %220 = arith.mulf %215, %219 : vector<32x32xbf16>
    %cst_76 = arith.constant dense<0.000000e+00> : vector<32x32xf32>
    %221 = tpu.matmul %220, %216, %cst_76 {dimension_numbers = #tpu.dot_dimension_numbers<[1], [1], [0], [0], [0, 0, 1, 0], [], []>} : vector<32x32xbf16>, vector<32x32xbf16>, vector<32x32xf32> -> vector<32x32xf32>
    %222 = arith.addf %221, %62 : vector<32x32xf32>
    %cst_77 = arith.constant dense<0xFF800000> : vector<32xf32>
    %223 = vector.multi_reduction <maximumf>, %222, %cst_77 [1] : vector<32x32xf32> to vector<32xf32>
    %224 = vector.shape_cast %223 : vector<32xf32> to vector<32x1xf32>
    %225 = vector.broadcast %224 : vector<32x1xf32> to vector<32x32xf32>
    %226 = arith.subf %222, %225 : vector<32x32xf32>
    %227 = math.exp %226 : vector<32x32xf32>
    %cst_78 = arith.constant dense<0.000000e+00> : vector<32xf32>
    %228 = vector.multi_reduction <add>, %227, %cst_78 [1] : vector<32x32xf32> to vector<32xf32>
    %229 = vector.shape_cast %228 : vector<32xf32> to vector<32x1xf32>
    %230 = tpu.reciprocal %229 {approx = true} : vector<32x1xf32> -> vector<32x1xf32>
    %231 = vector.broadcast %230 : vector<32x1xf32> to vector<32x32xf32>
    %232 = arith.mulf %227, %231 : vector<32x32xf32>
    %233 = arith.truncf %232 : vector<32x32xf32> to vector<32x32xbf16>
    %234 = vector.broadcast %15 : vector<1x32xbf16> to vector<32x32xbf16>
    %235 = arith.mulf %217, %234 : vector<32x32xbf16>
    %cst_79 = arith.constant dense<0.000000e+00> : vector<32x32xf32>
    %236 = tpu.matmul %233, %235, %cst_79 {dimension_numbers = #tpu.dot_dimension_numbers<[1], [0], [0], [1], [0, 0, 1, 1], [], []>} : vector<32x32xbf16>, vector<32x32xbf16>, vector<32x32xf32> -> vector<32x32xf32>
    %237 = arith.addf %218, %236 : vector<32x32xf32>
    %238 = vector.broadcast %24 : vector<1x32xbf16> to vector<32x32xbf16>
    %239 = arith.mulf %215, %238 : vector<32x32xbf16>
    %cst_80 = arith.constant dense<0.000000e+00> : vector<32x32xf32>
    %240 = tpu.matmul %239, %216, %cst_80 {dimension_numbers = #tpu.dot_dimension_numbers<[1], [1], [0], [0], [0, 0, 1, 0], [], []>} : vector<32x32xbf16>, vector<32x32xbf16>, vector<32x32xf32> -> vector<32x32xf32>
    %241 = arith.addf %240, %62 : vector<32x32xf32>
    %cst_81 = arith.constant dense<0xFF800000> : vector<32xf32>
    %242 = vector.multi_reduction <maximumf>, %241, %cst_81 [1] : vector<32x32xf32> to vector<32xf32>
    %243 = vector.shape_cast %242 : vector<32xf32> to vector<32x1xf32>
    %244 = vector.broadcast %243 : vector<32x1xf32> to vector<32x32xf32>
    %245 = arith.subf %241, %244 : vector<32x32xf32>
    %246 = math.exp %245 : vector<32x32xf32>
    %cst_82 = arith.constant dense<0.000000e+00> : vector<32xf32>
    %247 = vector.multi_reduction <add>, %246, %cst_82 [1] : vector<32x32xf32> to vector<32xf32>
    %248 = vector.shape_cast %247 : vector<32xf32> to vector<32x1xf32>
    %249 = tpu.reciprocal %248 {approx = true} : vector<32x1xf32> -> vector<32x1xf32>
    %250 = vector.broadcast %249 : vector<32x1xf32> to vector<32x32xf32>
    %251 = arith.mulf %246, %250 : vector<32x32xf32>
    %252 = arith.truncf %251 : vector<32x32xf32> to vector<32x32xbf16>
    %253 = vector.broadcast %24 : vector<1x32xbf16> to vector<32x32xbf16>
    %254 = arith.mulf %217, %253 : vector<32x32xbf16>
    %cst_83 = arith.constant dense<0.000000e+00> : vector<32x32xf32>
    %255 = tpu.matmul %252, %254, %cst_83 {dimension_numbers = #tpu.dot_dimension_numbers<[1], [0], [0], [1], [0, 0, 1, 1], [], []>} : vector<32x32xbf16>, vector<32x32xbf16>, vector<32x32xf32> -> vector<32x32xf32>
    %256 = arith.addf %237, %255 : vector<32x32xf32>
    %257 = vector.broadcast %33 : vector<1x32xbf16> to vector<32x32xbf16>
    %258 = arith.mulf %215, %257 : vector<32x32xbf16>
    %cst_84 = arith.constant dense<0.000000e+00> : vector<32x32xf32>
    %259 = tpu.matmul %258, %216, %cst_84 {dimension_numbers = #tpu.dot_dimension_numbers<[1], [1], [0], [0], [0, 0, 1, 0], [], []>} : vector<32x32xbf16>, vector<32x32xbf16>, vector<32x32xf32> -> vector<32x32xf32>
    %260 = arith.addf %259, %62 : vector<32x32xf32>
    %cst_85 = arith.constant dense<0xFF800000> : vector<32xf32>
    %261 = vector.multi_reduction <maximumf>, %260, %cst_85 [1] : vector<32x32xf32> to vector<32xf32>
    %262 = vector.shape_cast %261 : vector<32xf32> to vector<32x1xf32>
    %263 = vector.broadcast %262 : vector<32x1xf32> to vector<32x32xf32>
    %264 = arith.subf %260, %263 : vector<32x32xf32>
    %265 = math.exp %264 : vector<32x32xf32>
    %cst_86 = arith.constant dense<0.000000e+00> : vector<32xf32>
    %266 = vector.multi_reduction <add>, %265, %cst_86 [1] : vector<32x32xf32> to vector<32xf32>
    %267 = vector.shape_cast %266 : vector<32xf32> to vector<32x1xf32>
    %268 = tpu.reciprocal %267 {approx = true} : vector<32x1xf32> -> vector<32x1xf32>
    %269 = vector.broadcast %268 : vector<32x1xf32> to vector<32x32xf32>
    %270 = arith.mulf %265, %269 : vector<32x32xf32>
    %271 = arith.truncf %270 : vector<32x32xf32> to vector<32x32xbf16>
    %272 = vector.broadcast %33 : vector<1x32xbf16> to vector<32x32xbf16>
    %273 = arith.mulf %217, %272 : vector<32x32xbf16>
    %cst_87 = arith.constant dense<0.000000e+00> : vector<32x32xf32>
    %274 = tpu.matmul %271, %273, %cst_87 {dimension_numbers = #tpu.dot_dimension_numbers<[1], [0], [0], [1], [0, 0, 1, 1], [], []>} : vector<32x32xbf16>, vector<32x32xbf16>, vector<32x32xf32> -> vector<32x32xf32>
    %275 = arith.addf %256, %274 : vector<32x32xf32>
    %276 = vector.broadcast %42 : vector<1x32xbf16> to vector<32x32xbf16>
    %277 = arith.mulf %215, %276 : vector<32x32xbf16>
    %cst_88 = arith.constant dense<0.000000e+00> : vector<32x32xf32>
    %278 = tpu.matmul %277, %216, %cst_88 {dimension_numbers = #tpu.dot_dimension_numbers<[1], [1], [0], [0], [0, 0, 1, 0], [], []>} : vector<32x32xbf16>, vector<32x32xbf16>, vector<32x32xf32> -> vector<32x32xf32>
    %279 = arith.addf %278, %62 : vector<32x32xf32>
    %cst_89 = arith.constant dense<0xFF800000> : vector<32xf32>
    %280 = vector.multi_reduction <maximumf>, %279, %cst_89 [1] : vector<32x32xf32> to vector<32xf32>
    %281 = vector.shape_cast %280 : vector<32xf32> to vector<32x1xf32>
    %282 = vector.broadcast %281 : vector<32x1xf32> to vector<32x32xf32>
    %283 = arith.subf %279, %282 : vector<32x32xf32>
    %284 = math.exp %283 : vector<32x32xf32>
    %cst_90 = arith.constant dense<0.000000e+00> : vector<32xf32>
    %285 = vector.multi_reduction <add>, %284, %cst_90 [1] : vector<32x32xf32> to vector<32xf32>
    %286 = vector.shape_cast %285 : vector<32xf32> to vector<32x1xf32>
    %287 = tpu.reciprocal %286 {approx = true} : vector<32x1xf32> -> vector<32x1xf32>
    %288 = vector.broadcast %287 : vector<32x1xf32> to vector<32x32xf32>
    %289 = arith.mulf %284, %288 : vector<32x32xf32>
    %290 = arith.truncf %289 : vector<32x32xf32> to vector<32x32xbf16>
    %291 = vector.broadcast %42 : vector<1x32xbf16> to vector<32x32xbf16>
    %292 = arith.mulf %217, %291 : vector<32x32xbf16>
    %cst_91 = arith.constant dense<0.000000e+00> : vector<32x32xf32>
    %293 = tpu.matmul %290, %292, %cst_91 {dimension_numbers = #tpu.dot_dimension_numbers<[1], [0], [0], [1], [0, 0, 1, 1], [], []>} : vector<32x32xbf16>, vector<32x32xbf16>, vector<32x32xf32> -> vector<32x32xf32>
    %294 = arith.addf %275, %293 : vector<32x32xf32>
    %295 = arith.truncf %294 : vector<32x32xf32> to vector<32x32xbf16>
    %cst_92 = arith.constant dense<0.000000e+00> : vector<32x32xf32>
    %296 = tpu.matmul %295, %212, %cst_92 {dimension_numbers = #tpu.dot_dimension_numbers<[1], [0], [0], [1], [0, 0, 1, 1], [], []>} : vector<32x32xbf16>, vector<32x32xbf16>, vector<32x32xf32> -> vector<32x32xf32>
    %297 = arith.extf %214 : vector<1x32xbf16> to vector<1x32xf32>
    %298 = vector.broadcast %297 : vector<1x32xf32> to vector<32x32xf32>
    %299 = arith.addf %296, %298 : vector<32x32xf32>
    %300 = arith.addf %190, %299 : vector<32x32xf32>
    %c0_93 = arith.constant 0 : index
    %c272 = arith.constant 272 : index
    %c0_94 = arith.constant 0 : index
    %301 = vector.load %arg4[%c0_93, %c272, %c0_94] : memref<2x464x128xbf16, #tpu.memory_space<vmem>>, vector<1x1x32xbf16>
    %302 = vector.shape_cast %301 : vector<1x1x32xbf16> to vector<1x32xbf16>
    %c0_95 = arith.constant 0 : index
    %c288 = arith.constant 288 : index
    %c0_96 = arith.constant 0 : index
    %303 = vector.load %arg4[%c0_95, %c288, %c0_96] : memref<2x464x128xbf16, #tpu.memory_space<vmem>>, vector<1x1x32xbf16>
    %304 = vector.shape_cast %303 : vector<1x1x32xbf16> to vector<1x32xbf16>
    %cst_97 = arith.constant dense<0.000000e+00> : vector<32xf32>
    %305 = vector.multi_reduction <add>, %300, %cst_97 [1] : vector<32x32xf32> to vector<32xf32>
    %306 = vector.shape_cast %305 : vector<32xf32> to vector<32x1xf32>
    %cst_98 = arith.constant 3.200000e+01 : f32
    %307 = vector.broadcast %cst_98 : f32 to vector<32x1xf32>
    %308 = arith.divf %306, %307 : vector<32x1xf32>
    %309 = vector.broadcast %308 : vector<32x1xf32> to vector<32x32xf32>
    %310 = arith.subf %300, %309 : vector<32x32xf32>
    %311 = arith.mulf %310, %310 : vector<32x32xf32>
    %cst_99 = arith.constant dense<0.000000e+00> : vector<32xf32>
    %312 = vector.multi_reduction <add>, %311, %cst_99 [1] : vector<32x32xf32> to vector<32xf32>
    %313 = vector.shape_cast %312 : vector<32xf32> to vector<32x1xf32>
    %cst_100 = arith.constant 3.200000e+01 : f32
    %314 = vector.broadcast %cst_100 : f32 to vector<32x1xf32>
    %315 = arith.divf %313, %314 : vector<32x1xf32>
    %cst_101 = arith.constant 9.99999974E-6 : f32
    %316 = vector.broadcast %cst_101 : f32 to vector<32x1xf32>
    %317 = arith.addf %315, %316 : vector<32x1xf32>
    %318 = math.rsqrt %317 : vector<32x1xf32>
    %319 = vector.broadcast %318 : vector<32x1xf32> to vector<32x32xf32>
    %320 = arith.mulf %310, %319 : vector<32x32xf32>
    %321 = arith.extf %302 : vector<1x32xbf16> to vector<1x32xf32>
    %322 = vector.broadcast %321 : vector<1x32xf32> to vector<32x32xf32>
    %323 = arith.mulf %320, %322 : vector<32x32xf32>
    %324 = arith.extf %304 : vector<1x32xbf16> to vector<1x32xf32>
    %325 = vector.broadcast %324 : vector<1x32xf32> to vector<32x32xf32>
    %326 = arith.addf %323, %325 : vector<32x32xf32>
    %c0_102 = arith.constant 0 : index
    %c304 = arith.constant 304 : index
    %c0_103 = arith.constant 0 : index
    %327 = vector.load %arg4[%c0_102, %c304, %c0_103] : memref<2x464x128xbf16, #tpu.memory_space<vmem>>, vector<1x32x64xbf16>
    %328 = vector.shape_cast %327 : vector<1x32x64xbf16> to vector<32x64xbf16>
    %329 = arith.truncf %326 : vector<32x32xf32> to vector<32x32xbf16>
    %cst_104 = arith.constant dense<0.000000e+00> : vector<32x64xf32>
    %330 = tpu.matmul %329, %328, %cst_104 {dimension_numbers = #tpu.dot_dimension_numbers<[1], [0], [0], [1], [0, 0, 1, 1], [], []>} : vector<32x32xbf16>, vector<32x64xbf16>, vector<32x64xf32> -> vector<32x64xf32>
    %c0_105 = arith.constant 0 : index
    %c336 = arith.constant 336 : index
    %c0_106 = arith.constant 0 : index
    %331 = vector.load %arg4[%c0_105, %c336, %c0_106] : memref<2x464x128xbf16, #tpu.memory_space<vmem>>, vector<1x1x64xbf16>
    %332 = vector.shape_cast %331 : vector<1x1x64xbf16> to vector<1x64xbf16>
    %333 = arith.extf %332 : vector<1x64xbf16> to vector<1x64xf32>
    %334 = vector.broadcast %333 : vector<1x64xf32> to vector<32x64xf32>
    %335 = arith.addf %330, %334 : vector<32x64xf32>
    %cst_107 = arith.constant 0.000000e+00 : f32
    %336 = vector.broadcast %cst_107 : f32 to vector<32x64xf32>
    %337 = arith.maximumf %335, %336 : vector<32x64xf32>
    %c0_108 = arith.constant 0 : index
    %c352 = arith.constant 352 : index
    %c0_109 = arith.constant 0 : index
    %338 = vector.load %arg4[%c0_108, %c352, %c0_109] : memref<2x464x128xbf16, #tpu.memory_space<vmem>>, vector<1x64x32xbf16>
    %339 = vector.shape_cast %338 : vector<1x64x32xbf16> to vector<64x32xbf16>
    %340 = arith.truncf %337 : vector<32x64xf32> to vector<32x64xbf16>
    %cst_110 = arith.constant dense<0.000000e+00> : vector<32x32xf32>
    %341 = tpu.matmul %340, %339, %cst_110 {dimension_numbers = #tpu.dot_dimension_numbers<[1], [0], [0], [1], [0, 0, 1, 1], [], []>} : vector<32x64xbf16>, vector<64x32xbf16>, vector<32x32xf32> -> vector<32x32xf32>
    %c0_111 = arith.constant 0 : index
    %c416 = arith.constant 416 : index
    %c0_112 = arith.constant 0 : index
    %342 = vector.load %arg4[%c0_111, %c416, %c0_112] : memref<2x464x128xbf16, #tpu.memory_space<vmem>>, vector<1x1x32xbf16>
    %343 = vector.shape_cast %342 : vector<1x1x32xbf16> to vector<1x32xbf16>
    %344 = arith.extf %343 : vector<1x32xbf16> to vector<1x32xf32>
    %345 = vector.broadcast %344 : vector<1x32xf32> to vector<32x32xf32>
    %346 = arith.addf %341, %345 : vector<32x32xf32>
    %347 = arith.addf %326, %346 : vector<32x32xf32>
    %c0_113 = arith.constant 0 : index
    %c432 = arith.constant 432 : index
    %c0_114 = arith.constant 0 : index
    %348 = vector.load %arg4[%c0_113, %c432, %c0_114] : memref<2x464x128xbf16, #tpu.memory_space<vmem>>, vector<1x1x32xbf16>
    %349 = vector.shape_cast %348 : vector<1x1x32xbf16> to vector<1x32xbf16>
    %c0_115 = arith.constant 0 : index
    %c448 = arith.constant 448 : index
    %c0_116 = arith.constant 0 : index
    %350 = vector.load %arg4[%c0_115, %c448, %c0_116] : memref<2x464x128xbf16, #tpu.memory_space<vmem>>, vector<1x1x32xbf16>
    %351 = vector.shape_cast %350 : vector<1x1x32xbf16> to vector<1x32xbf16>
    %cst_117 = arith.constant dense<0.000000e+00> : vector<32xf32>
    %352 = vector.multi_reduction <add>, %347, %cst_117 [1] : vector<32x32xf32> to vector<32xf32>
    %353 = vector.shape_cast %352 : vector<32xf32> to vector<32x1xf32>
    %cst_118 = arith.constant 3.200000e+01 : f32
    %354 = vector.broadcast %cst_118 : f32 to vector<32x1xf32>
    %355 = arith.divf %353, %354 : vector<32x1xf32>
    %356 = vector.broadcast %355 : vector<32x1xf32> to vector<32x32xf32>
    %357 = arith.subf %347, %356 : vector<32x32xf32>
    %358 = arith.mulf %357, %357 : vector<32x32xf32>
    %cst_119 = arith.constant dense<0.000000e+00> : vector<32xf32>
    %359 = vector.multi_reduction <add>, %358, %cst_119 [1] : vector<32x32xf32> to vector<32xf32>
    %360 = vector.shape_cast %359 : vector<32xf32> to vector<32x1xf32>
    %cst_120 = arith.constant 3.200000e+01 : f32
    %361 = vector.broadcast %cst_120 : f32 to vector<32x1xf32>
    %362 = arith.divf %360, %361 : vector<32x1xf32>
    %cst_121 = arith.constant 9.99999974E-6 : f32
    %363 = vector.broadcast %cst_121 : f32 to vector<32x1xf32>
    %364 = arith.addf %362, %363 : vector<32x1xf32>
    %365 = math.rsqrt %364 : vector<32x1xf32>
    %366 = vector.broadcast %365 : vector<32x1xf32> to vector<32x32xf32>
    %367 = arith.mulf %357, %366 : vector<32x32xf32>
    %368 = arith.extf %349 : vector<1x32xbf16> to vector<1x32xf32>
    %369 = vector.broadcast %368 : vector<1x32xf32> to vector<32x32xf32>
    %370 = arith.mulf %367, %369 : vector<32x32xf32>
    %371 = arith.extf %351 : vector<1x32xbf16> to vector<1x32xf32>
    %372 = vector.broadcast %371 : vector<1x32xf32> to vector<32x32xf32>
    %373 = arith.addf %370, %372 : vector<32x32xf32>
    %c1 = arith.constant 1 : index
    %c0_122 = arith.constant 0 : index
    %c0_123 = arith.constant 0 : index
    %374 = vector.load %arg4[%c1, %c0_122, %c0_123] : memref<2x464x128xbf16, #tpu.memory_space<vmem>>, vector<1x32x96xbf16>
    %375 = vector.shape_cast %374 : vector<1x32x96xbf16> to vector<32x96xbf16>
    %376 = arith.truncf %373 : vector<32x32xf32> to vector<32x32xbf16>
    %cst_124 = arith.constant dense<0.000000e+00> : vector<32x96xf32>
    %377 = tpu.matmul %376, %375, %cst_124 {dimension_numbers = #tpu.dot_dimension_numbers<[1], [0], [0], [1], [0, 0, 1, 1], [], []>} : vector<32x32xbf16>, vector<32x96xbf16>, vector<32x96xf32> -> vector<32x96xf32>
    %c1_125 = arith.constant 1 : index
    %c32_126 = arith.constant 32 : index
    %c0_127 = arith.constant 0 : index
    %378 = vector.load %arg4[%c1_125, %c32_126, %c0_127] : memref<2x464x128xbf16, #tpu.memory_space<vmem>>, vector<1x1x96xbf16>
    %379 = vector.shape_cast %378 : vector<1x1x96xbf16> to vector<1x96xbf16>
    %380 = arith.extf %379 : vector<1x96xbf16> to vector<1x96xf32>
    %381 = vector.broadcast %380 : vector<1x96xf32> to vector<32x96xf32>
    %382 = arith.addf %377, %381 : vector<32x96xf32>
    %383 = vector.extract_strided_slice %382 {offsets = [0, 0], sizes = [32, 32], strides = [1, 1]} : vector<32x96xf32> to vector<32x32xf32>
    %384 = vector.extract_strided_slice %382 {offsets = [0, 32], sizes = [32, 32], strides = [1, 1]} : vector<32x96xf32> to vector<32x32xf32>
    %385 = vector.extract_strided_slice %382 {offsets = [0, 64], sizes = [32, 32], strides = [1, 1]} : vector<32x96xf32> to vector<32x32xf32>
    %c1_128 = arith.constant 1 : index
    %c48_129 = arith.constant 48 : index
    %c0_130 = arith.constant 0 : index
    %386 = vector.load %arg4[%c1_128, %c48_129, %c0_130] : memref<2x464x128xbf16, #tpu.memory_space<vmem>>, vector<1x32x32xbf16>
    %387 = vector.shape_cast %386 : vector<1x32x32xbf16> to vector<32x32xbf16>
    %c1_131 = arith.constant 1 : index
    %c80_132 = arith.constant 80 : index
    %c0_133 = arith.constant 0 : index
    %388 = vector.load %arg4[%c1_131, %c80_132, %c0_133] : memref<2x464x128xbf16, #tpu.memory_space<vmem>>, vector<1x1x32xbf16>
    %389 = vector.shape_cast %388 : vector<1x1x32xbf16> to vector<1x32xbf16>
    %390 = arith.truncf %383 : vector<32x32xf32> to vector<32x32xbf16>
    %391 = arith.truncf %384 : vector<32x32xf32> to vector<32x32xbf16>
    %392 = arith.truncf %385 : vector<32x32xf32> to vector<32x32xbf16>
    %cst_134 = arith.constant 0.000000e+00 : f32
    %393 = vector.broadcast %cst_134 : f32 to vector<32x32xf32>
    %394 = vector.broadcast %15 : vector<1x32xbf16> to vector<32x32xbf16>
    %395 = arith.mulf %390, %394 : vector<32x32xbf16>
    %cst_135 = arith.constant dense<0.000000e+00> : vector<32x32xf32>
    %396 = tpu.matmul %395, %391, %cst_135 {dimension_numbers = #tpu.dot_dimension_numbers<[1], [1], [0], [0], [0, 0, 1, 0], [], []>} : vector<32x32xbf16>, vector<32x32xbf16>, vector<32x32xf32> -> vector<32x32xf32>
    %397 = arith.addf %396, %62 : vector<32x32xf32>
    %cst_136 = arith.constant dense<0xFF800000> : vector<32xf32>
    %398 = vector.multi_reduction <maximumf>, %397, %cst_136 [1] : vector<32x32xf32> to vector<32xf32>
    %399 = vector.shape_cast %398 : vector<32xf32> to vector<32x1xf32>
    %400 = vector.broadcast %399 : vector<32x1xf32> to vector<32x32xf32>
    %401 = arith.subf %397, %400 : vector<32x32xf32>
    %402 = math.exp %401 : vector<32x32xf32>
    %cst_137 = arith.constant dense<0.000000e+00> : vector<32xf32>
    %403 = vector.multi_reduction <add>, %402, %cst_137 [1] : vector<32x32xf32> to vector<32xf32>
    %404 = vector.shape_cast %403 : vector<32xf32> to vector<32x1xf32>
    %405 = tpu.reciprocal %404 {approx = true} : vector<32x1xf32> -> vector<32x1xf32>
    %406 = vector.broadcast %405 : vector<32x1xf32> to vector<32x32xf32>
    %407 = arith.mulf %402, %406 : vector<32x32xf32>
    %408 = arith.truncf %407 : vector<32x32xf32> to vector<32x32xbf16>
    %409 = vector.broadcast %15 : vector<1x32xbf16> to vector<32x32xbf16>
    %410 = arith.mulf %392, %409 : vector<32x32xbf16>
    %cst_138 = arith.constant dense<0.000000e+00> : vector<32x32xf32>
    %411 = tpu.matmul %408, %410, %cst_138 {dimension_numbers = #tpu.dot_dimension_numbers<[1], [0], [0], [1], [0, 0, 1, 1], [], []>} : vector<32x32xbf16>, vector<32x32xbf16>, vector<32x32xf32> -> vector<32x32xf32>
    %412 = arith.addf %393, %411 : vector<32x32xf32>
    %413 = vector.broadcast %24 : vector<1x32xbf16> to vector<32x32xbf16>
    %414 = arith.mulf %390, %413 : vector<32x32xbf16>
    %cst_139 = arith.constant dense<0.000000e+00> : vector<32x32xf32>
    %415 = tpu.matmul %414, %391, %cst_139 {dimension_numbers = #tpu.dot_dimension_numbers<[1], [1], [0], [0], [0, 0, 1, 0], [], []>} : vector<32x32xbf16>, vector<32x32xbf16>, vector<32x32xf32> -> vector<32x32xf32>
    %416 = arith.addf %415, %62 : vector<32x32xf32>
    %cst_140 = arith.constant dense<0xFF800000> : vector<32xf32>
    %417 = vector.multi_reduction <maximumf>, %416, %cst_140 [1] : vector<32x32xf32> to vector<32xf32>
    %418 = vector.shape_cast %417 : vector<32xf32> to vector<32x1xf32>
    %419 = vector.broadcast %418 : vector<32x1xf32> to vector<32x32xf32>
    %420 = arith.subf %416, %419 : vector<32x32xf32>
    %421 = math.exp %420 : vector<32x32xf32>
    %cst_141 = arith.constant dense<0.000000e+00> : vector<32xf32>
    %422 = vector.multi_reduction <add>, %421, %cst_141 [1] : vector<32x32xf32> to vector<32xf32>
    %423 = vector.shape_cast %422 : vector<32xf32> to vector<32x1xf32>
    %424 = tpu.reciprocal %423 {approx = true} : vector<32x1xf32> -> vector<32x1xf32>
    %425 = vector.broadcast %424 : vector<32x1xf32> to vector<32x32xf32>
    %426 = arith.mulf %421, %425 : vector<32x32xf32>
    %427 = arith.truncf %426 : vector<32x32xf32> to vector<32x32xbf16>
    %428 = vector.broadcast %24 : vector<1x32xbf16> to vector<32x32xbf16>
    %429 = arith.mulf %392, %428 : vector<32x32xbf16>
    %cst_142 = arith.constant dense<0.000000e+00> : vector<32x32xf32>
    %430 = tpu.matmul %427, %429, %cst_142 {dimension_numbers = #tpu.dot_dimension_numbers<[1], [0], [0], [1], [0, 0, 1, 1], [], []>} : vector<32x32xbf16>, vector<32x32xbf16>, vector<32x32xf32> -> vector<32x32xf32>
    %431 = arith.addf %412, %430 : vector<32x32xf32>
    %432 = vector.broadcast %33 : vector<1x32xbf16> to vector<32x32xbf16>
    %433 = arith.mulf %390, %432 : vector<32x32xbf16>
    %cst_143 = arith.constant dense<0.000000e+00> : vector<32x32xf32>
    %434 = tpu.matmul %433, %391, %cst_143 {dimension_numbers = #tpu.dot_dimension_numbers<[1], [1], [0], [0], [0, 0, 1, 0], [], []>} : vector<32x32xbf16>, vector<32x32xbf16>, vector<32x32xf32> -> vector<32x32xf32>
    %435 = arith.addf %434, %62 : vector<32x32xf32>
    %cst_144 = arith.constant dense<0xFF800000> : vector<32xf32>
    %436 = vector.multi_reduction <maximumf>, %435, %cst_144 [1] : vector<32x32xf32> to vector<32xf32>
    %437 = vector.shape_cast %436 : vector<32xf32> to vector<32x1xf32>
    %438 = vector.broadcast %437 : vector<32x1xf32> to vector<32x32xf32>
    %439 = arith.subf %435, %438 : vector<32x32xf32>
    %440 = math.exp %439 : vector<32x32xf32>
    %cst_145 = arith.constant dense<0.000000e+00> : vector<32xf32>
    %441 = vector.multi_reduction <add>, %440, %cst_145 [1] : vector<32x32xf32> to vector<32xf32>
    %442 = vector.shape_cast %441 : vector<32xf32> to vector<32x1xf32>
    %443 = tpu.reciprocal %442 {approx = true} : vector<32x1xf32> -> vector<32x1xf32>
    %444 = vector.broadcast %443 : vector<32x1xf32> to vector<32x32xf32>
    %445 = arith.mulf %440, %444 : vector<32x32xf32>
    %446 = arith.truncf %445 : vector<32x32xf32> to vector<32x32xbf16>
    %447 = vector.broadcast %33 : vector<1x32xbf16> to vector<32x32xbf16>
    %448 = arith.mulf %392, %447 : vector<32x32xbf16>
    %cst_146 = arith.constant dense<0.000000e+00> : vector<32x32xf32>
    %449 = tpu.matmul %446, %448, %cst_146 {dimension_numbers = #tpu.dot_dimension_numbers<[1], [0], [0], [1], [0, 0, 1, 1], [], []>} : vector<32x32xbf16>, vector<32x32xbf16>, vector<32x32xf32> -> vector<32x32xf32>
    %450 = arith.addf %431, %449 : vector<32x32xf32>
    %451 = vector.broadcast %42 : vector<1x32xbf16> to vector<32x32xbf16>
    %452 = arith.mulf %390, %451 : vector<32x32xbf16>
    %cst_147 = arith.constant dense<0.000000e+00> : vector<32x32xf32>
    %453 = tpu.matmul %452, %391, %cst_147 {dimension_numbers = #tpu.dot_dimension_numbers<[1], [1], [0], [0], [0, 0, 1, 0], [], []>} : vector<32x32xbf16>, vector<32x32xbf16>, vector<32x32xf32> -> vector<32x32xf32>
    %454 = arith.addf %453, %62 : vector<32x32xf32>
    %cst_148 = arith.constant dense<0xFF800000> : vector<32xf32>
    %455 = vector.multi_reduction <maximumf>, %454, %cst_148 [1] : vector<32x32xf32> to vector<32xf32>
    %456 = vector.shape_cast %455 : vector<32xf32> to vector<32x1xf32>
    %457 = vector.broadcast %456 : vector<32x1xf32> to vector<32x32xf32>
    %458 = arith.subf %454, %457 : vector<32x32xf32>
    %459 = math.exp %458 : vector<32x32xf32>
    %cst_149 = arith.constant dense<0.000000e+00> : vector<32xf32>
    %460 = vector.multi_reduction <add>, %459, %cst_149 [1] : vector<32x32xf32> to vector<32xf32>
    %461 = vector.shape_cast %460 : vector<32xf32> to vector<32x1xf32>
    %462 = tpu.reciprocal %461 {approx = true} : vector<32x1xf32> -> vector<32x1xf32>
    %463 = vector.broadcast %462 : vector<32x1xf32> to vector<32x32xf32>
    %464 = arith.mulf %459, %463 : vector<32x32xf32>
    %465 = arith.truncf %464 : vector<32x32xf32> to vector<32x32xbf16>
    %466 = vector.broadcast %42 : vector<1x32xbf16> to vector<32x32xbf16>
    %467 = arith.mulf %392, %466 : vector<32x32xbf16>
    %cst_150 = arith.constant dense<0.000000e+00> : vector<32x32xf32>
    %468 = tpu.matmul %465, %467, %cst_150 {dimension_numbers = #tpu.dot_dimension_numbers<[1], [0], [0], [1], [0, 0, 1, 1], [], []>} : vector<32x32xbf16>, vector<32x32xbf16>, vector<32x32xf32> -> vector<32x32xf32>
    %469 = arith.addf %450, %468 : vector<32x32xf32>
    %470 = arith.truncf %469 : vector<32x32xf32> to vector<32x32xbf16>
    %cst_151 = arith.constant dense<0.000000e+00> : vector<32x32xf32>
    %471 = tpu.matmul %470, %387, %cst_151 {dimension_numbers = #tpu.dot_dimension_numbers<[1], [0], [0], [1], [0, 0, 1, 1], [], []>} : vector<32x32xbf16>, vector<32x32xbf16>, vector<32x32xf32> -> vector<32x32xf32>
    %472 = arith.extf %389 : vector<1x32xbf16> to vector<1x32xf32>
    %473 = vector.broadcast %472 : vector<1x32xf32> to vector<32x32xf32>
    %474 = arith.addf %471, %473 : vector<32x32xf32>
    %475 = arith.addf %373, %474 : vector<32x32xf32>
    %c1_152 = arith.constant 1 : index
    %c96_153 = arith.constant 96 : index
    %c0_154 = arith.constant 0 : index
    %476 = vector.load %arg4[%c1_152, %c96_153, %c0_154] : memref<2x464x128xbf16, #tpu.memory_space<vmem>>, vector<1x1x32xbf16>
    %477 = vector.shape_cast %476 : vector<1x1x32xbf16> to vector<1x32xbf16>
    %c1_155 = arith.constant 1 : index
    %c112_156 = arith.constant 112 : index
    %c0_157 = arith.constant 0 : index
    %478 = vector.load %arg4[%c1_155, %c112_156, %c0_157] : memref<2x464x128xbf16, #tpu.memory_space<vmem>>, vector<1x1x32xbf16>
    %479 = vector.shape_cast %478 : vector<1x1x32xbf16> to vector<1x32xbf16>
    %cst_158 = arith.constant dense<0.000000e+00> : vector<32xf32>
    %480 = vector.multi_reduction <add>, %475, %cst_158 [1] : vector<32x32xf32> to vector<32xf32>
    %481 = vector.shape_cast %480 : vector<32xf32> to vector<32x1xf32>
    %cst_159 = arith.constant 3.200000e+01 : f32
    %482 = vector.broadcast %cst_159 : f32 to vector<32x1xf32>
    %483 = arith.divf %481, %482 : vector<32x1xf32>
    %484 = vector.broadcast %483 : vector<32x1xf32> to vector<32x32xf32>
    %485 = arith.subf %475, %484 : vector<32x32xf32>
    %486 = arith.mulf %485, %485 : vector<32x32xf32>
    %cst_160 = arith.constant dense<0.000000e+00> : vector<32xf32>
    %487 = vector.multi_reduction <add>, %486, %cst_160 [1] : vector<32x32xf32> to vector<32xf32>
    %488 = vector.shape_cast %487 : vector<32xf32> to vector<32x1xf32>
    %cst_161 = arith.constant 3.200000e+01 : f32
    %489 = vector.broadcast %cst_161 : f32 to vector<32x1xf32>
    %490 = arith.divf %488, %489 : vector<32x1xf32>
    %cst_162 = arith.constant 9.99999974E-6 : f32
    %491 = vector.broadcast %cst_162 : f32 to vector<32x1xf32>
    %492 = arith.addf %490, %491 : vector<32x1xf32>
    %493 = math.rsqrt %492 : vector<32x1xf32>
    %494 = vector.broadcast %493 : vector<32x1xf32> to vector<32x32xf32>
    %495 = arith.mulf %485, %494 : vector<32x32xf32>
    %496 = arith.extf %477 : vector<1x32xbf16> to vector<1x32xf32>
    %497 = vector.broadcast %496 : vector<1x32xf32> to vector<32x32xf32>
    %498 = arith.mulf %495, %497 : vector<32x32xf32>
    %499 = arith.extf %479 : vector<1x32xbf16> to vector<1x32xf32>
    %500 = vector.broadcast %499 : vector<1x32xf32> to vector<32x32xf32>
    %501 = arith.addf %498, %500 : vector<32x32xf32>
    %c1_163 = arith.constant 1 : index
    %c128_164 = arith.constant 128 : index
    %c0_165 = arith.constant 0 : index
    %502 = vector.load %arg4[%c1_163, %c128_164, %c0_165] : memref<2x464x128xbf16, #tpu.memory_space<vmem>>, vector<1x32x32xbf16>
    %503 = vector.shape_cast %502 : vector<1x32x32xbf16> to vector<32x32xbf16>
    %504 = arith.truncf %501 : vector<32x32xf32> to vector<32x32xbf16>
    %cst_166 = arith.constant dense<0.000000e+00> : vector<32x32xf32>
    %505 = tpu.matmul %504, %503, %cst_166 {dimension_numbers = #tpu.dot_dimension_numbers<[1], [0], [0], [1], [0, 0, 1, 1], [], []>} : vector<32x32xbf16>, vector<32x32xbf16>, vector<32x32xf32> -> vector<32x32xf32>
    %c1_167 = arith.constant 1 : index
    %c160_168 = arith.constant 160 : index
    %c0_169 = arith.constant 0 : index
    %506 = vector.load %arg4[%c1_167, %c160_168, %c0_169] : memref<2x464x128xbf16, #tpu.memory_space<vmem>>, vector<1x1x32xbf16>
    %507 = vector.shape_cast %506 : vector<1x1x32xbf16> to vector<1x32xbf16>
    %508 = arith.extf %507 : vector<1x32xbf16> to vector<1x32xf32>
    %509 = vector.broadcast %508 : vector<1x32xf32> to vector<32x32xf32>
    %510 = arith.addf %505, %509 : vector<32x32xf32>
    %c1_170 = arith.constant 1 : index
    %c176_171 = arith.constant 176 : index
    %c0_172 = arith.constant 0 : index
    %511 = vector.load %arg4[%c1_170, %c176_171, %c0_172] : memref<2x464x128xbf16, #tpu.memory_space<vmem>>, vector<1x32x64xbf16>
    %512 = vector.shape_cast %511 : vector<1x32x64xbf16> to vector<32x64xbf16>
    %513 = arith.truncf %5 : vector<32x32xf32> to vector<32x32xbf16>
    %cst_173 = arith.constant dense<0.000000e+00> : vector<32x64xf32>
    %514 = tpu.matmul %513, %512, %cst_173 {dimension_numbers = #tpu.dot_dimension_numbers<[1], [0], [0], [1], [0, 0, 1, 1], [], []>} : vector<32x32xbf16>, vector<32x64xbf16>, vector<32x64xf32> -> vector<32x64xf32>
    %c1_174 = arith.constant 1 : index
    %c208_175 = arith.constant 208 : index
    %c0_176 = arith.constant 0 : index
    %515 = vector.load %arg4[%c1_174, %c208_175, %c0_176] : memref<2x464x128xbf16, #tpu.memory_space<vmem>>, vector<1x1x64xbf16>
    %516 = vector.shape_cast %515 : vector<1x1x64xbf16> to vector<1x64xbf16>
    %517 = arith.extf %516 : vector<1x64xbf16> to vector<1x64xf32>
    %518 = vector.broadcast %517 : vector<1x64xf32> to vector<32x64xf32>
    %519 = arith.addf %514, %518 : vector<32x64xf32>
    %520 = vector.extract_strided_slice %519 {offsets = [0, 0], sizes = [32, 32], strides = [1, 1]} : vector<32x64xf32> to vector<32x32xf32>
    %521 = vector.extract_strided_slice %519 {offsets = [0, 32], sizes = [32, 32], strides = [1, 1]} : vector<32x64xf32> to vector<32x32xf32>
    %c1_177 = arith.constant 1 : index
    %c224_178 = arith.constant 224 : index
    %c0_179 = arith.constant 0 : index
    %522 = vector.load %arg4[%c1_177, %c224_178, %c0_179] : memref<2x464x128xbf16, #tpu.memory_space<vmem>>, vector<1x32x32xbf16>
    %523 = vector.shape_cast %522 : vector<1x32x32xbf16> to vector<32x32xbf16>
    %c1_180 = arith.constant 1 : index
    %c256_181 = arith.constant 256 : index
    %c0_182 = arith.constant 0 : index
    %524 = vector.load %arg4[%c1_180, %c256_181, %c0_182] : memref<2x464x128xbf16, #tpu.memory_space<vmem>>, vector<1x1x32xbf16>
    %525 = vector.shape_cast %524 : vector<1x1x32xbf16> to vector<1x32xbf16>
    %526 = arith.truncf %510 : vector<32x32xf32> to vector<32x32xbf16>
    %527 = arith.truncf %520 : vector<32x32xf32> to vector<32x32xbf16>
    %528 = arith.truncf %521 : vector<32x32xf32> to vector<32x32xbf16>
    %cst_183 = arith.constant 0.000000e+00 : f32
    %529 = vector.broadcast %cst_183 : f32 to vector<32x32xf32>
    %530 = vector.broadcast %15 : vector<1x32xbf16> to vector<32x32xbf16>
    %531 = arith.mulf %526, %530 : vector<32x32xbf16>
    %cst_184 = arith.constant dense<0.000000e+00> : vector<32x32xf32>
    %532 = tpu.matmul %531, %527, %cst_184 {dimension_numbers = #tpu.dot_dimension_numbers<[1], [1], [0], [0], [0, 0, 1, 0], [], []>} : vector<32x32xbf16>, vector<32x32xbf16>, vector<32x32xf32> -> vector<32x32xf32>
    %533 = arith.addf %532, %62 : vector<32x32xf32>
    %cst_185 = arith.constant dense<0xFF800000> : vector<32xf32>
    %534 = vector.multi_reduction <maximumf>, %533, %cst_185 [1] : vector<32x32xf32> to vector<32xf32>
    %535 = vector.shape_cast %534 : vector<32xf32> to vector<32x1xf32>
    %536 = vector.broadcast %535 : vector<32x1xf32> to vector<32x32xf32>
    %537 = arith.subf %533, %536 : vector<32x32xf32>
    %538 = math.exp %537 : vector<32x32xf32>
    %cst_186 = arith.constant dense<0.000000e+00> : vector<32xf32>
    %539 = vector.multi_reduction <add>, %538, %cst_186 [1] : vector<32x32xf32> to vector<32xf32>
    %540 = vector.shape_cast %539 : vector<32xf32> to vector<32x1xf32>
    %541 = tpu.reciprocal %540 {approx = true} : vector<32x1xf32> -> vector<32x1xf32>
    %542 = vector.broadcast %541 : vector<32x1xf32> to vector<32x32xf32>
    %543 = arith.mulf %538, %542 : vector<32x32xf32>
    %544 = arith.truncf %543 : vector<32x32xf32> to vector<32x32xbf16>
    %545 = vector.broadcast %15 : vector<1x32xbf16> to vector<32x32xbf16>
    %546 = arith.mulf %528, %545 : vector<32x32xbf16>
    %cst_187 = arith.constant dense<0.000000e+00> : vector<32x32xf32>
    %547 = tpu.matmul %544, %546, %cst_187 {dimension_numbers = #tpu.dot_dimension_numbers<[1], [0], [0], [1], [0, 0, 1, 1], [], []>} : vector<32x32xbf16>, vector<32x32xbf16>, vector<32x32xf32> -> vector<32x32xf32>
    %548 = arith.addf %529, %547 : vector<32x32xf32>
    %549 = vector.broadcast %24 : vector<1x32xbf16> to vector<32x32xbf16>
    %550 = arith.mulf %526, %549 : vector<32x32xbf16>
    %cst_188 = arith.constant dense<0.000000e+00> : vector<32x32xf32>
    %551 = tpu.matmul %550, %527, %cst_188 {dimension_numbers = #tpu.dot_dimension_numbers<[1], [1], [0], [0], [0, 0, 1, 0], [], []>} : vector<32x32xbf16>, vector<32x32xbf16>, vector<32x32xf32> -> vector<32x32xf32>
    %552 = arith.addf %551, %62 : vector<32x32xf32>
    %cst_189 = arith.constant dense<0xFF800000> : vector<32xf32>
    %553 = vector.multi_reduction <maximumf>, %552, %cst_189 [1] : vector<32x32xf32> to vector<32xf32>
    %554 = vector.shape_cast %553 : vector<32xf32> to vector<32x1xf32>
    %555 = vector.broadcast %554 : vector<32x1xf32> to vector<32x32xf32>
    %556 = arith.subf %552, %555 : vector<32x32xf32>
    %557 = math.exp %556 : vector<32x32xf32>
    %cst_190 = arith.constant dense<0.000000e+00> : vector<32xf32>
    %558 = vector.multi_reduction <add>, %557, %cst_190 [1] : vector<32x32xf32> to vector<32xf32>
    %559 = vector.shape_cast %558 : vector<32xf32> to vector<32x1xf32>
    %560 = tpu.reciprocal %559 {approx = true} : vector<32x1xf32> -> vector<32x1xf32>
    %561 = vector.broadcast %560 : vector<32x1xf32> to vector<32x32xf32>
    %562 = arith.mulf %557, %561 : vector<32x32xf32>
    %563 = arith.truncf %562 : vector<32x32xf32> to vector<32x32xbf16>
    %564 = vector.broadcast %24 : vector<1x32xbf16> to vector<32x32xbf16>
    %565 = arith.mulf %528, %564 : vector<32x32xbf16>
    %cst_191 = arith.constant dense<0.000000e+00> : vector<32x32xf32>
    %566 = tpu.matmul %563, %565, %cst_191 {dimension_numbers = #tpu.dot_dimension_numbers<[1], [0], [0], [1], [0, 0, 1, 1], [], []>} : vector<32x32xbf16>, vector<32x32xbf16>, vector<32x32xf32> -> vector<32x32xf32>
    %567 = arith.addf %548, %566 : vector<32x32xf32>
    %568 = vector.broadcast %33 : vector<1x32xbf16> to vector<32x32xbf16>
    %569 = arith.mulf %526, %568 : vector<32x32xbf16>
    %cst_192 = arith.constant dense<0.000000e+00> : vector<32x32xf32>
    %570 = tpu.matmul %569, %527, %cst_192 {dimension_numbers = #tpu.dot_dimension_numbers<[1], [1], [0], [0], [0, 0, 1, 0], [], []>} : vector<32x32xbf16>, vector<32x32xbf16>, vector<32x32xf32> -> vector<32x32xf32>
    %571 = arith.addf %570, %62 : vector<32x32xf32>
    %cst_193 = arith.constant dense<0xFF800000> : vector<32xf32>
    %572 = vector.multi_reduction <maximumf>, %571, %cst_193 [1] : vector<32x32xf32> to vector<32xf32>
    %573 = vector.shape_cast %572 : vector<32xf32> to vector<32x1xf32>
    %574 = vector.broadcast %573 : vector<32x1xf32> to vector<32x32xf32>
    %575 = arith.subf %571, %574 : vector<32x32xf32>
    %576 = math.exp %575 : vector<32x32xf32>
    %cst_194 = arith.constant dense<0.000000e+00> : vector<32xf32>
    %577 = vector.multi_reduction <add>, %576, %cst_194 [1] : vector<32x32xf32> to vector<32xf32>
    %578 = vector.shape_cast %577 : vector<32xf32> to vector<32x1xf32>
    %579 = tpu.reciprocal %578 {approx = true} : vector<32x1xf32> -> vector<32x1xf32>
    %580 = vector.broadcast %579 : vector<32x1xf32> to vector<32x32xf32>
    %581 = arith.mulf %576, %580 : vector<32x32xf32>
    %582 = arith.truncf %581 : vector<32x32xf32> to vector<32x32xbf16>
    %583 = vector.broadcast %33 : vector<1x32xbf16> to vector<32x32xbf16>
    %584 = arith.mulf %528, %583 : vector<32x32xbf16>
    %cst_195 = arith.constant dense<0.000000e+00> : vector<32x32xf32>
    %585 = tpu.matmul %582, %584, %cst_195 {dimension_numbers = #tpu.dot_dimension_numbers<[1], [0], [0], [1], [0, 0, 1, 1], [], []>} : vector<32x32xbf16>, vector<32x32xbf16>, vector<32x32xf32> -> vector<32x32xf32>
    %586 = arith.addf %567, %585 : vector<32x32xf32>
    %587 = vector.broadcast %42 : vector<1x32xbf16> to vector<32x32xbf16>
    %588 = arith.mulf %526, %587 : vector<32x32xbf16>
    %cst_196 = arith.constant dense<0.000000e+00> : vector<32x32xf32>
    %589 = tpu.matmul %588, %527, %cst_196 {dimension_numbers = #tpu.dot_dimension_numbers<[1], [1], [0], [0], [0, 0, 1, 0], [], []>} : vector<32x32xbf16>, vector<32x32xbf16>, vector<32x32xf32> -> vector<32x32xf32>
    %590 = arith.addf %589, %62 : vector<32x32xf32>
    %cst_197 = arith.constant dense<0xFF800000> : vector<32xf32>
    %591 = vector.multi_reduction <maximumf>, %590, %cst_197 [1] : vector<32x32xf32> to vector<32xf32>
    %592 = vector.shape_cast %591 : vector<32xf32> to vector<32x1xf32>
    %593 = vector.broadcast %592 : vector<32x1xf32> to vector<32x32xf32>
    %594 = arith.subf %590, %593 : vector<32x32xf32>
    %595 = math.exp %594 : vector<32x32xf32>
    %cst_198 = arith.constant dense<0.000000e+00> : vector<32xf32>
    %596 = vector.multi_reduction <add>, %595, %cst_198 [1] : vector<32x32xf32> to vector<32xf32>
    %597 = vector.shape_cast %596 : vector<32xf32> to vector<32x1xf32>
    %598 = tpu.reciprocal %597 {approx = true} : vector<32x1xf32> -> vector<32x1xf32>
    %599 = vector.broadcast %598 : vector<32x1xf32> to vector<32x32xf32>
    %600 = arith.mulf %595, %599 : vector<32x32xf32>
    %601 = arith.truncf %600 : vector<32x32xf32> to vector<32x32xbf16>
    %602 = vector.broadcast %42 : vector<1x32xbf16> to vector<32x32xbf16>
    %603 = arith.mulf %528, %602 : vector<32x32xbf16>
    %cst_199 = arith.constant dense<0.000000e+00> : vector<32x32xf32>
    %604 = tpu.matmul %601, %603, %cst_199 {dimension_numbers = #tpu.dot_dimension_numbers<[1], [0], [0], [1], [0, 0, 1, 1], [], []>} : vector<32x32xbf16>, vector<32x32xbf16>, vector<32x32xf32> -> vector<32x32xf32>
    %605 = arith.addf %586, %604 : vector<32x32xf32>
    %606 = arith.truncf %605 : vector<32x32xf32> to vector<32x32xbf16>
    %cst_200 = arith.constant dense<0.000000e+00> : vector<32x32xf32>
    %607 = tpu.matmul %606, %523, %cst_200 {dimension_numbers = #tpu.dot_dimension_numbers<[1], [0], [0], [1], [0, 0, 1, 1], [], []>} : vector<32x32xbf16>, vector<32x32xbf16>, vector<32x32xf32> -> vector<32x32xf32>
    %608 = arith.extf %525 : vector<1x32xbf16> to vector<1x32xf32>
    %609 = vector.broadcast %608 : vector<1x32xf32> to vector<32x32xf32>
    %610 = arith.addf %607, %609 : vector<32x32xf32>
    %611 = arith.addf %501, %610 : vector<32x32xf32>
    %c1_201 = arith.constant 1 : index
    %c272_202 = arith.constant 272 : index
    %c0_203 = arith.constant 0 : index
    %612 = vector.load %arg4[%c1_201, %c272_202, %c0_203] : memref<2x464x128xbf16, #tpu.memory_space<vmem>>, vector<1x1x32xbf16>
    %613 = vector.shape_cast %612 : vector<1x1x32xbf16> to vector<1x32xbf16>
    %c1_204 = arith.constant 1 : index
    %c288_205 = arith.constant 288 : index
    %c0_206 = arith.constant 0 : index
    %614 = vector.load %arg4[%c1_204, %c288_205, %c0_206] : memref<2x464x128xbf16, #tpu.memory_space<vmem>>, vector<1x1x32xbf16>
    %615 = vector.shape_cast %614 : vector<1x1x32xbf16> to vector<1x32xbf16>
    %cst_207 = arith.constant dense<0.000000e+00> : vector<32xf32>
    %616 = vector.multi_reduction <add>, %611, %cst_207 [1] : vector<32x32xf32> to vector<32xf32>
    %617 = vector.shape_cast %616 : vector<32xf32> to vector<32x1xf32>
    %cst_208 = arith.constant 3.200000e+01 : f32
    %618 = vector.broadcast %cst_208 : f32 to vector<32x1xf32>
    %619 = arith.divf %617, %618 : vector<32x1xf32>
    %620 = vector.broadcast %619 : vector<32x1xf32> to vector<32x32xf32>
    %621 = arith.subf %611, %620 : vector<32x32xf32>
    %622 = arith.mulf %621, %621 : vector<32x32xf32>
    %cst_209 = arith.constant dense<0.000000e+00> : vector<32xf32>
    %623 = vector.multi_reduction <add>, %622, %cst_209 [1] : vector<32x32xf32> to vector<32xf32>
    %624 = vector.shape_cast %623 : vector<32xf32> to vector<32x1xf32>
    %cst_210 = arith.constant 3.200000e+01 : f32
    %625 = vector.broadcast %cst_210 : f32 to vector<32x1xf32>
    %626 = arith.divf %624, %625 : vector<32x1xf32>
    %cst_211 = arith.constant 9.99999974E-6 : f32
    %627 = vector.broadcast %cst_211 : f32 to vector<32x1xf32>
    %628 = arith.addf %626, %627 : vector<32x1xf32>
    %629 = math.rsqrt %628 : vector<32x1xf32>
    %630 = vector.broadcast %629 : vector<32x1xf32> to vector<32x32xf32>
    %631 = arith.mulf %621, %630 : vector<32x32xf32>
    %632 = arith.extf %613 : vector<1x32xbf16> to vector<1x32xf32>
    %633 = vector.broadcast %632 : vector<1x32xf32> to vector<32x32xf32>
    %634 = arith.mulf %631, %633 : vector<32x32xf32>
    %635 = arith.extf %615 : vector<1x32xbf16> to vector<1x32xf32>
    %636 = vector.broadcast %635 : vector<1x32xf32> to vector<32x32xf32>
    %637 = arith.addf %634, %636 : vector<32x32xf32>
    %c1_212 = arith.constant 1 : index
    %c304_213 = arith.constant 304 : index
    %c0_214 = arith.constant 0 : index
    %638 = vector.load %arg4[%c1_212, %c304_213, %c0_214] : memref<2x464x128xbf16, #tpu.memory_space<vmem>>, vector<1x32x64xbf16>
    %639 = vector.shape_cast %638 : vector<1x32x64xbf16> to vector<32x64xbf16>
    %640 = arith.truncf %637 : vector<32x32xf32> to vector<32x32xbf16>
    %cst_215 = arith.constant dense<0.000000e+00> : vector<32x64xf32>
    %641 = tpu.matmul %640, %639, %cst_215 {dimension_numbers = #tpu.dot_dimension_numbers<[1], [0], [0], [1], [0, 0, 1, 1], [], []>} : vector<32x32xbf16>, vector<32x64xbf16>, vector<32x64xf32> -> vector<32x64xf32>
    %c1_216 = arith.constant 1 : index
    %c336_217 = arith.constant 336 : index
    %c0_218 = arith.constant 0 : index
    %642 = vector.load %arg4[%c1_216, %c336_217, %c0_218] : memref<2x464x128xbf16, #tpu.memory_space<vmem>>, vector<1x1x64xbf16>
    %643 = vector.shape_cast %642 : vector<1x1x64xbf16> to vector<1x64xbf16>
    %644 = arith.extf %643 : vector<1x64xbf16> to vector<1x64xf32>
    %645 = vector.broadcast %644 : vector<1x64xf32> to vector<32x64xf32>
    %646 = arith.addf %641, %645 : vector<32x64xf32>
    %cst_219 = arith.constant 0.000000e+00 : f32
    %647 = vector.broadcast %cst_219 : f32 to vector<32x64xf32>
    %648 = arith.maximumf %646, %647 : vector<32x64xf32>
    %c1_220 = arith.constant 1 : index
    %c352_221 = arith.constant 352 : index
    %c0_222 = arith.constant 0 : index
    %649 = vector.load %arg4[%c1_220, %c352_221, %c0_222] : memref<2x464x128xbf16, #tpu.memory_space<vmem>>, vector<1x64x32xbf16>
    %650 = vector.shape_cast %649 : vector<1x64x32xbf16> to vector<64x32xbf16>
    %651 = arith.truncf %648 : vector<32x64xf32> to vector<32x64xbf16>
    %cst_223 = arith.constant dense<0.000000e+00> : vector<32x32xf32>
    %652 = tpu.matmul %651, %650, %cst_223 {dimension_numbers = #tpu.dot_dimension_numbers<[1], [0], [0], [1], [0, 0, 1, 1], [], []>} : vector<32x64xbf16>, vector<64x32xbf16>, vector<32x32xf32> -> vector<32x32xf32>
    %c1_224 = arith.constant 1 : index
    %c416_225 = arith.constant 416 : index
    %c0_226 = arith.constant 0 : index
    %653 = vector.load %arg4[%c1_224, %c416_225, %c0_226] : memref<2x464x128xbf16, #tpu.memory_space<vmem>>, vector<1x1x32xbf16>
    %654 = vector.shape_cast %653 : vector<1x1x32xbf16> to vector<1x32xbf16>
    %655 = arith.extf %654 : vector<1x32xbf16> to vector<1x32xf32>
    %656 = vector.broadcast %655 : vector<1x32xf32> to vector<32x32xf32>
    %657 = arith.addf %652, %656 : vector<32x32xf32>
    %658 = arith.addf %637, %657 : vector<32x32xf32>
    %c1_227 = arith.constant 1 : index
    %c432_228 = arith.constant 432 : index
    %c0_229 = arith.constant 0 : index
    %659 = vector.load %arg4[%c1_227, %c432_228, %c0_229] : memref<2x464x128xbf16, #tpu.memory_space<vmem>>, vector<1x1x32xbf16>
    %660 = vector.shape_cast %659 : vector<1x1x32xbf16> to vector<1x32xbf16>
    %c1_230 = arith.constant 1 : index
    %c448_231 = arith.constant 448 : index
    %c0_232 = arith.constant 0 : index
    %661 = vector.load %arg4[%c1_230, %c448_231, %c0_232] : memref<2x464x128xbf16, #tpu.memory_space<vmem>>, vector<1x1x32xbf16>
    %662 = vector.shape_cast %661 : vector<1x1x32xbf16> to vector<1x32xbf16>
    %cst_233 = arith.constant dense<0.000000e+00> : vector<32xf32>
    %663 = vector.multi_reduction <add>, %658, %cst_233 [1] : vector<32x32xf32> to vector<32xf32>
    %664 = vector.shape_cast %663 : vector<32xf32> to vector<32x1xf32>
    %cst_234 = arith.constant 3.200000e+01 : f32
    %665 = vector.broadcast %cst_234 : f32 to vector<32x1xf32>
    %666 = arith.divf %664, %665 : vector<32x1xf32>
    %667 = vector.broadcast %666 : vector<32x1xf32> to vector<32x32xf32>
    %668 = arith.subf %658, %667 : vector<32x32xf32>
    %669 = arith.mulf %668, %668 : vector<32x32xf32>
    %cst_235 = arith.constant dense<0.000000e+00> : vector<32xf32>
    %670 = vector.multi_reduction <add>, %669, %cst_235 [1] : vector<32x32xf32> to vector<32xf32>
    %671 = vector.shape_cast %670 : vector<32xf32> to vector<32x1xf32>
    %cst_236 = arith.constant 3.200000e+01 : f32
    %672 = vector.broadcast %cst_236 : f32 to vector<32x1xf32>
    %673 = arith.divf %671, %672 : vector<32x1xf32>
    %cst_237 = arith.constant 9.99999974E-6 : f32
    %674 = vector.broadcast %cst_237 : f32 to vector<32x1xf32>
    %675 = arith.addf %673, %674 : vector<32x1xf32>
    %676 = math.rsqrt %675 : vector<32x1xf32>
    %677 = vector.broadcast %676 : vector<32x1xf32> to vector<32x32xf32>
    %678 = arith.mulf %668, %677 : vector<32x32xf32>
    %679 = arith.extf %660 : vector<1x32xbf16> to vector<1x32xf32>
    %680 = vector.broadcast %679 : vector<1x32xf32> to vector<32x32xf32>
    %681 = arith.mulf %678, %680 : vector<32x32xf32>
    %682 = arith.extf %662 : vector<1x32xbf16> to vector<1x32xf32>
    %683 = vector.broadcast %682 : vector<1x32xf32> to vector<32x32xf32>
    %684 = arith.addf %681, %683 : vector<32x32xf32>
    %c0_238 = arith.constant 0 : index
    %c0_239 = arith.constant 0 : index
    %685 = vector.load %arg5[%c0_238, %c0_239] : memref<32x32xf32, #tpu.memory_space<vmem>>, vector<32x32xf32>
    tpu.vector_store %arg5[%c0_238, %c0_239], %684 {strides = array<i32>} : memref<32x32xf32, #tpu.memory_space<vmem>>, vector<32x32xf32>,
    return
  }
  func.func @transform_0(%arg0: i32) -> (i32, i32) {
    %c0_i32 = arith.constant 0 : i32
    %c0_i32_0 = arith.constant 0 : i32
    %c0_i32_1 = arith.constant 0 : i32
    return %c0_i32, %c0_i32_0 : i32, i32
  }
  func.func @transform_1(%arg0: i32) -> (i32, i32) {
    %c0_i32 = arith.constant 0 : i32
    %c0_i32_0 = arith.constant 0 : i32
    %c0_i32_1 = arith.constant 0 : i32
    return %c0_i32, %c0_i32_0 : i32, i32
  }
  func.func @transform_2(%arg0: i32) -> (i32, i32) {
    %c0_i32 = arith.constant 0 : i32
    %c0_i32_0 = arith.constant 0 : i32
    %c0_i32_1 = arith.constant 0 : i32
    return %c0_i32, %c0_i32_0 : i32, i32
  }
  func.func @transform_3(%arg0: i32) -> (i32, i32, i32) {
    %c0_i32 = arith.constant 0 : i32
    %c0_i32_0 = arith.constant 0 : i32
    %c0_i32_1 = arith.constant 0 : i32
    %c0_i32_2 = arith.constant 0 : i32
    return %c0_i32, %c0_i32_0, %c0_i32_1 : i32, i32, i32
  }
  func.func @transform_4(%arg0: i32) -> (i32, i32) {
    %c0_i32 = arith.constant 0 : i32
    %c0_i32_0 = arith.constant 0 : i32
    %c0_i32_1 = arith.constant 0 : i32
    return %c0_i32, %c0_i32_0 : i32, i32
  }
}

</mosaic_0001>

<bundles_post_ra>
// kernel: bev_query_pallas.1
= control target key start
LH: loop header
LB: loop body
LE: loop exit
PB: predicated region body
PF: predicated region fallthrough
CT: control target
= control target key end

     0   :  { %9 = vsyncpa [#allocation3], 0  ;;  %s5758_s0 = inlined_call_operand.hbm [shape: f32[32,32], index: 0, kind: input, shape index: {}]   ;;  %s5759_s1 = inlined_call_operand.hbm [shape: f32[32,32], index: 1, kind: input, shape index: {}]   ;;  %s5760_s2 = inlined_call_operand.hbm [shape: f32[16,32], index: 2, kind: input, shape index: {}]   ;;  %s5761_s3 = inlined_call_operand.hbm [shape: bf16[2,464,128], index: 3, kind: input, shape index: {}]   ;;  %s5762_s4 = inlined_call_operand.hbm [shape: f32[32,32], index: 4, kind: output, shape index: {}]  }
   0x1   :  { %10 = vsyncpa [#allocation6], 0 }
   0x2   :  { %11 = vsyncpa [#allocation9], 0 }
   0x3   :  { %12 = vsyncpa [#allocation4], 0  ;;  %s30_s17 = sshll.u32 %s5759_s1, 4  ;;  %s4227_s18 = smov [#allocation5]   ;;  %s31_s17 = int_to_ptr.hbm [resolvable:$true] %s30_s17 }
   0x4   :  { %s32_s19 = sshll.u32 %s4227_s18, 4  ;;  %s17_s22 = sshll.u32 %s5758_s0, 4  ;;  %s33_s19 = int_to_ptr.vmem [resolvable:$true] %s32_s19  ;;  %s18_s22 = int_to_ptr.hbm [resolvable:$true] %s17_s22 }
   0x5   :  { %s4228_s23 = smov 128   ;;  %s4229_s24 = smov 8  }
   0x6   :  { %38 = dma.hbm_to_vmem [thread:$0]  %s31_s17, 512, %s33_s19, [#allocation6], %s4228_s23, %s4228_s23, %s4229_s24  }
   0x7   :  { %s4230_s25 = smov [#allocation2]   ;;  %s43_s1 = sshll.u32 %s5760_s2, 4  ;;  %s44_s1 = int_to_ptr.hbm [resolvable:$true] %s43_s1 }
   0x8   :  { %s19_s26 = sshll.u32 %s4230_s25, 4  ;;  %s56_s30 = sshll.u32 %s5761_s3, 4  ;;  %s20_s26 = int_to_ptr.vmem [resolvable:$true] %s19_s26  ;;  %s57_s30 = int_to_ptr.hbm [resolvable:$true] %s56_s30 }
   0x9   :  { %25 = dma.hbm_to_vmem [thread:$0]  %s18_s22, 512, %s20_s26, [#allocation3], %s4228_s23, %s4228_s23, %s4229_s24  }
   0xa   :  { %s4231_s5 = smov [#allocation7]   ;;  %s4232_s7 = smov [#allocation8]  }
   0xb   :  { %s45_s6 = sshll.u32 %s4231_s5, 4  ;;  %s58_s2 = sshll.u32 %s4232_s7, 4  ;;  %s46_s6 = int_to_ptr.vmem [resolvable:$true] %s45_s6  ;;  %s59_s2 = int_to_ptr.vmem [resolvable:$true] %s58_s2 }
   0xc   :  { %51 = dma.hbm_to_vmem [thread:$0]  %s44_s1, 256, %s46_s6, [#allocation6], %s4228_s23, %s4228_s23, %s4229_s24  }
   0xd   :  { %s4233_s8 = smov 64   ;;  %s4234_s9 = smov 4  }
   0xe   :  { %64 = dma.hbm_to_vmem [thread:$0]  %s57_s30, 7424, %s59_s2, [#allocation9], %s4233_s8, %s4233_s8, %s4234_s9  }
   0xf   :  { %4219 = dma.done.wait [#allocation3], 512  }
  0x10   :  { %4220 = vsyncadd [#allocation3], 4294966784 }
  0x11   :  { %4221 = dma.done.wait [#allocation6], 768  }
  0x12   :  { %4222 = vsyncadd [#allocation6], 4294966528 }
  0x13   :  { %4223 = dma.done.wait [#allocation9], 7424  }
  0x14   :  { %4224 = vsyncadd [#allocation9], 4294959872  ;;  %v3732_v0 = vld [vmem:[#allocation8 + $0x8] sm:$0xff]  ;;  %v82_v1 = vld [vmem:[#allocation7] sm:$0xff]  ;;  %vm165_vm0 = vcmask 261120   ;;  %v100_v14 = vlaneseq  ;;  %v4235_v16 = vmov 0.0  }
  0x15   :  { %v83_v2 = vld [vmem:[#allocation7 + $0x8] sm:$0xff]  ;;  %v84_v3 = vld [vmem:[#allocation2] sm:$0xff]  ;;  %178 = vmatpush.bf16.msra.mxu0 %v3732_v0  ;;  %3763 = vmatpush.bf16.msra.mxu1 %v3732_v0  ;;  %v3731_v5 = vld [vmem:[#allocation8] sm:$0xff]  ;;  %s4236_s3 = smov 96   ;;  %s4239_s10 = smov 32  }
  0x16   :  { %v85_v4 = vld [vmem:[#allocation2 + $0x8] sm:$0xff]  ;;  %v4289_v6 = vadd.f32 %v84_v3, %v82_v1  ;;  %v86_v8 = vld [vmem:[#allocation2 + $0x10] sm:$0xff]  ;;  %v87_v9 = vld [vmem:[#allocation2 + $0x18] sm:$0xff]  ;;  %v4303_v15 = vand.u32 127, %v100_v14  ;;  %s4240_s11 = smov [#allocation10]   ;;  %s3488_s15 = sshll.u32 %s5762_s4, 4  ;;  %s3489_s15 = int_to_ptr.hbm [resolvable:$true] %s3488_s15 }
  0x17   :  { %v4291_v7 = vadd.f32 %v85_v4, %v83_v2  ;;  %v4293_v10 = vadd.f32 %v86_v8, %v82_v1  ;;  %v4295_v11 = vadd.f32 %v87_v9, %v83_v2  ;;  %v150_v21 = vld [vmem:[#allocation8 + $0x10] sm:$0x1]  ;;  %v4237_v1 = vmov -1e+30   ;;  %s3486_s12 = sshll.u32 %s4240_s11, 4  ;;  %s3487_s12 = int_to_ptr.vmem [resolvable:$true] %s3486_s12 }
  0x18   :  { %vm112_vm1 = vcmp.ge.s32.totalorder %v4303_v15, 16  ;;  %vm113_vm2 = vcmp.lt.s32.totalorder %v4303_v15, 24  ;;  %vm103_vm3 = vcmp.lt.s32.totalorder %v4303_v15, 8  ;;  %vm117_vm4 = vcmp.ge.s32.totalorder %v4303_v15, 24 }
  0x19   :  { %v148_v12 = vpack.c.bf16 %v4291_v7, %v4289_v6  ;;  %v149_v13 = vpack.c.bf16 %v4295_v11, %v4293_v10  ;;  %179 = vmatpush.bf16.msra.mxu0 %v3731_v5  ;;  %3764 = vmatpush.bf16.msra.mxu1 %v3731_v5  ;;  %vm118_vm5 = vcmp.lt.s32.totalorder %v4303_v15, 32  ;;  %v4310_v17 = vsel %vm103_vm3, 1.0, %v4235_v16  ;;  %vm114_vm6 = vmand %vm112_vm1, %vm113_vm2 }
  0x1a   :  { %v4314_v18 = vsel %vm114_vm6, 1.0, %v4235_v16  ;;  %vm119_vm7 = vmand %vm117_vm4, %vm118_vm5  ;;  %v4320_v20 = vsel %vm112_vm1, -1e+30, %v4235_v16  ;;  %v151_v23 = vunpack.c.l.bf16 %v150_v21  ;;  %vm107_vm8 = vcmp.ge.s32.totalorder %v4303_v15, 8 }
  0x1b   :  { %v4316_v19 = vsel %vm119_vm7, 1.0, %v4235_v16  ;;  %vm108_vm9 = vcmp.lt.s32.totalorder %v4303_v15, 16  ;;  %v4374_v2 = vsel %vm112_vm1, 0.0, %v4237_v1 }
  0x1c   :  { %3515 = vmatmul.msk.bf16.vlgmr.msra.gmra.mxu0 %vm165_vm0, %v148_v12  ;;  %3516 = vmatmul.msk.bf16.vlgmr.msra.gmra.mxu1 %vm165_vm0, %v149_v13  ;;  %v152_v25 = vperm.slane %v151_v23, 0  ;;  %vm109_vm10 = vmand %vm107_vm8, %vm108_vm9 }
  0x1d   :  { %v4326_v34 = vsel %vm109_vm10, 1.0, %v4235_v16 }
  0x99   :  { %v186_v22 = vpop.f32.mrf.mxu1  ;;  %v181_v24 = vpop.f32.mrf.mxu0 }
  0x9a   :  { %v187_v27 = vadd.f32 %v186_v22, %v152_v25  ;;  %v182_v31 = vadd.f32 %v181_v24, %v152_v25 }
  0x9c   :  { %v196_v37 = vpack.c.bf16 %v182_v31, %v182_v31  ;;  %v198_v50 = vpack.c.bf16 %v187_v27, %v187_v27 }
  0x9e   :  { %v4335_v39 = vunpack.c.l.bf16 %v196_v37  ;;  %v4356_v52 = vunpack.c.l.bf16 %v198_v50  ;;  %v4388_v37 = vpack.i.bf16 %v4314_v18, %v4310_v17 }
  0xa0   :  { %v207_v43 = vmul.f32 %v4335_v39, %v4310_v17  ;;  %v307_v45 = vmul.f32 %v4335_v39, %v4326_v34  ;;  %v209_v55 = vmul.f32 %v4356_v52, %v4310_v17  ;;  %v309_v56 = vmul.f32 %v4356_v52, %v4326_v34 }
  0xa1   :  { %v188_v26 = vpop.f32.mrf.mxu1  ;;  %v183_v30 = vpop.f32.mrf.mxu0 }
  0xa2   :  { %v189_v28 = vadd.f32 %v188_v26, %v152_v25  ;;  %v184_v32 = vadd.f32 %v183_v30, %v152_v25 }
  0xa4   :  { %v201_v29 = vpack.c.bf16 %v189_v28, %v187_v27  ;;  %v200_v33 = vpack.c.bf16 %v184_v32, %v182_v31  ;;  %v197_v38 = vpack.c.bf16 %v184_v32, %v184_v32  ;;  %v199_v49 = vpack.c.bf16 %v189_v28, %v189_v28 }
  0xa6   :  { %217 = vrot.lane.b32.xlu0 %v201_v29, %s4236_s3  ;;  %v4337_v40 = vunpack.c.l.bf16 %v197_v38  ;;  %v4354_v51 = vunpack.c.l.bf16 %v199_v49 }
  0xa8   :  { %v208_v44 = vmul.f32 %v4337_v40, %v4310_v17  ;;  %v308_v46 = vmul.f32 %v4337_v40, %v4326_v34  ;;  %v210_v53 = vmul.f32 %v4354_v51, %v4310_v17  ;;  %v310_v54 = vmul.f32 %v4354_v51, %v4326_v34 }
  0xaa   :  { %v211_v47 = vpack.c.bf16 %v208_v44, %v207_v43  ;;  %v311_v48 = vpack.c.bf16 %v308_v46, %v307_v45  ;;  %v212_v57 = vpack.c.bf16 %v210_v53, %v209_v55  ;;  %v312_v58 = vpack.c.bf16 %v310_v54, %v309_v56 }
  0xae   :  { %215 = vrot.lane.b32.xlu0 %v200_v33, %s4236_s3 }
  0xb6   :  { %385 = vrot.lane.b32.xlu0 %v4326_v34, %s4233_s8 }
 0x118   :  { %v218_v35 = vpop.permute.xlu0 %217 }
 0x119   :  { %v4331_v36 = vsel %vm165_vm0, %v218_v35, 0 }
 0x11a   :  { %237 = vmatpush.bf16.xpose.msrb.mxu1 %v4331_v36  ;;  %325 = vmatpush.bf16.xpose.msra.mxu2 %v4331_v36 }
 0x120   :  { %v216_v41 = vpop.permute.xlu0 %215 }
 0x121   :  { %v4340_v42 = vsel %vm165_vm0, %v216_v41, 0 }
 0x122   :  { %238 = vmatpush.bf16.xpose.msrb.mxu1 %v4340_v42  ;;  %326 = vmatpush.bf16.xpose.msra.mxu2 %v4340_v42 }
 0x128   :  { %v4393_v43 = vpop.permute.xlu0 %385 }
 0x129   :  { %3517 = vmatmul.msk.bf16.vlgmr.msrb.gmra.mxu1 %vm165_vm0, %v211_v47  ;;  %3519 = vmatmul.msk.bf16.vlgmr.msra.gmra.mxu2 %vm165_vm0, %v311_v48  ;;  %v388_v45 = vmul.f32 %v4393_v43, %v4335_v39  ;;  %v389_v46 = vmul.f32 %v4393_v43, %v4337_v40  ;;  %v390_v48 = vmul.f32 %v4393_v43, %v4356_v52 }
 0x12a   :  { %v391_v49 = vmul.f32 %v4393_v43, %v4354_v51 }
 0x12b   :  { %v392_v47 = vpack.c.bf16 %v389_v46, %v388_v45 }
 0x12c   :  { %v393_v53 = vpack.c.bf16 %v391_v49, %v390_v48 }
 0x139   :  { %3518 = vmatmul.msk.bf16.gmra.mxu1 %vm165_vm0, %v212_v57  ;;  %3520 = vmatmul.msk.bf16.gmra.mxu2 %vm165_vm0, %v312_v58 }
 0x1a6   :  { %v240_v44 = vpop.f32.mrf.mxu1 }
 0x1ac   :  { %v328_v59 = vpop.f32.mrf.mxu2 }
 0x1ad   :  { %v329_v60 = vadd.f32 %v4320_v20, %v328_v59  ;;  %v4413_v59 = vadd.f32 %v4320_v20, %v240_v44 }
 0x1ae   :  { %v242_v50 = vpop.f32.mrf.mxu1 }
 0x1af   :  { %v338_v61 = vsel %vm165_vm0, %v329_v60, -inf  ;;  %v4408_v57 = vadd.f32 %v4320_v20, %v242_v50 }
 0x1b0   :  { %339 = vmax.xlane.f32.xlu2 %v338_v61 }
 0x1b1   :  { %v253_v58 = vsel %vm165_vm0, %v4408_v57, -inf }
 0x1b4   :  { %v330_v62 = vpop.f32.mrf.mxu2 }
 0x1b5   :  { %v331_v63 = vadd.f32 %v4320_v20, %v330_v62 }
 0x1b6   :  { %v245_v54 = vpop.f32.mrf.mxu1 }
 0x1b7   :  { %v341_v0 = vsel %vm165_vm0, %v331_v63, -inf  ;;  %v246_v55 = vadd.f32 %v245_v54, %v4374_v2 }
 0x1b8   :  { %342 = vmax.xlane.f32.xlu2 %v341_v0 }
 0x1b9   :  { %v256_v56 = vsel %vm165_vm0, %v246_v55, -inf }
 0x1bc   :  { %v333_v3 = vpop.f32.mrf.mxu2 }
 0x1bd   :  { %v334_v4 = vadd.f32 %v333_v3, %v4374_v2 }
 0x1be   :  { %v247_v61 = vpop.f32.mrf.mxu1 }
 0x1bf   :  { %v344_v5 = vsel %vm165_vm0, %v334_v4, -inf  ;;  %v4418_v62 = vadd.f32 %v247_v61, %v4374_v2 }
 0x1c0   :  { %345 = vmax.xlane.f32.xlu1 %v344_v5 }
 0x1c4   :  { %v335_v8 = vpop.f32.mrf.mxu2 }
 0x1c5   :  { %v336_v9 = vadd.f32 %v335_v8, %v4374_v2 }
 0x1c7   :  { %v347_v12 = vsel %vm165_vm0, %v336_v9, -inf }
 0x1c8   :  { %348 = vmax.xlane.f32.xlu1 %v347_v12 }
 0x223   :  { %v340_v13 = vpop.xlane.xlu2 %339 }
 0x224   :  { %v350_v14 = vsub.f32 %v329_v60, %v340_v13  ;;  %v250_v60 = vsel %vm165_vm0, %v4413_v59, -inf }
 0x226   :  { %v354_v16 = vmul.f32 1.442695, %v350_v14 }
 0x228   :  { %3791 = vpow2.f32 %v354_v16 }
 0x22b   :  { %v343_v21 = vpop.xlane.xlu2 %342 }
 0x22c   :  { %v351_v15 = vsub.f32 %v331_v63, %v343_v21  ;;  %v259_v63 = vsel %vm165_vm0, %v4418_v62, -inf }
 0x22e   :  { %v4380_v22 = vpop.eup %3791  ;;  %v356_v23 = vmul.f32 1.442695, %v351_v15 }
 0x22f   :  { %v362_v24 = vsel %vm165_vm0, %v4380_v22, 0.0 }
 0x230   :  { %3793 = vpow2.f32 %v356_v23  ;;  %363 = vadd.xlane.f32.xlu0 %v362_v24 }
 0x233   :  { %v346_v25 = vpop.xlane.xlu1 %345 }
 0x234   :  { %v352_v26 = vsub.f32 %v334_v4, %v346_v25 }
 0x236   :  { %v3794_v27 = vpop.eup %3793  ;;  %v358_v28 = vmul.f32 1.442695, %v352_v26 }
 0x237   :  { %v365_v29 = vsel %vm165_vm0, %v3794_v27, 0.0 }
 0x238   :  { %3795 = vpow2.f32 %v358_v28  ;;  %366 = vadd.xlane.f32.xlu1 %v365_v29  ;;  %v587_v28 = vmul.f32 %v4337_v40, %v4316_v19 }
 0x23b   :  { %v349_v30 = vpop.xlane.xlu1 %348 }
 0x23c   :  { %v353_v31 = vsub.f32 %v336_v9, %v349_v30 }
 0x23e   :  { %v3796_v32 = vpop.eup %3795  ;;  %v360_v33 = vmul.f32 1.442695, %v353_v31 }
 0x23f   :  { %v368_v35 = vsel %vm165_vm0, %v3796_v32, 0.0 }
 0x240   :  { %3797 = vpow2.f32 %v360_v33  ;;  %369 = vadd.xlane.f32.xlu1 %v368_v35  ;;  %v464_v33 = vmul.f32 %v4354_v51, %v4314_v18  ;;  %v589_v35 = vmul.f32 %v4354_v51, %v4316_v19 }
 0x244   :  { %3782 = vrot.lane.b32.xlu0 %v4388_v37, %s4233_s8 }
 0x246   :  { %v3798_v38 = vpop.eup %3797 }
 0x247   :  { %v371_v41 = vsel %vm165_vm0, %v3798_v38, 0.0 }
 0x248   :  { %372 = vadd.xlane.f32.xlu2 %v371_v41  ;;  %v588_v41 = vmul.f32 %v4356_v52, %v4316_v19 }
 0x259   :  { %396 = vrot.lane.b32.xlu1 %v392_v47, %s4233_s8  ;;  %v591_v47 = vpack.c.bf16 %v589_v35, %v588_v41 }
 0x260   :  { %398 = vrot.lane.b32.xlu2 %v393_v53, %s4233_s8 }
 0x26e   :  { %257 = vmax.xlane.f32.xlu0 %v256_v56 }
 0x283   :  { %254 = vmax.xlane.f32.xlu1 %v253_v58 }
 0x289   :  { %251 = vmax.xlane.f32.xlu2 %v250_v60 }
 0x291   :  { %260 = vmax.xlane.f32.xlu2 %v259_v63 }
 0x2a3   :  { %v364_v3 = vpop.xlane.xlu0 %363 }
 0x2a9   :  { %664 = vrot.lane.b32.xlu2 %v4316_v19, %s4233_s8 }
 0x2ab   :  { %v367_v0 = vpop.xlane.xlu1 %366 }
 0x2ac   :  { %3799 = vrcp.f32 %v367_v0 }
 0x2b2   :  { %v3800_v8 = vpop.eup %3799 }
 0x2b3   :  { %v370_v4 = vpop.xlane.xlu1 %369  ;;  %v379_v14 = vmul.f32 %v3800_v8, %v3794_v27  ;;  %v462_v27 = vmul.f32 %v4337_v40, %v4314_v18 }
 0x2b6   :  { %v3783_v26 = vpop.permute.xlu0 %3782 }
 0x2bb   :  { %v373_v1 = vpop.xlane.xlu2 %372 }
 0x2bc   :  { %3801 = vrcp.f32 %v373_v1 }
 0x2bd   :  { %3803 = vrcp.f32 %v364_v3 }
 0x2be   :  { %3805 = vrcp.f32 %v370_v4 }
 0x2c2   :  { %v3802_v9 = vpop.eup %3801 }
 0x2c3   :  { %v399_v5 = vpop.permute.xlu2 %398  ;;  %v3804_v12 = vpop.eup %3803  ;;  %v381_v16 = vmul.f32 %v3802_v9, %v3798_v38  ;;  %v463_v38 = vmul.f32 %v4356_v52, %v4314_v18 }
 0x2c4   :  { %414 = vmatpush.bf16.msrb.mxu2 %v399_v5  ;;  %3765 = vmatpush.bf16.msra.mxu3 %v399_v5  ;;  %v3806_v13 = vpop.eup %3805  ;;  %v378_v21 = vmul.f32 %v3804_v12, %v4380_v22  ;;  %v461_v22 = vmul.f32 %v4335_v39, %v4314_v18 }
 0x2c5   :  { %v380_v23 = vmul.f32 %v3806_v13, %v3796_v32  ;;  %v466_v46 = vpack.c.bf16 %v464_v33, %v463_v38 }
 0x2c6   :  { %v382_v24 = vpack.c.bf16 %v379_v14, %v378_v21  ;;  %v465_v29 = vpack.c.bf16 %v462_v27, %v461_v22  ;;  %v4482_v14 = vunpack.i.h.bf16 %v3783_v26 }
 0x2c7   :  { %v383_v25 = vpack.c.bf16 %v381_v16, %v380_v23 }
 0x2c8   :  { %v544_v16 = vmul.f32 %v4482_v14, %v4356_v52  ;;  %v545_v21 = vmul.f32 %v4482_v14, %v4354_v51 }
 0x2cb   :  { %v397_v15 = vpop.permute.xlu1 %396 }
 0x2cc   :  { %415 = vmatpush.bf16.msrb.mxu2 %v397_v15  ;;  %3766 = vmatpush.bf16.msra.mxu3 %v397_v15 }
 0x2cf   :  { %3521 = vmatmul.msk.bf16.vlgmr.msrb.gmra.mxu2 %vm165_vm0, %v382_v24  ;;  %3522 = vmatmul.msk.bf16.vlgmr.msra.gmra.mxu3 %vm165_vm0, %v383_v25 }
 0x2d0   :  { %479 = vmatpush.bf16.xpose.msrb.mxu3 %v4331_v36  ;;  %604 = vmatpush.bf16.xpose.msra.mxu2 %v4331_v36  ;;  %v586_v36 = vmul.f32 %v4335_v39, %v4316_v19 }
 0x2d2   :  { %v590_v30 = vpack.c.bf16 %v587_v28, %v586_v36 }
 0x2d8   :  { %480 = vmatpush.bf16.xpose.msrb.mxu3 %v4340_v42  ;;  %605 = vmatpush.bf16.xpose.msra.mxu2 %v4340_v42 }
 0x2df   :  { %3525 = vmatmul.msk.bf16.vlgmr.msrb.gmra.mxu3 %vm165_vm0, %v465_v29  ;;  %3529 = vmatmul.msk.bf16.vlgmr.msra.gmra.mxu2 %vm165_vm0, %v590_v30 }
 0x2e1   :  { %v258_v42 = vpop.xlane.xlu0 %257 }
 0x2e2   :  { %v264_v31 = vsub.f32 %v246_v55, %v258_v42 }
 0x2e4   :  { %v270_v32 = vmul.f32 1.442695, %v264_v31 }
 0x2e6   :  { %3807 = vpow2.f32 %v270_v32 }
 0x2ec   :  { %v4449_v44 = vpop.eup %3807 }
 0x2ed   :  { %v280_v45 = vsel %vm165_vm0, %v4449_v44, 0.0 }
 0x2ee   :  { %281 = vadd.xlane.f32.xlu2 %v280_v45 }
 0x2ef   :  { %3526 = vmatmul.msk.bf16.gmra.mxu3 %vm165_vm0, %v466_v46  ;;  %3530 = vmatmul.msk.bf16.gmra.mxu2 %vm165_vm0, %v591_v47 }
 0x2f6   :  { %v255_v48 = vpop.xlane.xlu1 %254 }
 0x2f7   :  { %v263_v49 = vsub.f32 %v4408_v57, %v255_v48  ;;  %v4465_v57 = vunpack.i.l.bf16 %v3783_v26 }
 0x2f9   :  { %v268_v50 = vmul.f32 1.442695, %v263_v49  ;;  %v300_v63 = vmul.f32 %v4465_v57, %v4335_v39  ;;  %v302_v1 = vmul.f32 %v4465_v57, %v4356_v52  ;;  %v303_v3 = vmul.f32 %v4465_v57, %v4354_v51 }
 0x2fb   :  { %3809 = vpow2.f32 %v268_v50  ;;  %v305_v4 = vpack.c.bf16 %v303_v3, %v302_v1 }
 0x2fc   :  { %v252_v53 = vpop.xlane.xlu2 %251 }
 0x2fd   :  { %v262_v54 = vsub.f32 %v4413_v59, %v252_v53  ;;  %v301_v59 = vmul.f32 %v4465_v57, %v4337_v40 }
 0x2ff   :  { %v266_v55 = vmul.f32 1.442695, %v262_v54  ;;  %v304_v0 = vpack.c.bf16 %v301_v59, %v300_v63 }
 0x301   :  { %v4457_v56 = vpop.eup %3809  ;;  %3811 = vpow2.f32 %v266_v55 }
 0x302   :  { %v277_v58 = vsel %vm165_vm0, %v4457_v56, 0.0 }
 0x303   :  { %278 = vadd.xlane.f32.xlu0 %v277_v58 }
 0x304   :  { %v261_v5 = vpop.xlane.xlu2 %260 }
 0x305   :  { %v265_v8 = vsub.f32 %v4418_v62, %v261_v5  ;;  %v547_v62 = vpack.c.bf16 %v545_v21, %v544_v16 }
 0x307   :  { %v4461_v60 = vpop.eup %3811  ;;  %v272_v9 = vmul.f32 1.442695, %v265_v8 }
 0x308   :  { %v274_v61 = vsel %vm165_vm0, %v4461_v60, 0.0 }
 0x309   :  { %275 = vadd.xlane.f32.xlu1 %v274_v61  ;;  %3813 = vpow2.f32 %v272_v9 }
 0x30c   :  { %v4537_v61 = vpop.permute.xlu2 %664 }
 0x30d   :  { %v668_v1 = vmul.f32 %v4537_v61, %v4337_v40 }
 0x30f   :  { %v4478_v12 = vpop.eup %3813 }
 0x310   :  { %v283_v13 = vsel %vm165_vm0, %v4478_v12, 0.0 }
 0x317   :  { %429 = vrot.lane.b32.xlu0 %v304_v0, %s4233_s8  ;;  %v667_v0 = vmul.f32 %v4537_v61, %v4335_v39 }
 0x319   :  { %v671_v3 = vpack.c.bf16 %v668_v1, %v667_v0 }
 0x322   :  { %431 = vrot.lane.b32.xlu1 %v305_v4, %s4233_s8 }
 0x341   :  { %284 = vadd.xlane.f32.xlu0 %v283_v13 }
 0x352   :  { %v4488_v15 = vpop.f32.mrf.mxu2  ;;  %v4490_v23 = vpop.f32.mrf.mxu3 }
 0x355   :  { %552 = vrot.lane.b32.xlu0 %v547_v62, %s4233_s8 }
 0x35a   :  { %v4493_v24 = vpop.f32.mrf.mxu2  ;;  %v4495_v25 = vpop.f32.mrf.mxu3 }
 0x361   :  { %v282_v62 = vpop.xlane.xlu2 %281 }
 0x362   :  { %v482_v22 = vpop.f32.mrf.mxu3  ;;  %v607_v26 = vpop.f32.mrf.mxu2 }
 0x363   :  { %v4498_v27 = vadd.f32 %v4320_v20, %v607_v26  ;;  %v4503_v28 = vadd.f32 %v4320_v20, %v482_v22 }
 0x365   :  { %v617_v36 = vsel %vm165_vm0, %v4498_v27, -inf  ;;  %v492_v31 = vsel %vm165_vm0, %v4503_v28, -inf }
 0x366   :  { %618 = vmax.xlane.f32.xlu2 %v617_v36 }
 0x36a   :  { %v484_v29 = vpop.f32.mrf.mxu3  ;;  %v609_v30 = vpop.f32.mrf.mxu2 }
 0x36b   :  { %v4506_v42 = vadd.f32 %v4320_v20, %v609_v30  ;;  %v4523_v47 = vadd.f32 %v4320_v20, %v484_v29 }
 0x36d   :  { %v620_v32 = vsel %vm165_vm0, %v4506_v42, -inf  ;;  %v495_v50 = vsel %vm165_vm0, %v4523_v47, -inf }
 0x36e   :  { %493 = vmax.xlane.f32.xlu2 %v492_v31  ;;  %621 = vmax.xlane.f32.xlu1 %v620_v32 }
 0x372   :  { %v487_v33 = vpop.f32.mrf.mxu3  ;;  %v612_v35 = vpop.f32.mrf.mxu2 }
 0x373   :  { %v4513_v38 = vadd.f32 %v487_v33, %v4374_v2  ;;  %v4516_v41 = vadd.f32 %v612_v35, %v4374_v2 }
 0x375   :  { %v498_v45 = vsel %vm165_vm0, %v4513_v38, -inf  ;;  %v623_v46 = vsel %vm165_vm0, %v4516_v41, -inf }
 0x376   :  { %499 = vmax.xlane.f32.xlu2 %v498_v45  ;;  %624 = vmax.xlane.f32.xlu1 %v623_v46  ;;  %v279_v59 = vpop.xlane.xlu0 %278 }
 0x37a   :  { %v614_v48 = vpop.f32.mrf.mxu2  ;;  %v489_v54 = vpop.f32.mrf.mxu3 }
 0x37b   :  { %v4526_v49 = vadd.f32 %v614_v48, %v4374_v2  ;;  %v4533_v55 = vadd.f32 %v489_v54, %v4374_v2 }
 0x37c   :  { %v276_v63 = vpop.xlane.xlu1 %275 }
 0x37d   :  { %v626_v53 = vsel %vm165_vm0, %v4526_v49, -inf  ;;  %v501_v58 = vsel %vm165_vm0, %v4533_v55, -inf  ;;  %3815 = vrcp.f32 %v276_v63 }
 0x37e   :  { %496 = vmax.xlane.f32.xlu1 %v495_v50  ;;  %3817 = vrcp.f32 %v279_v59 }
 0x37f   :  { %627 = vmax.xlane.f32.xlu0 %v626_v53  ;;  %3819 = vrcp.f32 %v282_v62  ;;  %v543_v62 = vmul.f32 %v4482_v14, %v4337_v40 }
 0x383   :  { %v3816_v4 = vpop.eup %3815 }
 0x384   :  { %v3818_v8 = vpop.eup %3817  ;;  %v290_v9 = vmul.f32 %v3816_v4, %v4461_v60 }
 0x385   :  { %v291_v13 = vmul.f32 %v3818_v8, %v4457_v56  ;;  %v3820_v26 = vpop.eup %3819 }
 0x386   :  { %502 = vmax.xlane.f32.xlu1 %v501_v58  ;;  %v292_v29 = vmul.f32 %v3820_v26, %v4449_v44 }
 0x387   :  { %v294_v21 = vpack.c.bf16 %v291_v13, %v290_v9  ;;  %v669_v9 = vmul.f32 %v4537_v61, %v4356_v52  ;;  %v670_v13 = vmul.f32 %v4537_v61, %v4354_v51 }
 0x389   :  { %v430_v16 = vpop.permute.xlu0 %429 }
 0x393   :  { %675 = vrot.lane.b32.xlu0 %v671_v3, %s4233_s8 }
 0x394   :  { %v432_v5 = vpop.permute.xlu1 %431 }
 0x395   :  { %447 = vmatpush.bf16.msrb.mxu0 %v432_v5 }
 0x399   :  { %448 = vmatpush.bf16.msrb.mxu0 %v430_v16 }
 0x39c   :  { %3523 = vmatmul.msk.bf16.vlgmr.msrb.gmra.mxu0 %vm165_vm0, %v294_v21  ;;  %v672_v21 = vpack.c.bf16 %v670_v13, %v669_v9 }
 0x3b4   :  { %v285_v22 = vpop.xlane.xlu0 %284 }
 0x3b5   :  { %3821 = vrcp.f32 %v285_v22 }
 0x3bb   :  { %v3822_v36 = vpop.eup %3821 }
 0x3bc   :  { %v293_v30 = vmul.f32 %v3822_v36, %v4478_v12 }
 0x3be   :  { %v295_v31 = vpack.c.bf16 %v293_v30, %v292_v29 }
 0x3c0   :  { %3524 = vmatmul.msk.bf16.gmra.mxu0 %vm165_vm0, %v295_v31 }
 0x3c7   :  { %v553_v60 = vpop.permute.xlu0 %552 }
 0x3c8   :  { %568 = vmatpush.bf16.msra.mxu1 %v553_v60 }
 0x3d9   :  { %v619_v56 = vpop.xlane.xlu2 %618 }
 0x3da   :  { %v629_v32 = vsub.f32 %v4498_v27, %v619_v56 }
 0x3dc   :  { %v633_v33 = vmul.f32 1.442695, %v629_v32 }
 0x3de   :  { %3823 = vpow2.f32 %v633_v33 }
 0x3e1   :  { %v622_v35 = vpop.xlane.xlu1 %621  ;;  %v494_v45 = vpop.xlane.xlu2 %493 }
 0x3e2   :  { %v630_v46 = vsub.f32 %v4506_v42, %v622_v35  ;;  %v504_v48 = vsub.f32 %v4503_v28, %v494_v45 }
 0x3e4   :  { %v4553_v50 = vpop.eup %3823  ;;  %v635_v44 = vmul.f32 1.442695, %v630_v46  ;;  %v508_v12 = vmul.f32 1.442695, %v504_v48 }
 0x3e5   :  { %v641_v53 = vsel %vm165_vm0, %v4553_v50, 0.0 }
 0x3e6   :  { %3825 = vpow2.f32 %v635_v44  ;;  %642 = vadd.xlane.f32.xlu2 %v641_v53 }
 0x3e7   :  { %3827 = vpow2.f32 %v508_v12 }
 0x3e9   :  { %v625_v54 = vpop.xlane.xlu1 %624  ;;  %v500_v52 = vpop.xlane.xlu2 %499 }
 0x3ea   :  { %v506_v26 = vsub.f32 %v4513_v38, %v500_v52  ;;  %v631_v31 = vsub.f32 %v4516_v41, %v625_v54 }
 0x3ec   :  { %v4557_v27 = vpop.eup %3825  ;;  %v512_v51 = vmul.f32 1.442695, %v506_v26 }
 0x3ed   :  { %v3828_v58 = vpop.eup %3827  ;;  %v644_v63 = vsel %vm165_vm0, %v4557_v27, 0.0 }
 0x3ee   :  { %645 = vadd.xlane.f32.xlu2 %v644_v63  ;;  %v516_v28 = vsel %vm165_vm0, %v3828_v58, 0.0 }
 0x3ef   :  { %517 = vadd.xlane.f32.xlu1 %v516_v28 }
 0x3f1   :  { %v497_v42 = vpop.xlane.xlu1 %496 }
 0x3f2   :  { %v505_v59 = vsub.f32 %v4523_v47, %v497_v42  ;;  %v628_v36 = vpop.xlane.xlu0 %627 }
 0x3f3   :  { %v632_v29 = vsub.f32 %v4526_v49, %v628_v36 }
 0x3f4   :  { %v510_v0 = vmul.f32 1.442695, %v505_v59 }
 0x3f5   :  { %v639_v30 = vmul.f32 1.442695, %v632_v29  ;;  %v3733_v29 = vld [vmem:[#allocation8 + $0x18] sm:$0xff] }
 0x3f6   :  { %3829 = vpow2.f32 %v510_v0 }
 0x3f9   :  { %v503_v1 = vpop.xlane.xlu1 %502 }
 0x3fa   :  { %v507_v3 = vsub.f32 %v4533_v55, %v503_v1  ;;  %v542_v55 = vmul.f32 %v4482_v14, %v4335_v39  ;;  %v637_v39 = vmul.f32 1.442695, %v631_v31 }
 0x3fc   :  { %v3830_v4 = vpop.eup %3829  ;;  %v514_v5 = vmul.f32 1.442695, %v507_v3  ;;  %v546_v22 = vpack.c.bf16 %v543_v62, %v542_v55 }
 0x3fd   :  { %v519_v8 = vsel %vm165_vm0, %v3830_v4, 0.0 }
 0x3fe   :  { %3831 = vpow2.f32 %v514_v5  ;;  %520 = vadd.xlane.f32.xlu2 %v519_v8 }
 0x3ff   :  { %3833 = vpow2.f32 %v512_v51  ;;  %v3734_v51 = vld [vmem:[#allocation8 + $0x20] sm:$0xff] }
 0x400   :  { %3835 = vpow2.f32 %v639_v30  ;;  %738 = vmatpush.bf16.msra.mxu3 %v3734_v51 }
 0x401   :  { %3837 = vpow2.f32 %v637_v39 }
 0x404   :  { %v3832_v16 = vpop.eup %3831  ;;  %739 = vmatpush.bf16.msra.mxu3 %v3733_v29 }
 0x405   :  { %v525_v47 = vsel %vm165_vm0, %v3832_v16, 0.0  ;;  %v3834_v60 = vpop.eup %3833  ;;  %v676_v0 = vpop.permute.xlu0 %675 }
 0x406   :  { %526 = vadd.xlane.f32.xlu0 %v525_v47  ;;  %v522_v56 = vsel %vm165_vm0, %v3834_v60, 0.0  ;;  %v3836_v40 = vpop.eup %3835 }
 0x407   :  { %v650_v32 = vsel %vm165_vm0, %v3836_v40, 0.0  ;;  %v3838_v38 = vpop.eup %3837 }
 0x408   :  { %677 = vrot.lane.b32.xlu1 %v672_v21, %s4233_s8  ;;  %v647_v33 = vsel %vm165_vm0, %v3838_v38, 0.0 }
 0x416   :  { %550 = vrot.lane.b32.xlu2 %v546_v22, %s4233_s8 }
 0x419   :  { %v450_v26 = vpop.f32.mrf.mxu0 }
 0x421   :  { %v452_v36 = vpop.f32.mrf.mxu0 }
 0x432   :  { %523 = vadd.xlane.f32.xlu1 %v522_v56  ;;  %v451_v56 = vadd.f32 %v450_v26, %v4488_v15 }
 0x43a   :  { %651 = vadd.xlane.f32.xlu1 %v650_v32  ;;  %v453_v32 = vadd.f32 %v452_v36, %v4493_v24 }
 0x43f   :  { %648 = vadd.xlane.f32.xlu2 %v647_v33 }
 0x459   :  { %v643_v35 = vpop.xlane.xlu2 %642 }
 0x461   :  { %v646_v49 = vpop.xlane.xlu2 %645 }
 0x462   :  { %v518_v45 = vpop.xlane.xlu1 %517 }
 0x463   :  { %3839 = vrcp.f32 %v518_v45 }
 0x469   :  { %v3840_v46 = vpop.eup %3839 }
 0x46a   :  { %v532_v12 = vmul.f32 %v3840_v46, %v3828_v58 }
 0x471   :  { %v521_v41 = vpop.xlane.xlu2 %520 }
 0x472   :  { %3841 = vrcp.f32 %v521_v41 }
 0x473   :  { %3843 = vrcp.f32 %v646_v49 }
 0x474   :  { %3845 = vrcp.f32 %v643_v35 }
 0x478   :  { %v3842_v48 = vpop.eup %3841 }
 0x479   :  { %v3844_v44 = vpop.eup %3843  ;;  %v533_v53 = vmul.f32 %v3842_v48, %v3830_v4  ;;  %v551_v54 = vpop.permute.xlu2 %550 }
 0x47a   :  { %v678_v63 = vpop.permute.xlu1 %677  ;;  %569 = vmatpush.bf16.msra.mxu1 %v551_v54  ;;  %v3846_v28 = vpop.eup %3845  ;;  %v658_v59 = vmul.f32 %v3844_v44, %v4557_v27 }
 0x47b   :  { %v536_v42 = vpack.c.bf16 %v533_v53, %v532_v12  ;;  %693 = vmatpush.bf16.msra.mxu0 %v678_v63  ;;  %v657_v1 = vmul.f32 %v3846_v28, %v4553_v50  ;;  %v527_v5 = vpop.xlane.xlu0 %526 }
 0x47c   :  { %3847 = vrcp.f32 %v527_v5 }
 0x47d   :  { %3527 = vmatmul.msk.bf16.vlgmr.msra.gmra.mxu1 %vm165_vm0, %v536_v42  ;;  %v661_v3 = vpack.c.bf16 %v658_v59, %v657_v1  ;;  %v195_v42 = vld [vmem:[#allocation8 + $0x28] sm:$0x1] }
 0x47e   :  { %v712_v59 = vunpack.c.l.bf16 %v195_v42 }
 0x47f   :  { %694 = vmatpush.bf16.msra.mxu0 %v676_v0 }
 0x480   :  { %v713_v0 = vperm.slane %v712_v59, 0 }
 0x482   :  { %3531 = vmatmul.msk.bf16.vlgmr.msra.gmra.mxu0 %vm165_vm0, %v661_v3  ;;  %v3848_v4 = vpop.eup %3847 }
 0x483   :  { %v535_v13 = vmul.f32 %v3848_v4, %v3832_v16  ;;  %v455_v16 = vpop.f32.mrf.mxu0 }
 0x484   :  { %v456_v44 = vadd.f32 %v455_v16, %v4490_v23 }
 0x48b   :  { %v457_v30 = vpop.f32.mrf.mxu0 }
 0x48c   :  { %v458_v12 = vadd.f32 %v457_v30, %v4495_v25 }
 0x4a5   :  { %v524_v58 = vpop.xlane.xlu1 %523 }
 0x4a6   :  { %3849 = vrcp.f32 %v524_v58 }
 0x4ac   :  { %v3850_v8 = vpop.eup %3849 }
 0x4ad   :  { %v534_v9 = vmul.f32 %v3850_v8, %v3834_v60  ;;  %v652_v47 = vpop.xlane.xlu1 %651 }
 0x4ae   :  { %3851 = vrcp.f32 %v652_v47 }
 0x4af   :  { %v537_v21 = vpack.c.bf16 %v535_v13, %v534_v9 }
 0x4b1   :  { %3528 = vmatmul.msk.bf16.gmra.mxu1 %vm165_vm0, %v537_v21 }
 0x4b2   :  { %v649_v27 = vpop.xlane.xlu2 %648 }
 0x4b3   :  { %3853 = vrcp.f32 %v649_v27 }
 0x4b4   :  { %v3852_v50 = vpop.eup %3851 }
 0x4b5   :  { %v660_v22 = vmul.f32 %v3852_v50, %v3836_v40 }
 0x4b9   :  { %v3854_v55 = vpop.eup %3853 }
 0x4ba   :  { %v659_v62 = vmul.f32 %v3854_v55, %v3838_v38 }
 0x4bc   :  { %v662_v52 = vpack.c.bf16 %v660_v22, %v659_v62  ;;  %v4238_v62 = vmov 32.0  }
 0x4bd   :  { %3855 = vrcp.f32 %v4238_v62 }
 0x4be   :  { %3532 = vmatmul.msk.bf16.gmra.mxu0 %vm165_vm0, %v662_v52 }
 0x4fa   :  { %v571_v31 = vpop.f32.mrf.mxu1 }
 0x4fb   :  { %v581_v38 = vadd.f32 %v571_v31, %v451_v56 }
 0x4ff   :  { %v696_v60 = vpop.f32.mrf.mxu0 }
 0x500   :  { %v706_v35 = vadd.f32 %v696_v60, %v581_v38  ;;  %v3738_v38 = vld [vmem:[#allocation8 + $0x60] sm:$0xff] }
 0x501   :  { %943 = vmatpush.bf16.msrb.mxu2 %v3738_v38 }
 0x502   :  { %v573_v39 = vpop.f32.mrf.mxu1 }
 0x503   :  { %v582_v40 = vadd.f32 %v573_v39, %v453_v32 }
 0x507   :  { %v698_v33 = vpop.f32.mrf.mxu0 }
 0x508   :  { %v707_v49 = vadd.f32 %v698_v33, %v582_v40 }
 0x50a   :  { %v710_v45 = vpack.c.bf16 %v707_v49, %v706_v35 }
 0x50c   :  { %3541 = vmatmul.msk.bf16.vlgmr.msra.gmra.mxu3 %vm165_vm0, %v710_v45 }
 0x52e   :  { %v576_v41 = vpop.f32.mrf.mxu1 }
 0x52f   :  { %v583_v53 = vadd.f32 %v576_v41, %v456_v44 }
 0x536   :  { %v578_v48 = vpop.f32.mrf.mxu1 }
 0x537   :  { %v584_v54 = vadd.f32 %v578_v48, %v458_v12 }
 0x53b   :  { %v701_v46 = vpop.f32.mrf.mxu0 }
 0x53c   :  { %v708_v63 = vadd.f32 %v701_v46, %v583_v53  ;;  %v3737_v53 = vld [vmem:[#allocation8 + $0x58] sm:$0xff] }
 0x53d   :  { %944 = vmatpush.bf16.msrb.mxu2 %v3737_v53 }
 0x543   :  { %v703_v15 = vpop.f32.mrf.mxu0 }
 0x544   :  { %v709_v24 = vadd.f32 %v703_v15, %v584_v54  ;;  %v92_v54 = vld [vmem:[#allocation5] sm:$0xff]  ;;  %v93_v15 = vld [vmem:[#allocation5 + $0x8] sm:$0xff] }
 0x546   :  { %v711_v28 = vpack.c.bf16 %v709_v24, %v708_v63  ;;  %v4097_v63 = vld [vmem:[#allocation7] sm:$0xff] }
 0x547   :  { %v96_v24 = vadd.f32 %v4097_v63, %v92_v54 }
 0x548   :  { %3542 = vmatmul.msk.bf16.gmra.mxu3 %vm165_vm0, %v711_v28  ;;  %v4098_v28 = vld [vmem:[#allocation7 + $0x8] sm:$0xff] }
 0x549   :  { %v97_v42 = vadd.f32 %v4098_v28, %v93_v15 }
 0x54b   :  { %v4628_v59 = vpack.c.bf16 %v97_v42, %v96_v24 }
 0x54d   :  { %3561 = vmatmul.msk.bf16.vlgmr.msrb.gmra.mxu2 %vm165_vm0, %v4628_v59 }
 0x58f   :  { %v741_v1 = vpop.f32.mrf.mxu3 }
 0x590   :  { %v742_v3 = vadd.f32 %v741_v1, %v713_v0  ;;  %v95_v1 = vld [vmem:[#allocation5 + $0x18] sm:$0xff] }
 0x592   :  { %v751_v5 = vadd.f32 %v742_v3, %v4289_v6 }
 0x594   :  { %v757_v58 = vsel %vm165_vm0, %v751_v5, 0.0 }
 0x595   :  { %758 = vadd.xlane.f32.xlu2 %v757_v58 }
 0x597   :  { %v743_v23 = vpop.f32.mrf.mxu3 }
 0x598   :  { %v744_v25 = vadd.f32 %v743_v23, %v713_v0  ;;  %v3736_v23 = vld [vmem:[#allocation8 + $0x48] sm:$0xff] }
 0x599   :  { %897 = vmatpush.bf16.msrb.mxu1 %v3736_v23 }
 0x59a   :  { %v752_v4 = vadd.f32 %v744_v25, %v4291_v7  ;;  %v3856_v7 = vpop.eup %3855 }
 0x59b   :  { %v770_v22 = vmul.f32 32.0, %v3856_v7  ;;  %vm774_vm11 = vweird.f32 %v3856_v7 }
 0x59c   :  { %v760_v8 = vsel %vm165_vm0, %v752_v4, 0.0 }
 0x59d   :  { %761 = vadd.xlane.f32.xlu0 %v760_v8  ;;  %v771_v52 = vsub.f32 1.0, %v770_v22  ;;  %v3735_v8 = vld [vmem:[#allocation8 + $0x40] sm:$0xff]  ;;  %v755_v22 = vld [vmem:[#allocation8 + $0x30] sm:$0x1] }
 0x59e   :  { %898 = vmatpush.bf16.msrb.mxu1 %v3735_v8 }
 0x59f   :  { %v772_v26 = vmul.f32 %v3856_v7, %v771_v52 }
 0x5a1   :  { %v773_v51 = vadd.f32 %v3856_v7, %v772_v26 }
 0x5a3   :  { %v4602_v36 = vsel %vm774_vm11, %v3856_v7, %v773_v51 }
 0x5cb   :  { %v746_v9 = vpop.f32.mrf.mxu3 }
 0x5cc   :  { %v747_v13 = vadd.f32 %v746_v9, %v713_v0 }
 0x5ce   :  { %v753_v47 = vadd.f32 %v747_v13, %v4293_v10 }
 0x5d0   :  { %v763_v21 = vsel %vm165_vm0, %v753_v47, 0.0 }
 0x5d1   :  { %764 = vadd.xlane.f32.xlu1 %v763_v21 }
 0x5d3   :  { %v748_v27 = vpop.f32.mrf.mxu3 }
 0x5d4   :  { %v749_v50 = vadd.f32 %v748_v27, %v713_v0  ;;  %v94_v0 = vld [vmem:[#allocation5 + $0x10] sm:$0xff] }
 0x5d5   :  { %v98_v3 = vadd.f32 %v4097_v63, %v94_v0 }
 0x5d6   :  { %v754_v6 = vadd.f32 %v749_v50, %v4295_v11 }
 0x5d8   :  { %v766_v55 = vsel %vm165_vm0, %v754_v6, 0.0 }
 0x5d9   :  { %767 = vadd.xlane.f32.xlu2 %v766_v55 }
 0x608   :  { %v759_v10 = vpop.xlane.xlu2 %758 }
 0x609   :  { %v776_v29 = vmul.f32 %v4602_v36, %v759_v10  ;;  %v852_v10 = vunpack.c.l.bf16 %v755_v22  ;;  %v946_v22 = vpop.f32.mrf.mxu2 }
 0x60b   :  { %v4605_v16 = vsub.f32 %v751_v5, %v776_v29  ;;  %v99_v5 = vadd.f32 %v4098_v28, %v95_v1  ;;  %v756_v29 = vld [vmem:[#allocation8 + $0x38] sm:$0x1] }
 0x60d   :  { %v784_v11 = vmul.f32 %v4605_v16, %v4605_v16  ;;  %v4634_v58 = vpack.c.bf16 %v99_v5, %v98_v3 }
 0x60f   :  { %v788_v30 = vsel %vm165_vm0, %v784_v11, 0.0  ;;  %3562 = vmatmul.msk.bf16.gmra.mxu2 %vm165_vm0, %v4634_v58 }
 0x610   :  { %v762_v31 = vpop.xlane.xlu0 %761  ;;  %789 = vadd.xlane.f32.xlu0 %v788_v30 }
 0x611   :  { %v777_v60 = vmul.f32 %v4602_v36, %v762_v31 }
 0x613   :  { %v4611_v39 = vsub.f32 %v752_v4, %v777_v60  ;;  %v853_v60 = vperm.slane %v852_v10, 0 }
 0x615   :  { %v785_v56 = vmul.f32 %v4611_v39, %v4611_v39 }
 0x617   :  { %v791_v32 = vsel %vm165_vm0, %v785_v56, 0.0  ;;  %v858_v56 = vunpack.c.l.bf16 %v756_v29 }
 0x618   :  { %792 = vadd.xlane.f32.xlu1 %v791_v32 }
 0x644   :  { %v765_v40 = vpop.xlane.xlu1 %764 }
 0x645   :  { %v778_v33 = vmul.f32 %v4602_v36, %v765_v40 }
 0x647   :  { %v4617_v35 = vsub.f32 %v753_v47, %v778_v33  ;;  %v859_v33 = vperm.slane %v858_v56, 0 }
 0x649   :  { %v786_v49 = vmul.f32 %v4617_v35, %v4617_v35 }
 0x64b   :  { %v794_v45 = vsel %vm165_vm0, %v786_v49, 0.0 }
 0x64c   :  { %795 = vadd.xlane.f32.xlu2 %v794_v45  ;;  %v768_v41 = vpop.xlane.xlu2 %767 }
 0x64d   :  { %v779_v46 = vmul.f32 %v4602_v36, %v768_v41 }
 0x64f   :  { %v4623_v48 = vsub.f32 %v754_v6, %v779_v46 }
 0x651   :  { %v787_v44 = vmul.f32 %v4623_v48, %v4623_v48 }
 0x653   :  { %v797_v12 = vsel %vm165_vm0, %v787_v44, 0.0 }
 0x654   :  { %798 = vadd.xlane.f32.xlu0 %v797_v12 }
 0x668   :  { %1148 = vrot.lane.b32.xlu0 %v4326_v34, %s4239_s10 }
 0x683   :  { %v790_v25 = vpop.xlane.xlu0 %789 }
 0x684   :  { %v800_v4 = vmul.f32 %v790_v25, %v4602_v36 }
 0x686   :  { %v804_v9 = vadd.f32 1e-05, %v800_v4 }
 0x688   :  { %3857 = vrsqrt.f32 %v804_v9  ;;  %vm814_vm13 = vweird.f32 %v804_v9 }
 0x68b   :  { %v793_v13 = vpop.xlane.xlu1 %792 }
 0x68c   :  { %v801_v47 = vmul.f32 %v793_v13, %v4602_v36 }
 0x68e   :  { %v3858_v21 = vpop.eup %3857  ;;  %v805_v27 = vadd.f32 1e-05, %v801_v47 }
 0x68f   :  { %v809_v50 = vmul.f32 %v3858_v21, %v804_v9  ;;  %vm815_vm12 = vweird.f32 %v3858_v21 }
 0x690   :  { %3859 = vrsqrt.f32 %v805_v27  ;;  %vm816_vm14 = vmor %vm814_vm13, %vm815_vm12  ;;  %vm824_vm1 = vweird.f32 %v805_v27 }
 0x691   :  { %v810_v6 = vmul.f32 %v3858_v21, %v809_v50 }
 0x693   :  { %v811_v55 = vmul.f32 0.5, %v810_v6 }
 0x695   :  { %v812_v62 = vsub.f32 1.5, %v811_v55 }
 0x696   :  { %v3860_v7 = vpop.eup %3859 }
 0x697   :  { %v813_v52 = vmul.f32 %v3858_v21, %v812_v62  ;;  %v819_v26 = vmul.f32 %v3860_v7, %v805_v27  ;;  %vm825_vm15 = vweird.f32 %v3860_v7 }
 0x698   :  { %vm826_vm2 = vmor %vm824_vm1, %vm825_vm15 }
 0x699   :  { %v820_v51 = vmul.f32 %v3860_v7, %v819_v26  ;;  %v817_v11 = vsel %vm816_vm14, %v3858_v21, %v813_v52  ;;  %v948_v52 = vpop.f32.mrf.mxu2 }
 0x69a   :  { %v848_v32 = vmul.f32 %v817_v11, %v4605_v16 }
 0x69b   :  { %v821_v30 = vmul.f32 0.5, %v820_v51 }
 0x69c   :  { %v854_v49 = vmul.f32 %v853_v60, %v848_v32 }
 0x69d   :  { %v822_v31 = vsub.f32 1.5, %v821_v30 }
 0x69e   :  { %v4642_v46 = vadd.f32 %v859_v33, %v854_v49 }
 0x69f   :  { %v823_v38 = vmul.f32 %v3860_v7, %v822_v31 }
 0x6a1   :  { %v827_v40 = vsel %vm826_vm2, %v3860_v7, %v823_v38  ;;  %v951_v51 = vpop.f32.mrf.mxu2 }
 0x6a2   :  { %v849_v45 = vmul.f32 %v827_v40, %v4611_v39 }
 0x6a4   :  { %v855_v41 = vmul.f32 %v853_v60, %v849_v45 }
 0x6a6   :  { %v4644_v44 = vadd.f32 %v859_v33, %v855_v41 }
 0x6a8   :  { %v868_v12 = vpack.c.bf16 %v4644_v44, %v4642_v46 }
 0x6a9   :  { %v953_v11 = vpop.f32.mrf.mxu2 }
 0x6aa   :  { %3551 = vmatmul.msk.bf16.vlgmr.msrb.gmra.mxu1 %vm165_vm0, %v868_v12 }
 0x6bf   :  { %v796_v53 = vpop.xlane.xlu2 %795 }
 0x6c0   :  { %v802_v16 = vmul.f32 %v796_v53, %v4602_v36 }
 0x6c2   :  { %v806_v54 = vadd.f32 1e-05, %v802_v16 }
 0x6c4   :  { %3861 = vrsqrt.f32 %v806_v54  ;;  %vm834_vm4 = vweird.f32 %v806_v54 }
 0x6c7   :  { %v799_v15 = vpop.xlane.xlu0 %798 }
 0x6c8   :  { %v803_v63 = vmul.f32 %v799_v15, %v4602_v36 }
 0x6ca   :  { %v3862_v24 = vpop.eup %3861  ;;  %v807_v39 = vadd.f32 1e-05, %v803_v63 }
 0x6cb   :  { %v829_v28 = vmul.f32 %v3862_v24, %v806_v54  ;;  %vm835_vm3 = vweird.f32 %v3862_v24  ;;  %v870_v54 = vld [vmem:[#allocation8 + $0x50] sm:$0x1] }
 0x6cc   :  { %3863 = vrsqrt.f32 %v807_v39  ;;  %vm836_vm5 = vmor %vm834_vm4, %vm835_vm3  ;;  %vm844_vm7 = vweird.f32 %v807_v39  ;;  %v871_v15 = vunpack.c.l.bf16 %v870_v54 }
 0x6cd   :  { %v830_v42 = vmul.f32 %v3862_v24, %v829_v28 }
 0x6ce   :  { %v872_v63 = vperm.slane %v871_v15, 0 }
 0x6cf   :  { %v831_v0 = vmul.f32 0.5, %v830_v42 }
 0x6d1   :  { %v832_v1 = vsub.f32 1.5, %v831_v0 }
 0x6d2   :  { %v3864_v3 = vpop.eup %3863 }
 0x6d3   :  { %v833_v5 = vmul.f32 %v3862_v24, %v832_v1  ;;  %v839_v23 = vmul.f32 %v3864_v3, %v807_v39  ;;  %vm845_vm6 = vweird.f32 %v3864_v3 }
 0x6d4   :  { %vm846_vm8 = vmor %vm844_vm7, %vm845_vm6  ;;  %vm1703_vm6 = vcmask 523264  }
 0x6d5   :  { %v840_v25 = vmul.f32 %v3864_v3, %v839_v23  ;;  %v837_v4 = vsel %vm836_vm5, %v3862_v24, %v833_v5 }
 0x6d6   :  { %v850_v13 = vmul.f32 %v837_v4, %v4617_v35  ;;  %v916_v35 = vld [vmem:[#allocation8 + $0x68] sm:$0x1] }
 0x6d7   :  { %v841_v8 = vmul.f32 0.5, %v840_v25  ;;  %v917_v26 = vunpack.c.l.bf16 %v916_v35 }
 0x6d8   :  { %v856_v50 = vmul.f32 %v853_v60, %v850_v13 }
 0x6d9   :  { %v842_v9 = vsub.f32 1.5, %v841_v8  ;;  %v918_v10 = vperm.slane %v917_v26, 0 }
 0x6da   :  { %v4653_v55 = vadd.f32 %v859_v33, %v856_v50  ;;  %v4682_v41 = vpop.permute.xlu0 %1148 }
 0x6db   :  { %v843_v47 = vmul.f32 %v3864_v3, %v842_v9  ;;  %v952_v29 = vadd.f32 %v951_v51, %v918_v10  ;;  %v4660_v31 = vadd.f32 %v946_v22, %v918_v10 }
 0x6dd   :  { %v847_v21 = vsel %vm846_vm8, %v3864_v3, %v843_v47  ;;  %v969_v40 = vpack.c.bf16 %v952_v29, %v952_v29 }
 0x6de   :  { %v851_v27 = vmul.f32 %v847_v21, %v4623_v48  ;;  %v954_v48 = vadd.f32 %v953_v11, %v918_v10 }
 0x6df   :  { %v4677_v49 = vunpack.c.l.bf16 %v969_v40 }
 0x6e0   :  { %v857_v6 = vmul.f32 %v853_v60, %v851_v27  ;;  %v966_v30 = vpack.c.bf16 %v954_v48, %v952_v29  ;;  %v4662_v60 = vadd.f32 %v948_v52, %v918_v10 }
 0x6e1   :  { %v1153_v12 = vmul.f32 %v4682_v41, %v4677_v49 }
 0x6e2   :  { %v4655_v62 = vadd.f32 %v859_v33, %v857_v6  ;;  %v4665_v56 = vsel %vm165_vm0, %v966_v30, 0  ;;  %v965_v32 = vpack.c.bf16 %v4662_v60, %v4660_v31  ;;  %v970_v33 = vpack.c.bf16 %v954_v48, %v954_v48 }
 0x6e3   :  { %999 = vmatpush.bf16.xpose.msrb.mxu0 %v4665_v56  ;;  %1089 = vmatpush.bf16.xpose.msrb.mxu3 %v4665_v56 }
 0x6e4   :  { %v869_v7 = vpack.c.bf16 %v4655_v62, %v4653_v55  ;;  %v4672_v38 = vsel %vm165_vm0, %v965_v32, 0  ;;  %v4679_v45 = vunpack.c.l.bf16 %v970_v33 }
 0x6e6   :  { %3552 = vmatmul.msk.bf16.gmra.mxu1 %vm165_vm0, %v869_v7  ;;  %v1154_v53 = vmul.f32 %v4682_v41, %v4679_v45 }
 0x6e8   :  { %v1156_v16 = vpack.c.bf16 %v1154_v53, %v1153_v12 }
 0x6ea   :  { %1161 = vrot.lane.b32.xlu0 %v1156_v16, %s4236_s3 }
 0x6eb   :  { %1000 = vmatpush.bf16.xpose.msrb.mxu0 %v4672_v38  ;;  %1090 = vmatpush.bf16.xpose.msrb.mxu3 %v4672_v38 }
 0x6f3   :  { %1241 = vmatpush.bf16.xpose.msra.mxu0 %v4665_v56 }
 0x6fb   :  { %1242 = vmatpush.bf16.xpose.msra.mxu0 %v4672_v38 }
 0x727   :  { %v900_v24 = vpop.f32.mrf.mxu1 }
 0x728   :  { %v901_v39 = vadd.f32 %v900_v24, %v872_v63 }
 0x72a   :  { %v961_v28 = vpack.c.bf16 %v901_v39, %v901_v39 }
 0x72c   :  { %v971_v1 = vunpack.c.l.bf16 %v961_v28 }
 0x72e   :  { %v975_v23 = vmul.f32 %v971_v1, %v4310_v17  ;;  %v1071_v25 = vmul.f32 %v971_v1, %v4326_v34  ;;  %v1223_v4 = vmul.f32 %v971_v1, %v4314_v18  ;;  %v4693_v8 = vmul.f32 %v971_v1, %v4316_v19 }
 0x72f   :  { %v902_v42 = vpop.f32.mrf.mxu1 }
 0x730   :  { %v903_v0 = vadd.f32 %v902_v42, %v872_v63 }
 0x732   :  { %v962_v3 = vpack.c.bf16 %v903_v0, %v903_v0 }
 0x734   :  { %v972_v5 = vunpack.c.l.bf16 %v962_v3 }
 0x736   :  { %v976_v9 = vmul.f32 %v972_v5, %v4310_v17  ;;  %v1072_v13 = vmul.f32 %v972_v5, %v4326_v34  ;;  %v1224_v47 = vmul.f32 %v972_v5, %v4314_v18  ;;  %v4699_v21 = vmul.f32 %v972_v5, %v4316_v19 }
 0x738   :  { %v979_v27 = vpack.c.bf16 %v976_v9, %v975_v23  ;;  %v1075_v50 = vpack.c.bf16 %v1072_v13, %v1071_v25  ;;  %v1227_v6 = vpack.c.bf16 %v1224_v47, %v1223_v4  ;;  %v1350_v7 = vpack.c.bf16 %v4699_v21, %v4693_v8 }
 0x73a   :  { %3563 = vmatmul.msk.bf16.vlgmr.msrb.gmra.mxu0 %vm165_vm0, %v979_v27  ;;  %3565 = vmatmul.msk.bf16.vlgmr.msrb.gmra.mxu3 %vm165_vm0, %v1075_v50 }
 0x75c   :  { %v1162_v39 = vpop.permute.xlu0 %1161 }
 0x75d   :  { %1177 = vmatpush.bf16.msra.mxu1 %v1162_v39 }
 0x763   :  { %v905_v22 = vpop.f32.mrf.mxu1 }
 0x764   :  { %v906_v52 = vadd.f32 %v905_v22, %v872_v63 }
 0x766   :  { %v963_v35 = vpack.c.bf16 %v906_v52, %v906_v52 }
 0x768   :  { %v973_v10 = vunpack.c.l.bf16 %v963_v35 }
 0x76a   :  { %v977_v48 = vmul.f32 %v973_v10, %v4310_v17  ;;  %v1073_v30 = vmul.f32 %v973_v10, %v4326_v34  ;;  %v4710_v33 = vmul.f32 %v973_v10, %v4316_v19 }
 0x76b   :  { %v907_v26 = vpop.f32.mrf.mxu1 }
 0x76c   :  { %v908_v51 = vadd.f32 %v907_v26, %v872_v63  ;;  %v1225_v63 = vmul.f32 %v973_v10, %v4314_v18 }
 0x76e   :  { %v964_v29 = vpack.c.bf16 %v908_v51, %v908_v51 }
 0x770   :  { %v974_v11 = vunpack.c.l.bf16 %v964_v29 }
 0x772   :  { %v978_v32 = vmul.f32 %v974_v11, %v4310_v17  ;;  %v1074_v40 = vmul.f32 %v974_v11, %v4326_v34  ;;  %v4713_v12 = vmul.f32 %v974_v11, %v4316_v19  ;;  %v1226_v15 = vmul.f32 %v974_v11, %v4314_v18 }
 0x774   :  { %v980_v53 = vpack.c.bf16 %v978_v32, %v977_v48  ;;  %v1076_v16 = vpack.c.bf16 %v1074_v40, %v1073_v30  ;;  %v1351_v54 = vpack.c.bf16 %v4713_v12, %v4710_v33  ;;  %v1228_v24 = vpack.c.bf16 %v1226_v15, %v1225_v63 }
 0x775   :  { %v967_v48 = vpack.c.bf16 %v4660_v31, %v4660_v31  ;;  %v968_v30 = vpack.c.bf16 %v4662_v60, %v4662_v60 }
 0x776   :  { %3564 = vmatmul.msk.bf16.gmra.mxu0 %vm165_vm0, %v980_v53  ;;  %3566 = vmatmul.msk.bf16.gmra.mxu3 %vm165_vm0, %v1076_v16 }
 0x777   :  { %v4743_v32 = vunpack.c.l.bf16 %v967_v48  ;;  %v4745_v40 = vunpack.c.l.bf16 %v968_v30 }
 0x779   :  { %v1151_v53 = vmul.f32 %v4682_v41, %v4743_v32  ;;  %v1152_v16 = vmul.f32 %v4682_v41, %v4745_v40 }
 0x77b   :  { %v1155_v63 = vpack.c.bf16 %v1152_v16, %v1151_v53 }
 0x786   :  { %3571 = vmatmul.msk.bf16.vlgmr.msra.gmra.mxu0 %vm165_vm0, %v1227_v6 }
 0x796   :  { %3572 = vmatmul.msk.bf16.gmra.mxu0 %vm165_vm0, %v1228_v24 }
 0x7b7   :  { %v1002_v11 = vpop.f32.mrf.mxu0 }
 0x7bd   :  { %v1092_v28 = vpop.f32.mrf.mxu3 }
 0x7be   :  { %v1093_v42 = vadd.f32 %v4320_v20, %v1092_v28 }
 0x7bf   :  { %v1004_v15 = vpop.f32.mrf.mxu0 }
 0x7c0   :  { %v1102_v0 = vsel %vm165_vm0, %v1093_v42, -inf }
 0x7c1   :  { %1103 = vmax.xlane.f32.xlu1 %v1102_v0 }
 0x7c5   :  { %v1094_v1 = vpop.f32.mrf.mxu3 }
 0x7c6   :  { %v1095_v3 = vadd.f32 %v4320_v20, %v1094_v1 }
 0x7c8   :  { %v1105_v5 = vsel %vm165_vm0, %v1095_v3, -inf }
 0x7c9   :  { %1106 = vmax.xlane.f32.xlu2 %v1105_v5 }
 0x7f3   :  { %v1007_v24 = vpop.f32.mrf.mxu0 }
 0x7f9   :  { %v1097_v23 = vpop.f32.mrf.mxu3 }
 0x7fa   :  { %v1098_v25 = vadd.f32 %v1097_v23, %v4374_v2 }
 0x7fb   :  { %v1009_v31 = vpop.f32.mrf.mxu0 }
 0x7fc   :  { %v1108_v4 = vsel %vm165_vm0, %v1098_v25, -inf }
 0x7fd   :  { %1109 = vmax.xlane.f32.xlu1 %v1108_v4 }
 0x801   :  { %v1099_v9 = vpop.f32.mrf.mxu3 }
 0x802   :  { %v1100_v13 = vadd.f32 %v1099_v9, %v4374_v2  ;;  %v1003_v9 = vadd.f32 %v4320_v20, %v1002_v11 }
 0x803   :  { %v1244_v39 = vpop.f32.mrf.mxu0 }
 0x804   :  { %v1111_v47 = vsel %vm165_vm0, %v1100_v13, -inf  ;;  %v1245_v11 = vadd.f32 %v4320_v20, %v1244_v39 }
 0x805   :  { %1112 = vmax.xlane.f32.xlu2 %v1111_v47  ;;  %v1012_v47 = vsel %vm165_vm0, %v1003_v9, -inf }
 0x806   :  { %v1254_v48 = vsel %vm165_vm0, %v1245_v11, -inf }
 0x80b   :  { %v1246_v5 = vpop.f32.mrf.mxu0 }
 0x80c   :  { %v4778_v30 = vadd.f32 %v4320_v20, %v1246_v5 }
 0x80e   :  { %v1257_v53 = vsel %vm165_vm0, %v4778_v30, -inf }
 0x834   :  { %v1104_v27 = vpop.xlane.xlu1 %1103 }
 0x835   :  { %v1114_v50 = vsub.f32 %v1093_v42, %v1104_v27  ;;  %v1249_v27 = vpop.f32.mrf.mxu0 }
 0x837   :  { %v1118_v6 = vmul.f32 1.442695, %v1114_v50  ;;  %v1005_v50 = vadd.f32 %v4320_v20, %v1004_v15 }
 0x839   :  { %3865 = vpow2.f32 %v1118_v6  ;;  %v4766_v6 = vadd.f32 %v1249_v27, %v4374_v2 }
 0x83c   :  { %v1107_v22 = vpop.xlane.xlu2 %1106 }
 0x83d   :  { %v1115_v52 = vsub.f32 %v1095_v3, %v1107_v22  ;;  %v1251_v16 = vpop.f32.mrf.mxu0 }
 0x83e   :  { %v4785_v15 = vadd.f32 %v1251_v16, %v4374_v2 }
 0x83f   :  { %v4731_v35 = vpop.eup %3865  ;;  %v1120_v26 = vmul.f32 1.442695, %v1115_v52  ;;  %v1015_v52 = vsel %vm165_vm0, %v1005_v50, -inf }
 0x840   :  { %v1126_v51 = vsel %vm165_vm0, %v4731_v35, 0.0 }
 0x841   :  { %3867 = vpow2.f32 %v1120_v26  ;;  %1127 = vadd.xlane.f32.xlu1 %v1126_v51  ;;  %v1260_v26 = vsel %vm165_vm0, %v4766_v6, -inf  ;;  %v1008_v51 = vadd.f32 %v1007_v24, %v4374_v2 }
 0x847   :  { %v4735_v10 = vpop.eup %3867 }
 0x848   :  { %v1129_v29 = vsel %vm165_vm0, %v4735_v10, 0.0 }
 0x849   :  { %1130 = vadd.xlane.f32.xlu2 %v1129_v29  ;;  %v1018_v29 = vsel %vm165_vm0, %v1008_v51, -inf }
 0x85a   :  { %1159 = vrot.lane.b32.xlu1 %v1155_v63, %s4236_s3  ;;  %v1263_v63 = vsel %vm165_vm0, %v4785_v15, -inf }
 0x862   :  { %3787 = vrot.lane.b32.xlu1 %v4388_v37, %s4239_s10 }
 0x870   :  { %v1110_v60 = vpop.xlane.xlu1 %1109 }
 0x871   :  { %v1116_v28 = vsub.f32 %v1098_v25, %v1110_v60 }
 0x873   :  { %v1122_v42 = vmul.f32 1.442695, %v1116_v28 }
 0x875   :  { %3869 = vpow2.f32 %v1122_v42 }
 0x878   :  { %v1113_v0 = vpop.xlane.xlu2 %1112 }
 0x879   :  { %v1117_v1 = vsub.f32 %v1100_v13, %v1113_v0  ;;  %v4762_v13 = vadd.f32 %v1009_v31, %v4374_v2 }
 0x87b   :  { %v4754_v3 = vpop.eup %3869  ;;  %v1124_v23 = vmul.f32 1.442695, %v1117_v1  ;;  %v1021_v22 = vsel %vm165_vm0, %v4762_v13, -inf }
 0x87c   :  { %v1132_v4 = vsel %vm165_vm0, %v4754_v3, 0.0 }
 0x87d   :  { %3871 = vpow2.f32 %v1124_v23  ;;  %1133 = vadd.xlane.f32.xlu2 %v1132_v4 }
 0x883   :  { %v3872_v37 = vpop.eup %3871 }
 0x884   :  { %v1135_v25 = vsel %vm165_vm0, %v3872_v37, 0.0 }
 0x885   :  { %1013 = vmax.xlane.f32.xlu2 %v1012_v47  ;;  %1136 = vadd.xlane.f32.xlu0 %v1135_v25 }
 0x88c   :  { %1022 = vmax.xlane.f32.xlu1 %v1021_v22 }
 0x88d   :  { %1016 = vmax.xlane.f32.xlu2 %v1015_v52  ;;  %1261 = vmax.xlane.f32.xlu0 %v1260_v26 }
 0x895   :  { %1019 = vmax.xlane.f32.xlu2 %v1018_v29 }
 0x89d   :  { %1255 = vmax.xlane.f32.xlu2 %v1254_v48 }
 0x8a1   :  { %1423 = vrot.lane.b32.xlu0 %v4316_v19, %s4239_s10 }
 0x8a5   :  { %1258 = vmax.xlane.f32.xlu2 %v1257_v53 }
 0x8ad   :  { %1264 = vmax.xlane.f32.xlu2 %v1263_v63 }
 0x8b4   :  { %v1128_v31 = vpop.xlane.xlu1 %1127 }
 0x8bc   :  { %v1131_v24 = vpop.xlane.xlu2 %1130 }
 0x8bd   :  { %3873 = vrcp.f32 %v1131_v24 }
 0x8be   :  { %3875 = vrcp.f32 %v1128_v31 }
 0x8c3   :  { %v3874_v60 = vpop.eup %3873 }
 0x8c4   :  { %v3876_v39 = vpop.eup %3875  ;;  %v1143_v28 = vmul.f32 %v3874_v60, %v4735_v10 }
 0x8c5   :  { %v1142_v42 = vmul.f32 %v3876_v39, %v4731_v35 }
 0x8c7   :  { %v1146_v1 = vpack.c.bf16 %v1143_v28, %v1142_v42 }
 0x8cc   :  { %v1160_v0 = vpop.permute.xlu1 %1159 }
 0x8cd   :  { %1178 = vmatpush.bf16.msra.mxu1 %v1160_v0 }
 0x8d0   :  { %3567 = vmatmul.msk.bf16.vlgmr.msra.gmra.mxu1 %vm165_vm0, %v1146_v1 }
 0x8d1   :  { %1364 = vmatpush.bf16.xpose.msrb.mxu1 %v4665_v56 }
 0x8d4   :  { %v3788_v5 = vpop.permute.xlu1 %3787 }
 0x8d5   :  { %v4793_v23 = vunpack.i.l.bf16 %v3788_v5 }
 0x8d7   :  { %v1065_v4 = vmul.f32 %v4793_v23, %v4743_v32  ;;  %v1066_v10 = vmul.f32 %v4793_v23, %v4745_v40 }
 0x8d9   :  { %1365 = vmatpush.bf16.xpose.msrb.mxu1 %v4672_v38  ;;  %v1069_v47 = vpack.c.bf16 %v1066_v10, %v1065_v4  ;;  %v1067_v4 = vmul.f32 %v4793_v23, %v4677_v49 }
 0x8db   :  { %1192 = vrot.lane.b32.xlu0 %v1069_v47, %s4236_s3 }
 0x8f0   :  { %v1134_v35 = vpop.xlane.xlu2 %1133 }
 0x8f1   :  { %3877 = vrcp.f32 %v1134_v35 }
 0x8f7   :  { %v3878_v52 = vpop.eup %3877 }
 0x8f8   :  { %v1137_v25 = vpop.xlane.xlu0 %1136  ;;  %v1014_v56 = vpop.xlane.xlu2 %1013  ;;  %v1144_v29 = vmul.f32 %v3878_v52, %v4754_v3 }
 0x8f9   :  { %3879 = vrcp.f32 %v1137_v25  ;;  %v1024_v27 = vsub.f32 %v1003_v9, %v1014_v56  ;;  %v4828_v56 = vunpack.i.h.bf16 %v3788_v5 }
 0x8fb   :  { %v1028_v22 = vmul.f32 1.442695, %v1024_v27  ;;  %v1306_v27 = vmul.f32 %v4828_v56, %v4679_v45 }
 0x8fd   :  { %3881 = vpow2.f32 %v1028_v22 }
 0x8ff   :  { %v3880_v26 = vpop.eup %3879  ;;  %v1023_v12 = vpop.xlane.xlu1 %1022 }
 0x900   :  { %v1017_v38 = vpop.xlane.xlu2 %1016  ;;  %v1145_v48 = vmul.f32 %v3880_v26, %v3872_v37  ;;  %v4843_v5 = vpop.xlane.xlu0 %1261 }
 0x901   :  { %v1025_v53 = vsub.f32 %v1005_v50, %v1017_v38 }
 0x902   :  { %v1147_v16 = vpack.c.bf16 %v1145_v48, %v1144_v29 }
 0x903   :  { %v4802_v63 = vpop.eup %3881  ;;  %v1030_v24 = vmul.f32 1.442695, %v1025_v53 }
 0x904   :  { %3568 = vmatmul.msk.bf16.gmra.mxu1 %vm165_vm0, %v1147_v16  ;;  %v1036_v31 = vsel %vm165_vm0, %v4802_v63, 0.0  ;;  %v1027_v16 = vsub.f32 %v4762_v13, %v1023_v12 }
 0x905   :  { %1037 = vadd.xlane.f32.xlu1 %v1036_v31  ;;  %3883 = vpow2.f32 %v1030_v24 }
 0x908   :  { %v1020_v9 = vpop.xlane.xlu2 %1019 }
 0x909   :  { %v1026_v60 = vsub.f32 %v1008_v51, %v1020_v9  ;;  %v1034_v9 = vmul.f32 1.442695, %v1027_v16 }
 0x90b   :  { %v1032_v39 = vmul.f32 1.442695, %v1026_v60  ;;  %v3884_v28 = vpop.eup %3883 }
 0x90c   :  { %v1039_v3 = vsel %vm165_vm0, %v3884_v28, 0.0 }
 0x90d   :  { %3885 = vpow2.f32 %v1032_v39  ;;  %1040 = vadd.xlane.f32.xlu2 %v1039_v3 }
 0x910   :  { %v1256_v37 = vpop.xlane.xlu2 %1255 }
 0x911   :  { %v1266_v50 = vsub.f32 %v1245_v11, %v1256_v37  ;;  %v1068_v11 = vmul.f32 %v4793_v23, %v4679_v45 }
 0x913   :  { %v4808_v42 = vpop.eup %3885  ;;  %v1270_v0 = vmul.f32 1.442695, %v1266_v50  ;;  %v1070_v21 = vpack.c.bf16 %v1068_v11, %v1067_v4  ;;  %v4850_v24 = vpop.permute.xlu0 %1423 }
 0x914   :  { %3575 = vmatmul.msk.bf16.vlgmr.msrb.gmra.mxu1 %vm165_vm0, %v1350_v7  ;;  %v1042_v1 = vsel %vm165_vm0, %v4808_v42, 0.0 }
 0x915   :  { %3887 = vpow2.f32 %v1270_v0  ;;  %1043 = vadd.xlane.f32.xlu2 %v1042_v1 }
 0x918   :  { %v1259_v51 = vpop.xlane.xlu2 %1258 }
 0x919   :  { %v1267_v10 = vsub.f32 %v4778_v30, %v1259_v51  ;;  %v1305_v30 = vmul.f32 %v4828_v56, %v4677_v49 }
 0x91b   :  { %v3888_v47 = vpop.eup %3887  ;;  %v1272_v35 = vmul.f32 1.442695, %v1267_v10  ;;  %v1308_v22 = vpack.c.bf16 %v1306_v27, %v1305_v30 }
 0x91c   :  { %v1278_v8 = vsel %vm165_vm0, %v3888_v47, 0.0 }
 0x91d   :  { %3889 = vpow2.f32 %v1272_v35  ;;  %1279 = vadd.xlane.f32.xlu2 %v1278_v8 }
 0x91e   :  { %1194 = vrot.lane.b32.xlu1 %v1070_v21, %s4236_s3 }
 0x920   :  { %v4837_v26 = vpop.xlane.xlu2 %1264 }
 0x923   :  { %v3890_v7 = vpop.eup %3889 }
 0x924   :  { %3576 = vmatmul.msk.bf16.gmra.mxu1 %vm165_vm0, %v1351_v54  ;;  %v1281_v25 = vsel %vm165_vm0, %v3890_v7, 0.0 }
 0x925   :  { %1282 = vadd.xlane.f32.xlu2 %v1281_v25 }
 0x93d   :  { %1313 = vrot.lane.b32.xlu2 %v1308_v22, %s4236_s3 }
 0x94d   :  { %v4835_v52 = vpop.f32.mrf.mxu1  ;;  %v1193_v1 = vpop.permute.xlu0 %1192 }
 0x955   :  { %v4839_v33 = vpop.f32.mrf.mxu1 }
 0x978   :  { %v1038_v29 = vpop.xlane.xlu1 %1037 }
 0x980   :  { %v1041_v54 = vpop.xlane.xlu2 %1040 }
 0x981   :  { %v4841_v38 = vpop.f32.mrf.mxu1  ;;  %3891 = vrcp.f32 %v1041_v54 }
 0x982   :  { %3893 = vrcp.f32 %v1038_v29 }
 0x983   :  { %3895 = vpow2.f32 %v1034_v9 }
 0x987   :  { %v3892_v31 = vpop.eup %3891 }
 0x988   :  { %v4845_v48 = vpop.xlane.xlu2 %1043  ;;  %v3894_v39 = vpop.eup %3893  ;;  %v1053_v50 = vmul.f32 %v3892_v31, %v3884_v28 }
 0x989   :  { %v4847_v53 = vpop.f32.mrf.mxu1  ;;  %v1052_v51 = vmul.f32 %v3894_v39, %v4802_v63  ;;  %v3896_v11 = vpop.eup %3895 }
 0x98a   :  { %v1045_v8 = vsel %vm165_vm0, %v3896_v11, 0.0 }
 0x98b   :  { %v1056_v13 = vpack.c.bf16 %v1053_v50, %v1052_v51 }
 0x990   :  { %v1195_v60 = vpop.permute.xlu1 %1194  ;;  %v1280_v3 = vpop.xlane.xlu2 %1279 }
 0x991   :  { %1210 = vmatpush.bf16.msra.mxu2 %v1195_v60  ;;  %v1367_v37 = vpop.f32.mrf.mxu1  ;;  %3897 = vrcp.f32 %v1280_v3  ;;  %v1303_v3 = vmul.f32 %v4828_v56, %v4743_v32 }
 0x992   :  { %v1368_v0 = vadd.f32 %v4320_v20, %v1367_v37  ;;  %v1304_v37 = vmul.f32 %v4828_v56, %v4745_v40 }
 0x994   :  { %v1377_v4 = vsel %vm165_vm0, %v1368_v0, -inf  ;;  %v1307_v50 = vpack.c.bf16 %v1304_v37, %v1303_v3  ;;  %v1427_v3 = vmul.f32 %v4850_v24, %v4745_v40 }
 0x995   :  { %1378 = vmax.xlane.f32.xlu0 %v1377_v4  ;;  %1211 = vmatpush.bf16.msra.mxu2 %v1193_v1 }
 0x997   :  { %v3898_v63 = vpop.eup %3897 }
 0x998   :  { %3569 = vmatmul.msk.bf16.vlgmr.msra.gmra.mxu2 %vm165_vm0, %v1056_v13  ;;  %v1283_v10 = vpop.xlane.xlu2 %1282  ;;  %v4859_v30 = vmul.f32 %v3898_v63, %v3888_v47  ;;  %v1428_v47 = vmul.f32 %v4850_v24, %v4677_v49  ;;  %v1269_v49 = vsub.f32 %v4785_v15, %v4837_v26  ;;  %v1268_v15 = vsub.f32 %v4766_v6, %v4843_v5 }
 0x999   :  { %v1369_v35 = vpop.f32.mrf.mxu1  ;;  %3899 = vrcp.f32 %v1283_v10 }
 0x99a   :  { %v1370_v28 = vadd.f32 %v4320_v20, %v1369_v35  ;;  %v1276_v1 = vmul.f32 1.442695, %v1269_v49 }
 0x99c   :  { %v1380_v21 = vsel %vm165_vm0, %v1370_v28, -inf  ;;  %3901 = vpow2.f32 %v1276_v1 }
 0x99d   :  { %1046 = vadd.xlane.f32.xlu0 %v1045_v8  ;;  %1381 = vmax.xlane.f32.xlu2 %v1380_v21 }
 0x99f   :  { %v3900_v25 = vpop.eup %3899 }
 0x9a0   :  { %v4861_v27 = vmul.f32 %v3900_v25, %v3890_v7  ;;  %v1314_v22 = vpop.permute.xlu2 %1313  ;;  %v1429_v7 = vmul.f32 %v4850_v24, %v4679_v45 }
 0x9a1   :  { %v1372_v12 = vpop.f32.mrf.mxu1  ;;  %1329 = vmatpush.bf16.msra.mxu3 %v1314_v22 }
 0x9a2   :  { %v4864_v54 = vadd.f32 %v1372_v12, %v4374_v2  ;;  %v1298_v29 = vpack.c.bf16 %v4861_v27, %v4859_v30  ;;  %v1431_v39 = vpack.c.bf16 %v1429_v7, %v1428_v47  ;;  %v4884_v45 = vpop.eup %3901 }
 0x9a3   :  { %v1287_v51 = vsel %vm165_vm0, %v4884_v45, 0.0 }
 0x9a4   :  { %v1383_v16 = vsel %vm165_vm0, %v4864_v54, -inf }
 0x9a5   :  { %1384 = vmax.xlane.f32.xlu2 %v1383_v16 }
 0x9a9   :  { %v1374_v31 = vpop.f32.mrf.mxu1 }
 0x9aa   :  { %v1375_v9 = vadd.f32 %v1374_v31, %v4374_v2 }
 0x9ac   :  { %v1386_v60 = vsel %vm165_vm0, %v1375_v9, -inf }
 0x9ad   :  { %1387 = vmax.xlane.f32.xlu2 %v1386_v60 }
 0x9b1   :  { %1436 = vrot.lane.b32.xlu0 %v1431_v39, %s4236_s3 }
 0x9c5   :  { %1311 = vrot.lane.b32.xlu2 %v1307_v50, %s4236_s3 }
 0x9db   :  { %1288 = vadd.xlane.f32.xlu0 %v1287_v51 }
 0xa08   :  { %v1379_v4 = vpop.xlane.xlu0 %1378 }
 0xa09   :  { %v1389_v13 = vsub.f32 %v1368_v0, %v1379_v4  ;;  %v1274_v0 = vmul.f32 1.442695, %v1268_v15 }
 0xa0b   :  { %v1393_v10 = vmul.f32 1.442695, %v1389_v13 }
 0xa0d   :  { %3903 = vpow2.f32 %v1393_v10 }
 0xa0e   :  { %3905 = vrcp.f32 %v4845_v48 }
 0xa10   :  { %v1047_v35 = vpop.xlane.xlu0 %1046  ;;  %v1382_v8 = vpop.xlane.xlu2 %1381 }
 0xa11   :  { %3907 = vrcp.f32 %v1047_v35  ;;  %v1390_v21 = vsub.f32 %v1370_v28, %v1382_v8 }
 0xa13   :  { %v3904_v63 = vpop.eup %3903  ;;  %v1395_v26 = vmul.f32 1.442695, %v1390_v21 }
 0xa14   :  { %v1401_v25 = vsel %vm165_vm0, %v3904_v63, 0.0  ;;  %v3906_v30 = vpop.eup %3905 }
 0xa15   :  { %3909 = vpow2.f32 %v1395_v26  ;;  %1402 = vadd.xlane.f32.xlu1 %v1401_v25  ;;  %v1054_v12 = vmul.f32 %v3906_v30, %v4808_v42 }
 0xa16   :  { %3911 = vpow2.f32 %v1274_v0 }
 0xa17   :  { %v3908_v27 = vpop.eup %3907 }
 0xa18   :  { %v1385_v22 = vpop.xlane.xlu2 %1384  ;;  %v1055_v48 = vmul.f32 %v3908_v27, %v3896_v11  ;;  %v1426_v11 = vmul.f32 %v4850_v24, %v4743_v32 }
 0xa19   :  { %v1391_v49 = vsub.f32 %v4864_v54, %v1385_v22 }
 0xa1a   :  { %v1057_v16 = vpack.c.bf16 %v1055_v48, %v1054_v12  ;;  %v1430_v50 = vpack.c.bf16 %v1427_v3, %v1426_v11 }
 0xa1b   :  { %v3910_v31 = vpop.eup %3909  ;;  %v1397_v1 = vmul.f32 1.442695, %v1391_v49 }
 0xa1c   :  { %3570 = vmatmul.msk.bf16.gmra.mxu2 %vm165_vm0, %v1057_v16  ;;  %v1404_v28 = vsel %vm165_vm0, %v3910_v31, 0.0  ;;  %v3912_v5 = vpop.eup %3911 }
 0xa1d   :  { %1405 = vadd.xlane.f32.xlu2 %v1404_v28  ;;  %v1284_v39 = vsel %vm165_vm0, %v3912_v5, 0.0 }
 0xa20   :  { %v1388_v6 = vpop.xlane.xlu2 %1387 }
 0xa21   :  { %v1392_v47 = vsub.f32 %v1375_v9, %v1388_v6  ;;  %v1213_v6 = vpop.f32.mrf.mxu2 }
 0xa22   :  { %v1214_v3 = vadd.f32 %v1213_v6, %v4835_v52 }
 0xa23   :  { %v1399_v7 = vmul.f32 1.442695, %v1392_v47  ;;  %v1437_v60 = vpop.permute.xlu0 %1436  ;;  %v3739_v47 = vld [vmem:[#allocation8 + $0x70] sm:$0xff] }
 0xa24   :  { %1452 = vmatpush.bf16.msrb.mxu2 %v1437_v60 }
 0xa25   :  { %3913 = vpow2.f32 %v1399_v7  ;;  %1285 = vadd.xlane.f32.xlu2 %v1284_v39 }
 0xa26   :  { %3915 = vpow2.f32 %v1397_v1 }
 0xa28   :  { %v1312_v42 = vpop.permute.xlu2 %1311 }
 0xa29   :  { %1330 = vmatpush.bf16.msra.mxu3 %v1312_v42 }
 0xa2b   :  { %v3914_v37 = vpop.eup %3913 }
 0xa2c   :  { %3573 = vmatmul.msk.bf16.vlgmr.msra.gmra.mxu3 %vm165_vm0, %v1298_v29  ;;  %v1410_v9 = vsel %vm165_vm0, %v3914_v37, 0.0  ;;  %v3916_v51 = vpop.eup %3915 }
 0xa2d   :  { %1411 = vadd.xlane.f32.xlu2 %v1410_v9  ;;  %v1407_v32 = vsel %vm165_vm0, %v3916_v51, 0.0 }
 0xa2e   :  { %1434 = vrot.lane.b32.xlu1 %v1430_v50, %s4236_s3 }
 0xa4e   :  { %v1289_v40 = vpop.xlane.xlu0 %1288 }
 0xa58   :  { %1408 = vadd.xlane.f32.xlu1 %v1407_v32 }
 0xa88   :  { %v1403_v13 = vpop.xlane.xlu1 %1402 }
 0xa90   :  { %v1406_v4 = vpop.xlane.xlu2 %1405 }
 0xa91   :  { %3917 = vrcp.f32 %v1406_v4 }
 0xa92   :  { %3919 = vrcp.f32 %v1289_v40 }
 0xa93   :  { %3921 = vrcp.f32 %v1403_v13 }
 0xa97   :  { %v3918_v10 = vpop.eup %3917 }
 0xa98   :  { %v1286_v29 = vpop.xlane.xlu2 %1285  ;;  %v3920_v35 = vpop.eup %3919  ;;  %v1418_v21 = vmul.f32 %v3918_v10, %v3910_v31 }
 0xa99   :  { %3923 = vrcp.f32 %v1286_v29  ;;  %v3922_v8 = vpop.eup %3921  ;;  %v1297_v30 = vmul.f32 %v3920_v35, %v4884_v45  ;;  %v3740_v45 = vld [vmem:[#allocation8 + $0x78] sm:$0xff] }
 0xa9a   :  { %v1417_v54 = vmul.f32 %v3922_v8, %v3904_v63  ;;  %1497 = vmatpush.bf16.msrb.mxu0 %v3740_v45 }
 0xa9c   :  { %v1421_v27 = vpack.c.bf16 %v1418_v21, %v1417_v54  ;;  %v960_v54 = vld [vmem:[#allocation8 + $0x80] sm:$0x1] }
 0xa9e   :  { %1498 = vmatpush.bf16.msrb.mxu0 %v3739_v47 }
 0xa9f   :  { %v3924_v15 = vpop.eup %3923 }
 0xaa0   :  { %v1435_v26 = vpop.permute.xlu1 %1434  ;;  %v1296_v25 = vmul.f32 %v3924_v15, %v3912_v5  ;;  %v1412_v22 = vpop.xlane.xlu2 %1411 }
 0xaa1   :  { %1453 = vmatpush.bf16.msrb.mxu2 %v1435_v26  ;;  %3925 = vrcp.f32 %v1412_v22  ;;  %v1215_v5 = vpop.f32.mrf.mxu2  ;;  %v1471_v26 = vunpack.c.l.bf16 %v960_v54 }
 0xaa2   :  { %v1299_v0 = vpack.c.bf16 %v1297_v30, %v1296_v25  ;;  %v1216_v9 = vadd.f32 %v1215_v5, %v4839_v33 }
 0xaa3   :  { %v1472_v25 = vperm.slane %v1471_v26, 0 }
 0xaa4   :  { %3574 = vmatmul.msk.bf16.gmra.mxu3 %vm165_vm0, %v1299_v0  ;;  %3577 = vmatmul.msk.bf16.vlgmr.msrb.gmra.mxu2 %vm165_vm0, %v1421_v27 }
 0xaa7   :  { %v3926_v48 = vpop.eup %3925 }
 0xaa8   :  { %v1420_v28 = vmul.f32 %v3926_v48, %v3914_v37 }
 0xaa9   :  { %v1218_v7 = vpop.f32.mrf.mxu2 }
 0xaaa   :  { %v1219_v29 = vadd.f32 %v1218_v7, %v4841_v38 }
 0xaaf   :  { %v1332_v39 = vpop.f32.mrf.mxu3 }
 0xab0   :  { %v1342_v50 = vadd.f32 %v1332_v39, %v1214_v3 }
 0xab1   :  { %v1220_v60 = vpop.f32.mrf.mxu2 }
 0xab2   :  { %v1221_v10 = vadd.f32 %v1220_v60, %v4847_v53 }
 0xab7   :  { %v1334_v11 = vpop.f32.mrf.mxu3 }
 0xab8   :  { %v1343_v37 = vadd.f32 %v1334_v11, %v1216_v9 }
 0xacb   :  { %v1409_v12 = vpop.xlane.xlu1 %1408 }
 0xacc   :  { %3927 = vrcp.f32 %v1409_v12 }
 0xad2   :  { %v3928_v16 = vpop.eup %3927 }
 0xad3   :  { %v1419_v31 = vmul.f32 %v3928_v16, %v3916_v51 }
 0xad5   :  { %v1422_v63 = vpack.c.bf16 %v1420_v28, %v1419_v31 }
 0xad7   :  { %3578 = vmatmul.msk.bf16.gmra.mxu2 %vm165_vm0, %v1422_v63 }
 0xb27   :  { %v1455_v42 = vpop.f32.mrf.mxu2  ;;  %v1337_v4 = vpop.f32.mrf.mxu3 }
 0xb28   :  { %v1465_v1 = vadd.f32 %v1455_v42, %v1342_v50  ;;  %v1344_v35 = vadd.f32 %v1337_v4, %v1219_v29 }
 0xb2f   :  { %v1457_v49 = vpop.f32.mrf.mxu2  ;;  %v1339_v13 = vpop.f32.mrf.mxu3 }
 0xb30   :  { %v1466_v51 = vadd.f32 %v1457_v49, %v1343_v37  ;;  %v1345_v8 = vadd.f32 %v1339_v13, %v1221_v10  ;;  %v3742_v10 = vld [vmem:[#allocation8 + $0xa0] sm:$0xff] }
 0xb31   :  { %1649 = vmatpush.bf16.msrb.mxu3 %v3742_v10 }
 0xb32   :  { %v1469_v32 = vpack.c.bf16 %v1466_v51, %v1465_v1 }
 0xb34   :  { %3587 = vmatmul.msk.bf16.vlgmr.msrb.gmra.mxu0 %vm165_vm0, %v1469_v32 }
 0xb5a   :  { %v1460_v40 = vpop.f32.mrf.mxu2 }
 0xb5b   :  { %v1467_v21 = vadd.f32 %v1460_v40, %v1344_v35 }
 0xb62   :  { %v1462_v52 = vpop.f32.mrf.mxu2 }
 0xb63   :  { %v1468_v33 = vadd.f32 %v1462_v52, %v1345_v8  ;;  %v3741_v52 = vld [vmem:[#allocation8 + $0x98] sm:$0xff] }
 0xb64   :  { %1650 = vmatpush.bf16.msrb.mxu3 %v3741_v52 }
 0xb65   :  { %v1470_v15 = vpack.c.bf16 %v1468_v33, %v1467_v21 }
 0xb67   :  { %3588 = vmatmul.msk.bf16.gmra.mxu0 %vm165_vm0, %v1470_v15 }
 0xbb1   :  { %v1500_v30 = vpop.f32.mrf.mxu0 }
 0xbb2   :  { %v1501_v27 = vadd.f32 %v1500_v30, %v1472_v25 }
 0xbb4   :  { %v1510_v0 = vadd.f32 %v1501_v27, %v4642_v46 }
 0xbb6   :  { %v1516_v22 = vsel %vm165_vm0, %v1510_v0, 0.0 }
 0xbb7   :  { %1517 = vadd.xlane.f32.xlu0 %v1516_v22  ;;  %v1514_v22 = vld [vmem:[#allocation8 + $0x88] sm:$0x1] }
 0xbb9   :  { %v1502_v38 = vpop.f32.mrf.mxu0 }
 0xbba   :  { %v1503_v53 = vadd.f32 %v1502_v38, %v1472_v25 }
 0xbbc   :  { %v1511_v12 = vadd.f32 %v1503_v53, %v4644_v44 }
 0xbbe   :  { %v1519_v48 = vsel %vm165_vm0, %v1511_v12, 0.0 }
 0xbbf   :  { %1520 = vadd.xlane.f32.xlu2 %v1519_v48  ;;  %v1604_v48 = vunpack.c.l.bf16 %v1514_v22 }
 0xbe4   :  { %v1505_v16 = vpop.f32.mrf.mxu0 }
 0xbe5   :  { %v1506_v31 = vadd.f32 %v1505_v16, %v1472_v25  ;;  %v1515_v16 = vld [vmem:[#allocation8 + $0x90] sm:$0x1] }
 0xbe7   :  { %v1512_v28 = vadd.f32 %v1506_v31, %v4653_v55 }
 0xbe9   :  { %v1522_v63 = vsel %vm165_vm0, %v1512_v28, 0.0 }
 0xbea   :  { %1523 = vadd.xlane.f32.xlu0 %v1522_v63 }
 0xbec   :  { %v1507_v6 = vpop.f32.mrf.mxu0 }
 0xbed   :  { %v1508_v45 = vadd.f32 %v1507_v6, %v1472_v25  ;;  %v1605_v6 = vperm.slane %v1604_v48, 0  ;;  %v3745_v48 = vld [vmem:[#allocation8 + $0xc0] sm:$0xff] }
 0xbef   :  { %v1513_v46 = vadd.f32 %v1508_v45, %v4655_v62  ;;  %v1610_v45 = vunpack.c.l.bf16 %v1515_v16  ;;  %v3744_v16 = vld [vmem:[#allocation8 + $0xb8] sm:$0xff] }
 0xbf1   :  { %v1525_v5 = vsel %vm165_vm0, %v1513_v46, 0.0 }
 0xbf2   :  { %1526 = vadd.xlane.f32.xlu2 %v1525_v5 }
 0xc2a   :  { %v1518_v47 = vpop.xlane.xlu0 %1517 }
 0xc2b   :  { %v1528_v44 = vmul.f32 %v1518_v47, %v4602_v36 }
 0xc2d   :  { %v1532_v7 = vsub.f32 %v1510_v0, %v1528_v44  ;;  %v1611_v44 = vperm.slane %v1610_v45, 0 }
 0xc2f   :  { %v1536_v60 = vmul.f32 %v1532_v7, %v1532_v7 }
 0xc31   :  { %v1540_v39 = vsel %vm165_vm0, %v1536_v60, 0.0 }
 0xc32   :  { %1541 = vadd.xlane.f32.xlu0 %v1540_v39  ;;  %v1521_v42 = vpop.xlane.xlu2 %1520 }
 0xc33   :  { %v1529_v55 = vmul.f32 %v1521_v42, %v4602_v36 }
 0xc35   :  { %v1533_v11 = vsub.f32 %v1511_v12, %v1529_v55 }
 0xc37   :  { %v1537_v3 = vmul.f32 %v1533_v11, %v1533_v11 }
 0xc39   :  { %v1543_v9 = vsel %vm165_vm0, %v1537_v3, 0.0 }
 0xc3a   :  { %1544 = vadd.xlane.f32.xlu1 %v1543_v9 }
 0xc5d   :  { %v1524_v62 = vpop.xlane.xlu0 %1523 }
 0xc5e   :  { %v1530_v50 = vmul.f32 %v1524_v62, %v4602_v36 }
 0xc60   :  { %v4928_v37 = vsub.f32 %v1512_v28, %v1530_v50 }
 0xc62   :  { %v1538_v49 = vmul.f32 %v4928_v37, %v4928_v37 }
 0xc64   :  { %v1546_v1 = vsel %vm165_vm0, %v1538_v49, 0.0 }
 0xc65   :  { %1547 = vadd.xlane.f32.xlu2 %v1546_v1  ;;  %v1527_v51 = vpop.xlane.xlu2 %1526 }
 0xc66   :  { %v1531_v32 = vmul.f32 %v1527_v51, %v4602_v36 }
 0xc68   :  { %v4934_v4 = vsub.f32 %v1513_v46, %v1531_v32 }
 0xc6a   :  { %v1539_v40 = vmul.f32 %v4934_v4, %v4934_v4 }
 0xc6c   :  { %v1549_v13 = vsel %vm165_vm0, %v1539_v40, 0.0 }
 0xc6d   :  { %1550 = vadd.xlane.f32.xlu0 %v1549_v13 }
 0xca5   :  { %v1542_v29 = vpop.xlane.xlu0 %1541 }
 0xca6   :  { %v1552_v35 = vmul.f32 %v1542_v29, %v4602_v36 }
 0xca8   :  { %v1556_v8 = vadd.f32 1e-05, %v1552_v35 }
 0xcaa   :  { %3929 = vrsqrt.f32 %v1556_v8  ;;  %vm1566_vm10 = vweird.f32 %v1556_v8 }
 0xcad   :  { %v1545_v21 = vpop.xlane.xlu1 %1544 }
 0xcae   :  { %v1553_v33 = vmul.f32 %v1545_v21, %v4602_v36 }
 0xcb0   :  { %v3930_v15 = vpop.eup %3929  ;;  %v1557_v54 = vadd.f32 1e-05, %v1553_v33 }
 0xcb1   :  { %v1561_v26 = vmul.f32 %v3930_v15, %v1556_v8  ;;  %vm1567_vm9 = vweird.f32 %v3930_v15 }
 0xcb2   :  { %3931 = vrsqrt.f32 %v1557_v54  ;;  %vm1568_vm11 = vmor %vm1566_vm10, %vm1567_vm9  ;;  %vm1576_vm13 = vweird.f32 %v1557_v54 }
 0xcb3   :  { %v1562_v25 = vmul.f32 %v3930_v15, %v1561_v26 }
 0xcb5   :  { %v1563_v30 = vmul.f32 0.5, %v1562_v25 }
 0xcb7   :  { %v1564_v27 = vsub.f32 1.5, %v1563_v30 }
 0xcb8   :  { %v3932_v0 = vpop.eup %3931 }
 0xcb9   :  { %v1565_v38 = vmul.f32 %v3930_v15, %v1564_v27  ;;  %v1571_v53 = vmul.f32 %v3932_v0, %v1557_v54  ;;  %vm1577_vm12 = vweird.f32 %v3932_v0 }
 0xcba   :  { %vm1578_vm14 = vmor %vm1576_vm13, %vm1577_vm12 }
 0xcbb   :  { %v1572_v12 = vmul.f32 %v3932_v0, %v1571_v53  ;;  %v1569_v31 = vsel %vm1568_vm11, %v3930_v15, %v1565_v38 }
 0xcbc   :  { %v1600_v46 = vmul.f32 %v1569_v31, %v1532_v7  ;;  %v1622_v31 = vld [vmem:[#allocation8 + $0xa8] sm:$0x1] }
 0xcbd   :  { %v1573_v28 = vmul.f32 0.5, %v1572_v12  ;;  %v3746_v12 = vld [vmem:[#allocation8 + $0xc8] sm:$0xff] }
 0xcbe   :  { %v1606_v60 = vmul.f32 %v1605_v6, %v1600_v46  ;;  %1714 = vmatpush.bf16.msra.mxu1 %v3746_v12 }
 0xcbf   :  { %v1574_v63 = vsub.f32 1.5, %v1573_v28  ;;  %v1623_v28 = vunpack.c.l.bf16 %v1622_v31 }
 0xcc0   :  { %v4941_v55 = vadd.f32 %v1611_v44, %v1606_v60 }
 0xcc1   :  { %v1575_v5 = vmul.f32 %v3932_v0, %v1574_v63  ;;  %v1624_v45 = vperm.slane %v1623_v28, 0 }
 0xcc2   :  { %1715 = vmatpush.bf16.msra.mxu1 %v3745_v48 }
 0xcc3   :  { %v1579_v47 = vsel %vm1578_vm14, %v3932_v0, %v1575_v5 }
 0xcc4   :  { %v1601_v39 = vmul.f32 %v1579_v47, %v1533_v11 }
 0xcc6   :  { %v1607_v42 = vmul.f32 %v1605_v6, %v1601_v39  ;;  %1716 = vmatpush.bf16.msra.mxu1 %v3744_v16 }
 0xcc8   :  { %v4943_v3 = vadd.f32 %v1611_v44, %v1607_v42 }
 0xcca   :  { %v1620_v9 = vpack.c.bf16 %v4943_v3, %v4941_v55 }
 0xccc   :  { %3597 = vmatmul.msk.bf16.vlgmr.msrb.gmra.mxu3 %vm165_vm0, %v1620_v9 }
 0xcd8   :  { %v1548_v62 = vpop.xlane.xlu2 %1547 }
 0xcd9   :  { %v1554_v7 = vmul.f32 %v1548_v62, %v4602_v36 }
 0xcdb   :  { %v1558_v50 = vadd.f32 1e-05, %v1554_v7 }
 0xcdd   :  { %3933 = vrsqrt.f32 %v1558_v50  ;;  %vm1586_vm1 = vweird.f32 %v1558_v50 }
 0xce0   :  { %v1551_v49 = vpop.xlane.xlu0 %1550 }
 0xce1   :  { %v1555_v1 = vmul.f32 %v1551_v49, %v4602_v36  ;;  %v1676_v49 = vld [vmem:[#allocation8 + $0xd0] sm:$0x1] }
 0xce3   :  { %v3934_v51 = vpop.eup %3933  ;;  %v1559_v11 = vadd.f32 1e-05, %v1555_v1  ;;  %v1677_v1 = vunpack.c.l.bf16 %v1676_v49 }
 0xce4   :  { %v1581_v32 = vmul.f32 %v3934_v51, %v1558_v50  ;;  %vm1587_vm15 = vweird.f32 %v3934_v51 }
 0xce5   :  { %3935 = vrsqrt.f32 %v1559_v11  ;;  %vm1588_vm2 = vmor %vm1586_vm1, %vm1587_vm15  ;;  %vm1596_vm4 = vweird.f32 %v1559_v11 }
 0xce6   :  { %v1582_v40 = vmul.f32 %v3934_v51, %v1581_v32 }
 0xce8   :  { %v1583_v13 = vmul.f32 0.5, %v1582_v40 }
 0xcea   :  { %v1584_v29 = vsub.f32 1.5, %v1583_v13 }
 0xceb   :  { %v3936_v10 = vpop.eup %3935 }
 0xcec   :  { %v1585_v35 = vmul.f32 %v3934_v51, %v1584_v29  ;;  %v1591_v8 = vmul.f32 %v3936_v10, %v1559_v11  ;;  %vm1597_vm3 = vweird.f32 %v3936_v10 }
 0xced   :  { %vm1598_vm5 = vmor %vm1596_vm4, %vm1597_vm3 }
 0xcee   :  { %v1592_v52 = vmul.f32 %v3936_v10, %v1591_v8  ;;  %v1589_v21 = vsel %vm1588_vm2, %v3934_v51, %v1585_v35  ;;  %v1678_v51 = vperm.slane %v1677_v1, 0 }
 0xcef   :  { %v1602_v54 = vmul.f32 %v1589_v21, %v4928_v37  ;;  %v3743_v37 = vld [vmem:[#allocation8 + $0xb0] sm:$0xff] }
 0xcf0   :  { %v1593_v33 = vmul.f32 0.5, %v1592_v52  ;;  %1717 = vmatpush.bf16.msra.mxu1 %v3743_v37 }
 0xcf1   :  { %v1608_v27 = vmul.f32 %v1605_v6, %v1602_v54 }
 0xcf2   :  { %v1594_v15 = vsub.f32 1.5, %v1593_v33 }
 0xcf3   :  { %v1614_v22 = vadd.f32 %v1611_v44, %v1608_v27 }
 0xcf4   :  { %v1595_v26 = vmul.f32 %v3936_v10, %v1594_v15 }
 0xcf6   :  { %v1599_v25 = vsel %vm1598_vm5, %v3936_v10, %v1595_v26 }
 0xcf7   :  { %v1603_v30 = vmul.f32 %v1599_v25, %v4934_v4 }
 0xcf9   :  { %v1609_v0 = vmul.f32 %v1605_v6, %v1603_v30 }
 0xcfb   :  { %v1615_v38 = vadd.f32 %v1611_v44, %v1609_v0 }
 0xcfd   :  { %v1621_v53 = vpack.c.bf16 %v1615_v38, %v1614_v22 }
 0xcff   :  { %3598 = vmatmul.msk.bf16.gmra.mxu3 %vm165_vm0, %v1621_v53 }
 0xd4f   :  { %v1652_v63 = vpop.f32.mrf.mxu3 }
 0xd50   :  { %v1653_v4 = vadd.f32 %v1652_v63, %v1624_v45 }
 0xd52   :  { %v1662_v5 = vmax.f32 %v1653_v4, 0.0 }
 0xd57   :  { %v1654_v46 = vpop.f32.mrf.mxu3 }
 0xd58   :  { %v1655_v6 = vadd.f32 %v1654_v46, %v1624_v45 }
 0xd5a   :  { %v1663_v47 = vmax.f32 %v1655_v6, 0.0 }
 0xd5c   :  { %v1674_v44 = vpack.c.bf16 %v1663_v47, %v1662_v5 }
 0xd5e   :  { %3615 = vmatmul.msk.bf16.vlgmr.msra.gmra.mxu1 %vm1703_vm6, %v1674_v44 }
 0xd82   :  { %v1657_v60 = vpop.f32.mrf.mxu3 }
 0xd83   :  { %v1658_v39 = vadd.f32 %v1657_v60, %v1624_v45  ;;  %v3748_v60 = vld [vmem:[#allocation8 + $0xf0] sm:$0xff] }
 0xd84   :  { %1869 = vmatpush.bf16.msra.mxu2 %v3748_v60 }
 0xd85   :  { %v1664_v62 = vmax.f32 %v1658_v39, 0.0 }
 0xd8a   :  { %v1659_v42 = vpop.f32.mrf.mxu3 }
 0xd8b   :  { %v1660_v9 = vadd.f32 %v1659_v42, %v1624_v45 }
 0xd8d   :  { %v1665_v7 = vmax.f32 %v1660_v9, 0.0  ;;  %v3747_v9 = vld [vmem:[#allocation8 + $0xe8] sm:$0xff] }
 0xd8e   :  { %1870 = vmatpush.bf16.msra.mxu2 %v3747_v9 }
 0xd8f   :  { %v1675_v50 = vpack.c.bf16 %v1665_v7, %v1664_v62 }
 0xd91   :  { %3616 = vmatmul.msk.bf16.gmra.mxu1 %vm1703_vm6, %v1675_v50 }
 0xddb   :  { %v1719_v11 = vpop.f32.mrf.mxu1 }
 0xddc   :  { %v1720_v32 = vadd.f32 %v1719_v11, %v1678_v51 }
 0xdde   :  { %v1729_v40 = vadd.f32 %v1720_v32, %v4941_v55 }
 0xde0   :  { %v1735_v13 = vsel %vm165_vm0, %v1729_v40, 0.0 }
 0xde1   :  { %1736 = vadd.xlane.f32.xlu1 %v1735_v13  ;;  %v1733_v13 = vld [vmem:[#allocation8 + $0xd8] sm:$0x1] }
 0xde3   :  { %v1721_v29 = vpop.f32.mrf.mxu1 }
 0xde4   :  { %v1722_v10 = vadd.f32 %v1721_v29, %v1678_v51 }
 0xde6   :  { %v1730_v35 = vadd.f32 %v1722_v10, %v4943_v3 }
 0xde8   :  { %v1738_v8 = vsel %vm165_vm0, %v1730_v35, 0.0 }
 0xde9   :  { %1739 = vadd.xlane.f32.xlu2 %v1738_v8  ;;  %v1823_v8 = vunpack.c.l.bf16 %v1733_v13 }
 0xe0e   :  { %v1724_v52 = vpop.f32.mrf.mxu1 }
 0xe0f   :  { %v1725_v21 = vadd.f32 %v1724_v52, %v1678_v51  ;;  %v1734_v52 = vld [vmem:[#allocation8 + $0xe0] sm:$0x1] }
 0xe11   :  { %v1731_v33 = vadd.f32 %v1725_v21, %v1614_v22 }
 0xe13   :  { %v1741_v15 = vsel %vm165_vm0, %v1731_v33, 0.0 }
 0xe14   :  { %1742 = vadd.xlane.f32.xlu0 %v1741_v15 }
 0xe16   :  { %v1726_v54 = vpop.f32.mrf.mxu1 }
 0xe17   :  { %v1727_v26 = vadd.f32 %v1726_v54, %v1678_v51  ;;  %v1824_v54 = vperm.slane %v1823_v8, 0 }
 0xe19   :  { %v1732_v25 = vadd.f32 %v1727_v26, %v1615_v38  ;;  %v1829_v26 = vunpack.c.l.bf16 %v1734_v52 }
 0xe1b   :  { %v1744_v55 = vsel %vm165_vm0, %v1732_v25, 0.0 }
 0xe1c   :  { %1745 = vadd.xlane.f32.xlu1 %v1744_v55 }
 0xe54   :  { %v1737_v30 = vpop.xlane.xlu1 %1736 }
 0xe55   :  { %v1747_v27 = vmul.f32 %v1737_v30, %v4602_v36 }
 0xe57   :  { %v1751_v0 = vsub.f32 %v1729_v40, %v1747_v27  ;;  %v1830_v27 = vperm.slane %v1829_v26, 0 }
 0xe59   :  { %v1755_v3 = vmul.f32 %v1751_v0, %v1751_v0 }
 0xe5b   :  { %v1759_v53 = vsel %vm165_vm0, %v1755_v3, 0.0 }
 0xe5c   :  { %1760 = vadd.xlane.f32.xlu2 %v1759_v53  ;;  %v1740_v12 = vpop.xlane.xlu2 %1739 }
 0xe5d   :  { %v1748_v22 = vmul.f32 %v1740_v12, %v4602_v36 }
 0xe5f   :  { %v1752_v48 = vsub.f32 %v1730_v35, %v1748_v22 }
 0xe61   :  { %v1756_v16 = vmul.f32 %v1752_v48, %v1752_v48 }
 0xe63   :  { %v1762_v37 = vsel %vm165_vm0, %v1756_v16, 0.0 }
 0xe64   :  { %1763 = vadd.xlane.f32.xlu0 %v1762_v37 }
 0xe87   :  { %v1743_v38 = vpop.xlane.xlu0 %1742 }
 0xe88   :  { %v1749_v31 = vmul.f32 %v1743_v38, %v4602_v36 }
 0xe8a   :  { %v4966_v28 = vsub.f32 %v1731_v33, %v1749_v31 }
 0xe8c   :  { %v1757_v63 = vmul.f32 %v4966_v28, %v4966_v28 }
 0xe8e   :  { %v1765_v45 = vsel %vm165_vm0, %v1757_v63, 0.0 }
 0xe8f   :  { %v1746_v4 = vpop.xlane.xlu1 %1745  ;;  %1766 = vadd.xlane.f32.xlu1 %v1765_v45 }
 0xe90   :  { %v1750_v46 = vmul.f32 %v1746_v4, %v4602_v36 }
 0xe92   :  { %v4972_v6 = vsub.f32 %v1732_v25, %v1750_v46 }
 0xe94   :  { %v1758_v5 = vmul.f32 %v4972_v6, %v4972_v6 }
 0xe96   :  { %v1768_v47 = vsel %vm165_vm0, %v1758_v5, 0.0 }
 0xe97   :  { %1769 = vadd.xlane.f32.xlu2 %v1768_v47 }
 0xecf   :  { %v1761_v44 = vpop.xlane.xlu2 %1760 }
 0xed0   :  { %v1771_v39 = vmul.f32 %v1761_v44, %v4602_v36 }
 0xed2   :  { %v1775_v42 = vadd.f32 1e-05, %v1771_v39 }
 0xed4   :  { %3937 = vrsqrt.f32 %v1775_v42  ;;  %vm1785_vm8 = vweird.f32 %v1775_v42 }
 0xed7   :  { %v1764_v62 = vpop.xlane.xlu0 %1763 }
 0xed8   :  { %v1772_v7 = vmul.f32 %v1764_v62, %v4602_v36 }
 0xeda   :  { %v3938_v50 = vpop.eup %3937  ;;  %v1776_v49 = vadd.f32 1e-05, %v1772_v7 }
 0xedb   :  { %v1780_v1 = vmul.f32 %v3938_v50, %v1775_v42  ;;  %vm1786_vm7 = vweird.f32 %v3938_v50 }
 0xedc   :  { %3939 = vrsqrt.f32 %v1776_v49  ;;  %vm1787_vm9 = vmor %vm1785_vm8, %vm1786_vm7  ;;  %vm1795_vm11 = vweird.f32 %v1776_v49 }
 0xedd   :  { %v1781_v51 = vmul.f32 %v3938_v50, %v1780_v1 }
 0xedf   :  { %v1782_v11 = vmul.f32 0.5, %v1781_v51 }
 0xee1   :  { %v1783_v32 = vsub.f32 1.5, %v1782_v11 }
 0xee2   :  { %v3940_v40 = vpop.eup %3939 }
 0xee3   :  { %v1784_v29 = vmul.f32 %v3938_v50, %v1783_v32  ;;  %v1790_v10 = vmul.f32 %v3940_v40, %v1776_v49  ;;  %vm1796_vm10 = vweird.f32 %v3940_v40 }
 0xee4   :  { %vm1797_vm12 = vmor %vm1795_vm11, %vm1796_vm10 }
 0xee5   :  { %v1791_v35 = vmul.f32 %v3940_v40, %v1790_v10  ;;  %v1788_v21 = vsel %vm1787_vm9, %v3938_v50, %v1784_v29 }
 0xee6   :  { %v1819_v25 = vmul.f32 %v1788_v21, %v1751_v0 }
 0xee7   :  { %v1792_v33 = vmul.f32 0.5, %v1791_v35  ;;  %v1842_v35 = vld [vmem:[#allocation8 + $0xf8] sm:$0x1] }
 0xee8   :  { %v1825_v3 = vmul.f32 %v1824_v54, %v1819_v25  ;;  %v1843_v8 = vunpack.c.l.bf16 %v1842_v35 }
 0xee9   :  { %v1793_v15 = vsub.f32 1.5, %v1792_v33 }
 0xeea   :  { %v4979_v22 = vadd.f32 %v1830_v27, %v1825_v3 }
 0xeeb   :  { %v1794_v55 = vmul.f32 %v3940_v40, %v1793_v15 }
 0xeed   :  { %v1798_v30 = vsel %vm1797_vm12, %v3940_v40, %v1794_v55 }
 0xeee   :  { %v1820_v53 = vmul.f32 %v1798_v30, %v1752_v48 }
 0xef0   :  { %v1826_v12 = vmul.f32 %v1824_v54, %v1820_v53 }
 0xef2   :  { %v4981_v16 = vadd.f32 %v1830_v27, %v1826_v12 }
 0xef4   :  { %v1840_v37 = vpack.c.bf16 %v4981_v16, %v4979_v22 }
 0xef6   :  { %3625 = vmatmul.msk.bf16.vlgmr.msra.gmra.mxu2 %vm165_vm0, %v1840_v37 }
 0xf02   :  { %v1767_v38 = vpop.xlane.xlu1 %1766 }
 0xf03   :  { %v1773_v0 = vmul.f32 %v1767_v38, %v4602_v36 }
 0xf05   :  { %v1777_v31 = vadd.f32 1e-05, %v1773_v0 }
 0xf07   :  { %3941 = vrsqrt.f32 %v1777_v31  ;;  %vm1805_vm14 = vweird.f32 %v1777_v31 }
 0xf0a   :  { %v1770_v63 = vpop.xlane.xlu2 %1769 }
 0xf0b   :  { %v1774_v45 = vmul.f32 %v1770_v63, %v4602_v36 }
 0xf0d   :  { %v3942_v4 = vpop.eup %3941  ;;  %v1778_v48 = vadd.f32 1e-05, %v1774_v45 }
 0xf0e   :  { %v1800_v46 = vmul.f32 %v3942_v4, %v1777_v31  ;;  %vm1806_vm13 = vweird.f32 %v3942_v4 }
 0xf0f   :  { %3943 = vrsqrt.f32 %v1778_v48  ;;  %vm1807_vm15 = vmor %vm1805_vm14, %vm1806_vm13  ;;  %vm1815_vm2 = vweird.f32 %v1778_v48 }
 0xf10   :  { %v1801_v5 = vmul.f32 %v3942_v4, %v1800_v46 }
 0xf12   :  { %v1802_v47 = vmul.f32 0.5, %v1801_v5 }
 0xf14   :  { %v1803_v44 = vsub.f32 1.5, %v1802_v47 }
 0xf15   :  { %v3944_v60 = vpop.eup %3943 }
 0xf16   :  { %v1804_v39 = vmul.f32 %v3942_v4, %v1803_v44  ;;  %v1810_v42 = vmul.f32 %v3944_v60, %v1778_v48  ;;  %vm1816_vm1 = vweird.f32 %v3944_v60 }
 0xf17   :  { %vm1817_vm3 = vmor %vm1815_vm2, %vm1816_vm1 }
 0xf18   :  { %v1811_v9 = vmul.f32 %v3944_v60, %v1810_v42  ;;  %v1808_v62 = vsel %vm1807_vm15, %v3942_v4, %v1804_v39 }
 0xf19   :  { %v1821_v49 = vmul.f32 %v1808_v62, %v4966_v28  ;;  %v1844_v28 = vperm.slane %v1843_v8, 0 }
 0xf1a   :  { %v1812_v7 = vmul.f32 0.5, %v1811_v9 }
 0xf1b   :  { %v1827_v32 = vmul.f32 %v1824_v54, %v1821_v49 }
 0xf1c   :  { %v1813_v50 = vsub.f32 1.5, %v1812_v7 }
 0xf1d   :  { %v4990_v13 = vadd.f32 %v1830_v27, %v1827_v32 }
 0xf1e   :  { %v1814_v1 = vmul.f32 %v3944_v60, %v1813_v50 }
 0xf20   :  { %v1818_v51 = vsel %vm1817_vm3, %v3944_v60, %v1814_v1 }
 0xf21   :  { %v1822_v11 = vmul.f32 %v1818_v51, %v4972_v6 }
 0xf23   :  { %v1828_v40 = vmul.f32 %v1824_v54, %v1822_v11 }
 0xf25   :  { %v4992_v29 = vadd.f32 %v1830_v27, %v1828_v40 }
 0xf27   :  { %v1841_v10 = vpack.c.bf16 %v4992_v29, %v4990_v13 }
 0xf29   :  { %3626 = vmatmul.msk.bf16.gmra.mxu2 %vm165_vm0, %v1841_v10 }
 0xf79   :  { %v1872_v52 = vpop.f32.mrf.mxu2 }
 0xf7a   :  { %v1873_v21 = vadd.f32 %v1872_v52, %v1844_v28 }
 0xf7c   :  { %v1887_v33 = vpack.c.bf16 %v1873_v21, %v1873_v21 }
 0xf7e   :  { %v1893_v15 = vunpack.c.l.bf16 %v1887_v33 }
 0xf80   :  { %v4998_v55 = vmul.f32 %v1893_v15, %v4310_v17  ;;  %v5002_v27 = vmul.f32 %v1893_v15, %v4326_v34  ;;  %v5005_v3 = vmul.f32 %v1893_v15, %v4314_v18  ;;  %v5008_v53 = vmul.f32 %v1893_v15, %v4393_v43 }
 0xf81   :  { %v1874_v26 = vpop.f32.mrf.mxu2  ;;  %v5011_v12 = vmul.f32 %v1893_v15, %v4316_v19  ;;  %v5014_v37 = vmul.f32 %v4465_v57, %v1893_v15  ;;  %v5017_v38 = vmul.f32 %v1893_v15, %v4537_v61  ;;  %v5020_v0 = vmul.f32 %v4482_v14, %v1893_v15 }
 0xf82   :  { %v1875_v6 = vadd.f32 %v1874_v26, %v1844_v28 }
 0xf84   :  { %v1888_v25 = vpack.c.bf16 %v1875_v6, %v1875_v6  ;;  %v1891_v54 = vpack.c.bf16 %v1875_v6, %v1873_v21 }
 0xf86   :  { %v1894_v30 = vunpack.c.l.bf16 %v1888_v25  ;;  %1905 = vrot.lane.b32.xlu1 %v1891_v54, %s4236_s3 }
 0xf88   :  { %v1898_v31 = vmul.f32 %v1894_v30, %v4310_v17  ;;  %v1993_v63 = vmul.f32 %v1894_v30, %v4326_v34  ;;  %v5025_v45 = vmul.f32 %v1894_v30, %v4314_v18  ;;  %v5028_v4 = vmul.f32 %v1894_v30, %v4393_v43 }
 0xf89   :  { %v5031_v48 = vmul.f32 %v1894_v30, %v4316_v19  ;;  %v5034_v46 = vmul.f32 %v4465_v57, %v1894_v30  ;;  %v5037_v5 = vmul.f32 %v1894_v30, %v4537_v61  ;;  %v5040_v47 = vmul.f32 %v4482_v14, %v1894_v30 }
 0xf8a   :  { %v1901_v44 = vpack.c.bf16 %v1898_v31, %v4998_v55  ;;  %v1996_v60 = vpack.c.bf16 %v1993_v63, %v5002_v27  ;;  %v2145_v39 = vpack.c.bf16 %v5025_v45, %v5005_v3  ;;  %v2073_v42 = vpack.c.bf16 %v5028_v4, %v5008_v53 }
 0xf8b   :  { %v2265_v9 = vpack.c.bf16 %v5031_v48, %v5011_v12  ;;  %v1990_v62 = vpack.c.bf16 %v5034_v46, %v5014_v37 }
 0xfac   :  { %v1877_v49 = vpop.f32.mrf.mxu2 }
 0xfad   :  { %v1878_v1 = vadd.f32 %v1877_v49, %v1844_v28 }
 0xfaf   :  { %v1889_v51 = vpack.c.bf16 %v1878_v1, %v1878_v1 }
 0xfb1   :  { %v1895_v11 = vunpack.c.l.bf16 %v1889_v51 }
 0xfb3   :  { %v1899_v8 = vmul.f32 %v1895_v11, %v4310_v17  ;;  %v1994_v21 = vmul.f32 %v1895_v11, %v4326_v34  ;;  %v2143_v33 = vmul.f32 %v1895_v11, %v4314_v18  ;;  %v5061_v15 = vmul.f32 %v1895_v11, %v4393_v43 }
 0xfb4   :  { %v1879_v32 = vpop.f32.mrf.mxu2  ;;  %v5064_v26 = vmul.f32 %v1895_v11, %v4316_v19  ;;  %v5067_v6 = vmul.f32 %v4465_v57, %v1895_v11  ;;  %v5073_v25 = vmul.f32 %v1895_v11, %v4537_v61 }
 0xfb5   :  { %v1880_v40 = vadd.f32 %v1879_v32, %v1844_v28  ;;  %v5070_v28 = vmul.f32 %v4482_v14, %v1895_v11 }
 0xfb7   :  { %v1890_v10 = vpack.c.bf16 %v1880_v40, %v1880_v40  ;;  %v1892_v35 = vpack.c.bf16 %v1880_v40, %v1878_v1 }
 0xfb9   :  { %v1896_v52 = vunpack.c.l.bf16 %v1890_v10  ;;  %1907 = vrot.lane.b32.xlu0 %v1892_v35, %s4236_s3 }
 0xfbb   :  { %v1900_v54 = vmul.f32 %v1896_v52, %v4310_v17  ;;  %v1995_v55 = vmul.f32 %v1896_v52, %v4326_v34  ;;  %v2144_v30 = vmul.f32 %v1896_v52, %v4314_v18  ;;  %v5079_v27 = vmul.f32 %v1896_v52, %v4393_v43 }
 0xfbc   :  { %v5082_v3 = vmul.f32 %v1896_v52, %v4316_v19  ;;  %v5085_v31 = vmul.f32 %v4465_v57, %v1896_v52  ;;  %v5088_v63 = vmul.f32 %v4482_v14, %v1896_v52  ;;  %v5091_v45 = vmul.f32 %v1896_v52, %v4537_v61 }
 0xfbd   :  { %v1902_v49 = vpack.c.bf16 %v1900_v54, %v1899_v8  ;;  %v1997_v1 = vpack.c.bf16 %v1995_v55, %v1994_v21  ;;  %v2146_v51 = vpack.c.bf16 %v2144_v30, %v2143_v33  ;;  %v2074_v11 = vpack.c.bf16 %v5079_v27, %v5061_v15 }
 0xfbe   :  { %v2266_v43 = vpack.c.bf16 %v5082_v3, %v5064_v26  ;;  %v1991_v32 = vpack.c.bf16 %v5085_v31, %v5067_v6 }
 0xff8   :  { %v1906_v10 = vpop.permute.xlu1 %1905 }
 0xff9   :  { %v5109_v35 = vsel %vm165_vm0, %v1906_v10, 0 }
0x102b   :  { %v1908_v61 = vpop.permute.xlu0 %1907 }
0x102c   :  { %v5104_v40 = vsel %vm165_vm0, %v1908_v61, 0 }
0x102d   :  { %1927 = vmatpush.bf16.xpose.msra.mxu0 %v5104_v40  ;;  %2010 = vmatpush.bf16.xpose.msra.mxu3 %v5104_v40 }
0x1035   :  { %1928 = vmatpush.bf16.xpose.msra.mxu0 %v5109_v35  ;;  %2011 = vmatpush.bf16.xpose.msra.mxu3 %v5109_v35 }
0x103c   :  { %3627 = vmatmul.msk.bf16.vlgmr.msra.gmra.mxu0 %vm165_vm0, %v1901_v44  ;;  %3629 = vmatmul.msk.bf16.vlgmr.msra.gmra.mxu3 %vm165_vm0, %v1996_v60 }
0x103d   :  { %2159 = vmatpush.bf16.xpose.msrb.mxu0 %v5104_v40 }
0x1045   :  { %2160 = vmatpush.bf16.xpose.msrb.mxu0 %v5109_v35 }
0x104c   :  { %3628 = vmatmul.msk.bf16.gmra.mxu0 %vm165_vm0, %v1902_v49  ;;  %3630 = vmatmul.msk.bf16.gmra.mxu3 %vm165_vm0, %v1997_v1 }
0x105c   :  { %3635 = vmatmul.msk.bf16.vlgmr.msrb.gmra.mxu0 %vm165_vm0, %v2145_v39 }
0x106c   :  { %3636 = vmatmul.msk.bf16.gmra.mxu0 %vm165_vm0, %v2146_v51 }
0x10b9   :  { %v1930_v51 = vpop.f32.mrf.mxu0 }
0x10bf   :  { %v2013_v8 = vpop.f32.mrf.mxu3 }
0x10c0   :  { %v2014_v52 = vadd.f32 %v4320_v20, %v2013_v8 }
0x10c1   :  { %v1932_v61 = vpop.f32.mrf.mxu0 }
0x10c2   :  { %v2023_v21 = vsel %vm165_vm0, %v2014_v52, -inf  ;;  %v1933_v10 = vadd.f32 %v4320_v20, %v1932_v61 }
0x10c3   :  { %2024 = vmax.xlane.f32.xlu2 %v2023_v21 }
0x10c4   :  { %v1943_v8 = vsel %vm165_vm0, %v1933_v10, -inf }
0x10c7   :  { %v2015_v33 = vpop.f32.mrf.mxu3 }
0x10c8   :  { %v2016_v44 = vadd.f32 %v4320_v20, %v2015_v33 }
0x10ca   :  { %v2026_v60 = vsel %vm165_vm0, %v2016_v44, -inf }
0x10cb   :  { %2027 = vmax.xlane.f32.xlu2 %v2026_v60 }
0x10cf   :  { %v2018_v54 = vpop.f32.mrf.mxu3 }
0x10d0   :  { %v2019_v55 = vadd.f32 %v2018_v54, %v4374_v2 }
0x10d2   :  { %v2029_v30 = vsel %vm165_vm0, %v2019_v55, -inf }
0x10d3   :  { %2030 = vmax.xlane.f32.xlu0 %v2029_v30 }
0x10d7   :  { %v2020_v39 = vpop.f32.mrf.mxu3 }
0x10d8   :  { %v2021_v49 = vadd.f32 %v2020_v39, %v4374_v2 }
0x10da   :  { %v2032_v1 = vsel %vm165_vm0, %v2021_v49, -inf }
0x10db   :  { %2033 = vmax.xlane.f32.xlu2 %v2032_v1 }
0x10e7   :  { %2077 = vrot.lane.b32.xlu0 %v2073_v42, %s4233_s8 }
0x1111   :  { %1944 = vmax.xlane.f32.xlu0 %v1943_v8 }
0x1136   :  { %v2025_v21 = vpop.xlane.xlu2 %2024 }
0x1137   :  { %v2035_v33 = vsub.f32 %v2014_v52, %v2025_v21  ;;  %v1935_v52 = vpop.f32.mrf.mxu0 }
0x1139   :  { %v2039_v60 = vmul.f32 1.442695, %v2035_v33 }
0x113b   :  { %3945 = vpow2.f32 %v2039_v60  ;;  %v1931_v60 = vadd.f32 %v4320_v20, %v1930_v51 }
0x113e   :  { %v2028_v54 = vpop.xlane.xlu2 %2027 }
0x113f   :  { %v2036_v30 = vsub.f32 %v2016_v44, %v2028_v54  ;;  %v1937_v33 = vpop.f32.mrf.mxu0  ;;  %v1940_v54 = vsel %vm165_vm0, %v1931_v60, -inf }
0x1141   :  { %v5135_v39 = vpop.eup %3945  ;;  %v2041_v1 = vmul.f32 1.442695, %v2036_v30 }
0x1142   :  { %v2047_v53 = vsel %vm165_vm0, %v5135_v39, 0.0 }
0x1143   :  { %3947 = vpow2.f32 %v2041_v1  ;;  %2048 = vadd.xlane.f32.xlu1 %v2047_v53  ;;  %v5156_v1 = vadd.f32 %v1937_v33, %v4374_v2 }
0x1145   :  { %v1949_v53 = vsel %vm165_vm0, %v5156_v1, -inf }
0x1149   :  { %v3948_v4 = vpop.eup %3947 }
0x114a   :  { %v2050_v42 = vsel %vm165_vm0, %v3948_v4, 0.0 }
0x114b   :  { %2051 = vadd.xlane.f32.xlu2 %v2050_v42  ;;  %v2031_v42 = vpop.xlane.xlu0 %2030 }
0x114c   :  { %v2037_v27 = vsub.f32 %v2019_v55, %v2031_v42 }
0x114e   :  { %v2034_v61 = vpop.xlane.xlu2 %2033 }
0x114f   :  { %v2038_v8 = vsub.f32 %v2021_v49, %v2034_v61  ;;  %v5151_v49 = vadd.f32 %v1935_v52, %v4374_v2 }
0x1151   :  { %v2045_v50 = vmul.f32 1.442695, %v2038_v8  ;;  %v1946_v30 = vsel %vm165_vm0, %v5151_v49, -inf }
0x1153   :  { %3949 = vpow2.f32 %v2045_v50  ;;  %v2162_v50 = vpop.f32.mrf.mxu0 }
0x1154   :  { %v5161_v15 = vadd.f32 %v4320_v20, %v2162_v50 }
0x1159   :  { %v5140_v21 = vpop.eup %3949  ;;  %v2078_v8 = vpop.permute.xlu0 %2077 }
0x115a   :  { %v2056_v44 = vsel %vm165_vm0, %v5140_v21, 0.0 }
0x115b   :  { %2057 = vadd.xlane.f32.xlu1 %v2056_v44  ;;  %v2164_v51 = vpop.f32.mrf.mxu0  ;;  %v2043_v44 = vmul.f32 1.442695, %v2037_v27 }
0x115d   :  { %3951 = vpow2.f32 %v2043_v44 }
0x1163   :  { %2079 = vrot.lane.b32.xlu2 %v2074_v11, %s4233_s8  ;;  %1941 = vmax.xlane.f32.xlu1 %v1940_v54  ;;  %v2172_v11 = vsel %vm165_vm0, %v5161_v15, -inf  ;;  %v2167_v61 = vpop.f32.mrf.mxu0 }
0x1164   :  { %v5166_v52 = vadd.f32 %v2167_v61, %v4374_v2 }
0x1166   :  { %v2178_v33 = vsel %vm165_vm0, %v5166_v52, -inf }
0x116b   :  { %1947 = vmax.xlane.f32.xlu1 %v1946_v30  ;;  %v2169_v44 = vpop.f32.mrf.mxu0 }
0x1173   :  { %1950 = vmax.xlane.f32.xlu1 %v1949_v53  ;;  %v3952_v53 = vpop.eup %3951 }
0x1174   :  { %v2053_v55 = vsel %vm165_vm0, %v3952_v53, 0.0 }
0x117b   :  { %2173 = vmax.xlane.f32.xlu1 %v2172_v11  ;;  %v5174_v11 = vadd.f32 %v4320_v20, %v2164_v51 }
0x117d   :  { %v2175_v61 = vsel %vm165_vm0, %v5174_v11, -inf }
0x1183   :  { %2179 = vmax.xlane.f32.xlu1 %v2178_v33 }
0x1184   :  { %v1945_v54 = vpop.xlane.xlu0 %1944 }
0x1185   :  { %v1953_v30 = vsub.f32 %v1933_v10, %v1945_v54  ;;  %v5181_v10 = vadd.f32 %v2169_v44, %v4374_v2 }
0x1187   :  { %v1958_v50 = vmul.f32 1.442695, %v1953_v30  ;;  %v2181_v33 = vsel %vm165_vm0, %v5181_v10, -inf }
0x1189   :  { %3953 = vpow2.f32 %v1958_v50 }
0x118c   :  { %2054 = vadd.xlane.f32.xlu2 %v2053_v55 }
0x118f   :  { %v5171_v42 = vpop.eup %3953 }
0x1190   :  { %v1967_v27 = vsel %vm165_vm0, %v5171_v42, 0.0 }
0x1191   :  { %1968 = vadd.xlane.f32.xlu0 %v1967_v27 }
0x1194   :  { %2176 = vmax.xlane.f32.xlu2 %v2175_v61 }
0x119c   :  { %2182 = vmax.xlane.f32.xlu2 %v2181_v33 }
0x11b6   :  { %v2049_v54 = vpop.xlane.xlu1 %2048 }
0x11be   :  { %v2052_v30 = vpop.xlane.xlu2 %2051 }
0x11bf   :  { %3955 = vrcp.f32 %v2052_v30 }
0x11c0   :  { %3957 = vrcp.f32 %v2049_v54 }
0x11c5   :  { %v3956_v51 = vpop.eup %3955 }
0x11c6   :  { %v2080_v50 = vpop.permute.xlu2 %2079  ;;  %v3958_v55 = vpop.eup %3957  ;;  %v2064_v27 = vmul.f32 %v3956_v51, %v3948_v4 }
0x11c7   :  { %2095 = vmatpush.bf16.msrb.mxu1 %v2080_v50  ;;  %v2063_v7 = vmul.f32 %v3958_v55, %v5135_v39 }
0x11c9   :  { %v2067_v61 = vpack.c.bf16 %v2064_v27, %v2063_v7 }
0x11cb   :  { %2096 = vmatpush.bf16.msrb.mxu1 %v2078_v8 }
0x11ce   :  { %v2058_v44 = vpop.xlane.xlu1 %2057  ;;  %3631 = vmatmul.msk.bf16.vlgmr.msrb.gmra.mxu1 %vm165_vm0, %v2067_v61 }
0x11cf   :  { %2279 = vmatpush.bf16.xpose.msra.mxu1 %v5104_v40 }
0x11d6   :  { %v1942_v33 = vpop.xlane.xlu1 %1941 }
0x11d7   :  { %2280 = vmatpush.bf16.xpose.msra.mxu1 %v5109_v35  ;;  %v1952_v14 = vsub.f32 %v1931_v60, %v1942_v33  ;;  %v3754_v35 = vld [vmem:[#allocation8 + $0x148] sm:$0xff] }
0x11d9   :  { %v1956_v30 = vmul.f32 1.442695, %v1952_v14  ;;  %v3753_v14 = vld [vmem:[#allocation8 + $0x140] sm:$0xff] }
0x11db   :  { %3959 = vpow2.f32 %v1956_v30 }
0x11dc   :  { %3961 = vrcp.f32 %v2058_v44 }
0x11de   :  { %v1948_v26 = vpop.xlane.xlu1 %1947 }
0x11df   :  { %2599 = vmatpush.bf16.msrb.mxu1 %v3754_v35 }
0x11e1   :  { %v5189_v54 = vpop.eup %3959 }
0x11e2   :  { %v1964_v4 = vsel %vm165_vm0, %v5189_v54, 0.0  ;;  %v3962_v7 = vpop.eup %3961 }
0x11e3   :  { %1965 = vadd.xlane.f32.xlu2 %v1964_v4  ;;  %v2066_v8 = vmul.f32 %v3962_v7, %v5140_v21  ;;  %2600 = vmatpush.bf16.msrb.mxu1 %v3753_v14  ;;  %v2578_v7 = vld [vmem:[#allocation8 + $0x150] sm:$0x1] }
0x11e6   :  { %v1951_v27 = vpop.xlane.xlu1 %1950 }
0x11e7   :  { %v1955_v30 = vsub.f32 %v5156_v1, %v1951_v27 }
0x11ff   :  { %v2055_v39 = vpop.xlane.xlu2 %2054 }
0x1200   :  { %3963 = vrcp.f32 %v2055_v39  ;;  %v1962_v39 = vmul.f32 1.442695, %v1955_v30 }
0x1206   :  { %v3964_v40 = vpop.eup %3963 }
0x1207   :  { %v2065_v51 = vmul.f32 %v3964_v40, %v3952_v53 }
0x1209   :  { %v2068_v50 = vpack.c.bf16 %v2066_v8, %v2065_v51 }
0x120b   :  { %3632 = vmatmul.msk.bf16.gmra.mxu1 %vm165_vm0, %v2068_v50  ;;  %v2579_v50 = vunpack.c.l.bf16 %v2578_v7 }
0x121b   :  { %3639 = vmatmul.msk.bf16.vlgmr.msra.gmra.mxu1 %vm165_vm0, %v2265_v9 }
0x122b   :  { %3640 = vmatmul.msk.bf16.gmra.mxu1 %vm165_vm0, %v2266_v43  ;;  %v1954_v43 = vsub.f32 %v5151_v49, %v1948_v26  ;;  %v2174_v49 = vpop.xlane.xlu1 %2173 }
0x122c   :  { %v2184_v35 = vsub.f32 %v5161_v15, %v2174_v49 }
0x122d   :  { %v1960_v61 = vmul.f32 1.442695, %v1954_v43 }
0x122e   :  { %v2188_v26 = vmul.f32 1.442695, %v2184_v35 }
0x122f   :  { %3965 = vpow2.f32 %v1960_v61 }
0x1230   :  { %3967 = vpow2.f32 %v1962_v39 }
0x1231   :  { %3969 = vpow2.f32 %v2188_v26 }
0x1235   :  { %v5232_v40 = vpop.eup %3965 }
0x1236   :  { %v1970_v14 = vsel %vm165_vm0, %v5232_v40, 0.0 }
0x123b   :  { %3671 = vmatmul.msk.bf16.vlgmr.msrb.gmra.mxu1 %vm165_vm0, %v4628_v59 }
0x124b   :  { %3672 = vmatmul.msk.bf16.gmra.mxu1 %vm165_vm0, %v4634_v58  ;;  %v5207_v21 = vpop.f32.mrf.mxu1 }
0x1253   :  { %v5209_v60 = vpop.f32.mrf.mxu1 }
0x1288   :  { %v5211_v53 = vpop.f32.mrf.mxu1 }
0x1290   :  { %v5213_v12 = vpop.f32.mrf.mxu1 }
0x1298   :  { %v2282_v48 = vpop.f32.mrf.mxu1 }
0x1299   :  { %v5216_v9 = vadd.f32 %v4320_v20, %v2282_v48  ;;  %v2580_v48 = vperm.slane %v2579_v50, 0 }
0x129b   :  { %v2292_v3 = vsel %vm165_vm0, %v5216_v9, -inf }
0x129c   :  { %2293 = vmax.xlane.f32.xlu1 %v2292_v3  ;;  %v5242_v3 = vpop.eup %3967 }
0x129d   :  { %v5254_v27 = vpop.eup %3969 }
0x129e   :  { %v2196_v37 = vsel %vm165_vm0, %v5254_v27, 0.0 }
0x12a0   :  { %v2284_v59 = vpop.f32.mrf.mxu1 }
0x12a1   :  { %v5221_v58 = vadd.f32 %v4320_v20, %v2284_v59 }
0x12a3   :  { %v2295_v55 = vsel %vm165_vm0, %v5221_v58, -inf }
0x12a4   :  { %2296 = vmax.xlane.f32.xlu2 %v2295_v55  ;;  %v1973_v55 = vsel %vm165_vm0, %v5242_v3, 0.0 }
0x12a8   :  { %v2287_v44 = vpop.f32.mrf.mxu1 }
0x12a9   :  { %v5227_v33 = vadd.f32 %v2287_v44, %v4374_v2 }
0x12ab   :  { %v2298_v4 = vsel %vm165_vm0, %v5227_v33, -inf }
0x12ac   :  { %2299 = vmax.xlane.f32.xlu0 %v2298_v4 }
0x12b0   :  { %v2289_v8 = vpop.f32.mrf.mxu1 }
0x12b1   :  { %v5235_v51 = vadd.f32 %v2289_v8, %v4374_v2 }
0x12b3   :  { %v2301_v1 = vsel %vm165_vm0, %v5235_v51, -inf }
0x12b4   :  { %2302 = vmax.xlane.f32.xlu1 %v2301_v1  ;;  %1971 = vadd.xlane.f32.xlu0 %v1970_v14 }
0x12b8   :  { %v2602_v59 = vpop.f32.mrf.mxu1 }
0x12b9   :  { %v5244_v43 = vadd.f32 %v2602_v59, %v2580_v48 }
0x12bb   :  { %v2623_v15 = vpack.c.bf16 %v5244_v43, %v5244_v43 }
0x12bc   :  { %2110 = vrot.lane.b32.xlu2 %v1990_v62, %s4233_s8  ;;  %1974 = vadd.xlane.f32.xlu0 %v1973_v55 }
0x12bd   :  { %v2714_v30 = vunpack.c.l.bf16 %v2623_v15 }
0x12bf   :  { %v5265_v62 = vmul.f32 %v2714_v30, %v4682_v41  ;;  %v5268_v7 = vmul.f32 %v4793_v23, %v2714_v30  ;;  %v5271_v49 = vmul.f32 %v4828_v56, %v2714_v30  ;;  %v5286_v26 = vmul.f32 %v2714_v30, %v4850_v24  ;;  %v2177_v30 = vpop.xlane.xlu2 %2176 }
0x12c0   :  { %v2604_v61 = vpop.f32.mrf.mxu1  ;;  %v2185_v55 = vsub.f32 %v5174_v11, %v2177_v30 }
0x12c1   :  { %v5256_v44 = vadd.f32 %v2604_v61, %v2580_v48 }
0x12c2   :  { %v2190_v4 = vmul.f32 1.442695, %v2185_v55 }
0x12c3   :  { %v2624_v39 = vpack.c.bf16 %v5256_v44, %v5256_v44 }
0x12c4   :  { %2197 = vadd.xlane.f32.xlu0 %v2196_v37  ;;  %3971 = vpow2.f32 %v2190_v4 }
0x12c5   :  { %v2715_v46 = vunpack.c.l.bf16 %v2624_v39 }
0x12c7   :  { %v5274_v8 = vmul.f32 %v2715_v46, %v4682_v41  ;;  %v5277_v50 = vmul.f32 %v4793_v23, %v2715_v46  ;;  %v5280_v35 = vmul.f32 %v4828_v56, %v2715_v46  ;;  %v5283_v1 = vmul.f32 %v2715_v46, %v4850_v24 }
0x12c8   :  { %v2607_v14 = vpop.f32.mrf.mxu1 }
0x12c9   :  { %v5294_v61 = vadd.f32 %v2607_v14, %v2580_v48 }
0x12cb   :  { %v2625_v37 = vpack.c.bf16 %v5294_v61, %v5294_v61 }
0x12cd   :  { %2112 = vrot.lane.b32.xlu1 %v1991_v32, %s4233_s8  ;;  %v2716_v15 = vunpack.c.l.bf16 %v2625_v37  ;;  %v5763_v37 = vpack.c.bf16 %v5088_v63, %v5070_v28  ;;  %v5349_v28 = vpop.eup %3971 }
0x12ce   :  { %v2199_v63 = vsel %vm165_vm0, %v5349_v28, 0.0 }
0x12cf   :  { %v5310_v57 = vmul.f32 %v2716_v15, %v4682_v41  ;;  %v5313_v6 = vmul.f32 %v4793_v23, %v2716_v15  ;;  %v5316_v31 = vmul.f32 %v4828_v56, %v2716_v15  ;;  %v5319_v32 = vmul.f32 %v2716_v15, %v4850_v24 }
0x12d0   :  { %v2609_v46 = vpop.f32.mrf.mxu1 }
0x12d1   :  { %v5305_v59 = vadd.f32 %v2609_v46, %v2580_v48  ;;  %v2180_v46 = vpop.xlane.xlu1 %2179 }
0x12d3   :  { %v2626_v14 = vpack.c.bf16 %v5305_v59, %v5305_v59 }
0x12d5   :  { %v2717_v39 = vunpack.c.l.bf16 %v2626_v14  ;;  %v5357_v14 = vpop.xlane.xlu2 %2182 }
0x12d7   :  { %v5322_v11 = vmul.f32 %v2717_v39, %v4682_v41  ;;  %v5325_v48 = vmul.f32 %v4793_v23, %v2717_v39  ;;  %v5328_v55 = vmul.f32 %v4828_v56, %v2717_v39  ;;  %v5331_v30 = vmul.f32 %v2717_v39, %v4850_v24  ;;  %v1969_v23 = vpop.xlane.xlu0 %1968 }
0x12d8   :  { %2228 = vrot.lane.b32.xlu0 %v5763_v37, %s4233_s8  ;;  %v5764_v24 = vpack.c.bf16 %v5091_v45, %v5073_v25  ;;  %v5765_v39 = vpack.c.bf16 %v5037_v5, %v5017_v38  ;;  %v2186_v25 = vsub.f32 %v5166_v52, %v2180_v46 }
0x12dd   :  { %v1966_v4 = vpop.xlane.xlu2 %1965 }
0x12e0   :  { %2348 = vrot.lane.b32.xlu0 %v5764_v24, %s4233_s8  ;;  %v2192_v24 = vmul.f32 1.442695, %v2186_v25 }
0x12e5   :  { %2200 = vadd.xlane.f32.xlu2 %v2199_v63 }
0x12fd   :  { %2346 = vrot.lane.b32.xlu2 %v5765_v39, %s4233_s8 }
0x130f   :  { %v2294_v37 = vpop.xlane.xlu1 %2293 }
0x1310   :  { %v2304_v56 = vsub.f32 %v5216_v9, %v2294_v37 }
0x1312   :  { %v2308_v45 = vmul.f32 1.442695, %v2304_v56 }
0x1314   :  { %3973 = vpow2.f32 %v2308_v45 }
0x1315   :  { %3975 = vpow2.f32 %v2192_v24 }
0x1317   :  { %v2297_v41 = vpop.xlane.xlu2 %2296 }
0x1318   :  { %v2305_v63 = vsub.f32 %v5221_v58, %v2297_v41 }
0x131a   :  { %v5362_v15 = vpop.eup %3973  ;;  %v2310_v38 = vmul.f32 1.442695, %v2305_v63 }
0x131b   :  { %v2316_v5 = vsel %vm165_vm0, %v5362_v15, 0.0  ;;  %v5366_v9 = vpop.eup %3975 }
0x131c   :  { %3977 = vpow2.f32 %v2310_v38  ;;  %2317 = vadd.xlane.f32.xlu1 %v2316_v5  ;;  %v2202_v41 = vsel %vm165_vm0, %v5366_v9, 0.0 }
0x131f   :  { %v2300_v39 = vpop.xlane.xlu0 %2299 }
0x1320   :  { %v2306_v52 = vsub.f32 %v5227_v33, %v2300_v39 }
0x1322   :  { %v5369_v56 = vpop.eup %3977  ;;  %v2312_v46 = vmul.f32 1.442695, %v2306_v52 }
0x1323   :  { %v2319_v58 = vsel %vm165_vm0, %v5369_v56, 0.0 }
0x1324   :  { %3979 = vpow2.f32 %v2312_v46  ;;  %2320 = vadd.xlane.f32.xlu0 %v2319_v58  ;;  %2203 = vadd.xlane.f32.xlu1 %v2202_v41 }
0x1327   :  { %v2303_v37 = vpop.xlane.xlu1 %2302  ;;  %v1972_v63 = vpop.xlane.xlu0 %1971 }
0x1328   :  { %v2307_v25 = vsub.f32 %v5235_v51, %v2303_v37  ;;  %v5766_v51 = vpack.c.bf16 %v5040_v47, %v5020_v0 }
0x132a   :  { %v5376_v45 = vpop.eup %3979  ;;  %v2314_v24 = vmul.f32 1.442695, %v2307_v25 }
0x132b   :  { %v2322_v33 = vsel %vm165_vm0, %v5376_v45, 0.0 }
0x132c   :  { %3981 = vpow2.f32 %v2314_v24  ;;  %2323 = vadd.xlane.f32.xlu1 %v2322_v33  ;;  %v2111_v24 = vpop.permute.xlu2 %2110 }
0x132d   :  { %3983 = vrcp.f32 %v1966_v4 }
0x132e   :  { %3985 = vrcp.f32 %v1969_v23  ;;  %v2187_v23 = vsub.f32 %v5181_v10, %v5357_v14 }
0x132f   :  { %v1975_v39 = vpop.xlane.xlu0 %1974 }
0x1330   :  { %3987 = vrcp.f32 %v1975_v39 }
0x1331   :  { %3989 = vrcp.f32 %v1972_v63 }
0x1332   :  { %v5380_v38 = vpop.eup %3981 }
0x1333   :  { %v2325_v5 = vsel %vm165_vm0, %v5380_v38, 0.0  ;;  %v3984_v52 = vpop.eup %3983 }
0x1334   :  { %2326 = vadd.xlane.f32.xlu1 %v2325_v5  ;;  %v3986_v58 = vpop.eup %3985  ;;  %v1980_v41 = vmul.f32 %v3984_v52, %v5189_v54 }
0x1335   :  { %v1981_v25 = vmul.f32 %v3986_v58, %v5171_v42  ;;  %v2194_v42 = vmul.f32 1.442695, %v2187_v23 }
0x1336   :  { %v3988_v0 = vpop.eup %3987 }
0x1337   :  { %v2198_v37 = vpop.xlane.xlu0 %2197  ;;  %v1984_v33 = vpack.c.bf16 %v1981_v25, %v1980_v41  ;;  %v3990_v47 = vpop.eup %3989  ;;  %v1983_v5 = vmul.f32 %v3988_v0, %v5242_v3 }
0x1338   :  { %2226 = vrot.lane.b32.xlu0 %v5766_v51, %s4233_s8  ;;  %v1982_v51 = vmul.f32 %v3990_v47, %v5232_v40  ;;  %3991 = vrcp.f32 %v2198_v37 }
0x1339   :  { %3993 = vpow2.f32 %v2194_v42 }
0x133a   :  { %v1985_v52 = vpack.c.bf16 %v1983_v5, %v1982_v51 }
0x133e   :  { %v3992_v39 = vpop.eup %3991 }
0x133f   :  { %v2113_v46 = vpop.permute.xlu1 %2112  ;;  %v2212_v41 = vmul.f32 %v3992_v39, %v5254_v27 }
0x1340   :  { %2128 = vmatpush.bf16.msrb.mxu2 %v2113_v46  ;;  %v3994_v46 = vpop.eup %3993 }
0x1341   :  { %v2205_v40 = vsel %vm165_vm0, %v3994_v46, 0.0 }
0x1344   :  { %2129 = vmatpush.bf16.msrb.mxu2 %v2111_v24 }
0x1347   :  { %3633 = vmatmul.msk.bf16.vlgmr.msrb.gmra.mxu2 %vm165_vm0, %v1984_v33 }
0x134a   :  { %v2229_v4 = vpop.permute.xlu0 %2228 }
0x134b   :  { %2244 = vmatpush.bf16.msrb.mxu3 %v2229_v4 }
0x1352   :  { %v2349_v54 = vpop.permute.xlu0 %2348 }
0x1353   :  { %2364 = vmatpush.bf16.msra.mxu2 %v2349_v54 }
0x1357   :  { %3634 = vmatmul.msk.bf16.gmra.mxu2 %vm165_vm0, %v1985_v52 }
0x1358   :  { %v2201_v63 = vpop.xlane.xlu2 %2200 }
0x1359   :  { %3995 = vrcp.f32 %v2201_v63 }
0x135f   :  { %v3996_v58 = vpop.eup %3995 }
0x1360   :  { %v2213_v10 = vmul.f32 %v3996_v58, %v5349_v28  ;;  %v2347_v3 = vpop.permute.xlu2 %2346 }
0x1361   :  { %2365 = vmatpush.bf16.msra.mxu2 %v2347_v3 }
0x1362   :  { %v2216_v14 = vpack.c.bf16 %v2213_v10, %v2212_v41  ;;  %2206 = vadd.xlane.f32.xlu0 %v2205_v40 }
0x138f   :  { %v2318_v25 = vpop.xlane.xlu1 %2317 }
0x1390   :  { %3997 = vrcp.f32 %v2318_v25 }
0x1396   :  { %v3998_v33 = vpop.eup %3997 }
0x1397   :  { %v2321_v37 = vpop.xlane.xlu0 %2320  ;;  %v2204_v24 = vpop.xlane.xlu1 %2203  ;;  %v2332_v0 = vmul.f32 %v3998_v33, %v5362_v15 }
0x1398   :  { %3999 = vrcp.f32 %v2321_v37 }
0x139e   :  { %v4000_v4 = vpop.eup %3999 }
0x139f   :  { %v2333_v47 = vmul.f32 %v4000_v4, %v5369_v56  ;;  %v2324_v27 = vpop.xlane.xlu1 %2323 }
0x13a0   :  { %4001 = vrcp.f32 %v2324_v27 }
0x13a1   :  { %v2336_v23 = vpack.c.bf16 %v2333_v47, %v2332_v0 }
0x13a3   :  { %3641 = vmatmul.msk.bf16.vlgmr.msra.gmra.mxu2 %vm165_vm0, %v2336_v23 }
0x13a6   :  { %v4002_v54 = vpop.eup %4001 }
0x13a7   :  { %v2327_v28 = vpop.xlane.xlu1 %2326  ;;  %v2334_v42 = vmul.f32 %v4002_v54, %v5376_v45  ;;  %v3749_v45 = vld [vmem:[#allocation8 + $0x100] sm:$0xff] }
0x13a8   :  { %4003 = vrcp.f32 %v2327_v28 }
0x13a9   :  { %4005 = vrcp.f32 %v2204_v24 }
0x13aa   :  { %v2227_v5 = vpop.permute.xlu0 %2226 }
0x13ab   :  { %2245 = vmatpush.bf16.msrb.mxu3 %v2227_v5 }
0x13ae   :  { %v4004_v51 = vpop.eup %4003  ;;  %3637 = vmatmul.msk.bf16.vlgmr.msrb.gmra.mxu3 %vm165_vm0, %v2216_v14  ;;  %v3750_v14 = vld [vmem:[#allocation8 + $0x108] sm:$0xff] }
0x13af   :  { %v2335_v52 = vmul.f32 %v4004_v51, %v5380_v38  ;;  %v4006_v63 = vpop.eup %4005  ;;  %2409 = vmatpush.bf16.msra.mxu0 %v3750_v14 }
0x13b0   :  { %v2214_v58 = vmul.f32 %v4006_v63, %v5366_v9 }
0x13b1   :  { %v2337_v15 = vpack.c.bf16 %v2335_v52, %v2334_v42 }
0x13b3   :  { %3642 = vmatmul.msk.bf16.gmra.mxu2 %vm165_vm0, %v2337_v15  ;;  %2410 = vmatpush.bf16.msra.mxu0 %v3749_v45 }
0x13ca   :  { %v2131_v3 = vpop.f32.mrf.mxu2 }
0x13cb   :  { %v2132_v33 = vadd.f32 %v2131_v3, %v5207_v21 }
0x13d2   :  { %v2133_v40 = vpop.f32.mrf.mxu2 }
0x13d3   :  { %v2134_v4 = vadd.f32 %v2133_v40, %v5209_v60 }
0x13d5   :  { %v2207_v56 = vpop.xlane.xlu0 %2206 }
0x13d6   :  { %4007 = vrcp.f32 %v2207_v56 }
0x13da   :  { %v2136_v38 = vpop.f32.mrf.mxu2 }
0x13db   :  { %v2137_v51 = vadd.f32 %v2136_v38, %v5211_v53 }
0x13dc   :  { %v4008_v39 = vpop.eup %4007 }
0x13dd   :  { %v2215_v41 = vmul.f32 %v4008_v39, %v3994_v46 }
0x13df   :  { %v2217_v10 = vpack.c.bf16 %v2215_v41, %v2214_v58  ;;  %v1886_v58 = vld [vmem:[#allocation8 + $0x110] sm:$0x1] }
0x13e0   :  { %v2383_v41 = vunpack.c.l.bf16 %v1886_v58 }
0x13e1   :  { %3638 = vmatmul.msk.bf16.gmra.mxu3 %vm165_vm0, %v2217_v10 }
0x13e2   :  { %v2138_v25 = vpop.f32.mrf.mxu2  ;;  %v2384_v10 = vperm.slane %v2383_v41, 0 }
0x13e3   :  { %v2139_v42 = vadd.f32 %v2138_v25, %v5213_v12 }
0x1426   :  { %v2367_v37 = vpop.f32.mrf.mxu2 }
0x142e   :  { %v2369_v47 = vpop.f32.mrf.mxu2 }
0x1431   :  { %v2247_v24 = vpop.f32.mrf.mxu3 }
0x1432   :  { %v2257_v0 = vadd.f32 %v2247_v24, %v2132_v33 }
0x1434   :  { %v2377_v27 = vadd.f32 %v2367_v37, %v2257_v0 }
0x1436   :  { %v2372_v5 = vpop.f32.mrf.mxu2 }
0x1439   :  { %v2249_v9 = vpop.f32.mrf.mxu3 }
0x143a   :  { %v2258_v46 = vadd.f32 %v2249_v9, %v2134_v4 }
0x143c   :  { %v2378_v23 = vadd.f32 %v2369_v47, %v2258_v46 }
0x143e   :  { %v2381_v28 = vpack.c.bf16 %v2378_v23, %v2377_v27  ;;  %v2374_v56 = vpop.f32.mrf.mxu2 }
0x1440   :  { %3651 = vmatmul.msk.bf16.vlgmr.msra.gmra.mxu0 %vm165_vm0, %v2381_v28 }
0x1464   :  { %v2252_v54 = vpop.f32.mrf.mxu3 }
0x1465   :  { %v2259_v52 = vadd.f32 %v2252_v54, %v2137_v51 }
0x1467   :  { %v2379_v60 = vadd.f32 %v2372_v5, %v2259_v52 }
0x146c   :  { %v2254_v15 = vpop.f32.mrf.mxu3 }
0x146d   :  { %v2260_v21 = vadd.f32 %v2254_v15, %v2139_v42 }
0x146f   :  { %v2380_v63 = vadd.f32 %v2374_v56, %v2260_v21 }
0x1471   :  { %v2382_v39 = vpack.c.bf16 %v2380_v63, %v2379_v60 }
0x1473   :  { %3652 = vmatmul.msk.bf16.gmra.mxu0 %vm165_vm0, %v2382_v39 }
0x14bd   :  { %v2412_v3 = vpop.f32.mrf.mxu0 }
0x14be   :  { %v2413_v40 = vadd.f32 %v2412_v3, %v2384_v10  ;;  %v3752_v3 = vld [vmem:[#allocation8 + $0x130] sm:$0xff] }
0x14bf   :  { %2561 = vmatpush.bf16.msra.mxu3 %v3752_v3 }
0x14c0   :  { %v2422_v14 = vadd.f32 %v2413_v40, %v4979_v22 }
0x14c2   :  { %v2428_v53 = vsel %vm165_vm0, %v2422_v14, 0.0 }
0x14c3   :  { %2429 = vadd.xlane.f32.xlu2 %v2428_v53  ;;  %v3751_v53 = vld [vmem:[#allocation8 + $0x128] sm:$0xff] }
0x14c4   :  { %2562 = vmatpush.bf16.msra.mxu3 %v3751_v53 }
0x14c5   :  { %v2414_v12 = vpop.f32.mrf.mxu0 }
0x14c6   :  { %v2415_v45 = vadd.f32 %v2414_v12, %v2384_v10 }
0x14c8   :  { %v2423_v38 = vadd.f32 %v2415_v45, %v4981_v16 }
0x14ca   :  { %v2431_v25 = vsel %vm165_vm0, %v2423_v38, 0.0 }
0x14cb   :  { %2432 = vadd.xlane.f32.xlu1 %v2431_v25 }
0x14f0   :  { %v2417_v37 = vpop.f32.mrf.mxu0 }
0x14f1   :  { %v2418_v24 = vadd.f32 %v2417_v37, %v2384_v10 }
0x14f3   :  { %v2424_v33 = vadd.f32 %v2418_v24, %v4990_v13 }
0x14f5   :  { %v2434_v4 = vsel %vm165_vm0, %v2424_v33, 0.0 }
0x14f6   :  { %2435 = vadd.xlane.f32.xlu1 %v2434_v4 }
0x14f8   :  { %v2419_v0 = vpop.f32.mrf.mxu0 }
0x14f9   :  { %v2420_v9 = vadd.f32 %v2419_v0, %v2384_v10 }
0x14fb   :  { %v2425_v22 = vadd.f32 %v2420_v9, %v4992_v29  ;;  %v2426_v9 = vld [vmem:[#allocation8 + $0x118] sm:$0x1] }
0x14fd   :  { %v2437_v46 = vsel %vm165_vm0, %v2425_v22, 0.0 }
0x14fe   :  { %2438 = vadd.xlane.f32.xlu1 %v2437_v46 }
0x1536   :  { %v2430_v47 = vpop.xlane.xlu2 %2429 }
0x1537   :  { %v2440_v16 = vmul.f32 %v2430_v47, %v4602_v36 }
0x1539   :  { %v2444_v27 = vsub.f32 %v2422_v14, %v2440_v16  ;;  %v2516_v16 = vunpack.c.l.bf16 %v2426_v9 }
0x153b   :  { %v2448_v23 = vmul.f32 %v2444_v27, %v2444_v27 }
0x153d   :  { %v2452_v28 = vsel %vm165_vm0, %v2448_v23, 0.0  ;;  %v2427_v23 = vld [vmem:[#allocation8 + $0x120] sm:$0x1] }
0x153e   :  { %2453 = vadd.xlane.f32.xlu0 %v2452_v28  ;;  %v2433_v5 = vpop.xlane.xlu1 %2432 }
0x153f   :  { %v2441_v13 = vmul.f32 %v2433_v5, %v4602_v36 }
0x1541   :  { %v2445_v54 = vsub.f32 %v2423_v38, %v2441_v13 }
0x1543   :  { %v2449_v51 = vmul.f32 %v2445_v54, %v2445_v54 }
0x1545   :  { %v2455_v42 = vsel %vm165_vm0, %v2449_v51, 0.0  ;;  %v2517_v51 = vperm.slane %v2516_v16, 0 }
0x1546   :  { %2456 = vadd.xlane.f32.xlu1 %v2455_v42  ;;  %v2522_v42 = vunpack.c.l.bf16 %v2427_v23 }
0x1569   :  { %v2436_v29 = vpop.xlane.xlu1 %2435 }
0x156a   :  { %v2442_v52 = vmul.f32 %v2436_v29, %v4602_v36 }
0x156c   :  { %v5427_v15 = vsub.f32 %v2424_v33, %v2442_v52 }
0x156e   :  { %v2450_v21 = vmul.f32 %v5427_v15, %v5427_v15 }
0x1570   :  { %v2458_v56 = vsel %vm165_vm0, %v2450_v21, 0.0 }
0x1571   :  { %2459 = vadd.xlane.f32.xlu0 %v2458_v56  ;;  %v2439_v60 = vpop.xlane.xlu1 %2438  ;;  %v2523_v56 = vperm.slane %v2522_v42, 0 }
0x1572   :  { %v2443_v63 = vmul.f32 %v2439_v60, %v4602_v36 }
0x1574   :  { %v5433_v39 = vsub.f32 %v2425_v22, %v2443_v63 }
0x1576   :  { %v2451_v58 = vmul.f32 %v5433_v39, %v5433_v39 }
0x1578   :  { %v2461_v41 = vsel %vm165_vm0, %v2451_v58, 0.0 }
0x1579   :  { %2462 = vadd.xlane.f32.xlu1 %v2461_v41 }
0x15b1   :  { %v2454_v10 = vpop.xlane.xlu0 %2453 }
0x15b2   :  { %v2464_v40 = vmul.f32 %v2454_v10, %v4602_v36 }
0x15b4   :  { %v2468_v14 = vadd.f32 1e-05, %v2464_v40 }
0x15b6   :  { %4009 = vrsqrt.f32 %v2468_v14  ;;  %vm2478_vm5 = vweird.f32 %v2468_v14 }
0x15b9   :  { %v2457_v12 = vpop.xlane.xlu1 %2456 }
0x15ba   :  { %v2465_v45 = vmul.f32 %v2457_v12, %v4602_v36 }
0x15bc   :  { %v4010_v38 = vpop.eup %4009  ;;  %v2469_v25 = vadd.f32 1e-05, %v2465_v45 }
0x15bd   :  { %v2473_v37 = vmul.f32 %v4010_v38, %v2468_v14  ;;  %vm2479_vm4 = vweird.f32 %v4010_v38  ;;  %v2622_v14 = vpack.c.bf16 %v5305_v59, %v5294_v61 }
0x15be   :  { %4011 = vrsqrt.f32 %v2469_v25  ;;  %vm2480_vm7 = vmor %vm2478_vm5, %vm2479_vm4  ;;  %vm2488_vm9 = vweird.f32 %v2469_v25 }
0x15bf   :  { %v2474_v24 = vmul.f32 %v4010_v38, %v2473_v37 }
0x15c1   :  { %v2475_v33 = vmul.f32 0.5, %v2474_v24 }
0x15c3   :  { %v2476_v4 = vsub.f32 1.5, %v2475_v33 }
0x15c4   :  { %v4012_v0 = vpop.eup %4011 }
0x15c5   :  { %v2477_v22 = vmul.f32 %v4010_v38, %v2476_v4  ;;  %v2483_v46 = vmul.f32 %v4012_v0, %v2469_v25  ;;  %vm2489_vm8 = vweird.f32 %v4012_v0 }
0x15c6   :  { %vm2490_vm10 = vmor %vm2488_vm9, %vm2489_vm8 }
0x15c7   :  { %v2484_v47 = vmul.f32 %v4012_v0, %v2483_v46  ;;  %v2481_v28 = vsel %vm2480_vm7, %v4010_v38, %v2477_v22 }
0x15c8   :  { %v2512_v29 = vmul.f32 %v2481_v28, %v2444_v27 }
0x15c9   :  { %v2485_v5 = vmul.f32 0.5, %v2484_v47 }
0x15ca   :  { %v2518_v60 = vmul.f32 %v2517_v51, %v2512_v29 }
0x15cb   :  { %v2486_v13 = vsub.f32 1.5, %v2485_v5 }
0x15cc   :  { %v5440_v41 = vadd.f32 %v2523_v56, %v2518_v60 }
0x15cd   :  { %v2487_v52 = vmul.f32 %v4012_v0, %v2486_v13 }
0x15cf   :  { %v2491_v21 = vsel %vm2490_vm10, %v4012_v0, %v2487_v52 }
0x15d0   :  { %v2513_v63 = vmul.f32 %v2491_v21, %v2445_v54  ;;  %v5451_v54 = vsel %vm165_vm0, %v2622_v14, 0 }
0x15d1   :  { %2655 = vmatpush.bf16.xpose.msrb.mxu2 %v5451_v54  ;;  %2742 = vmatpush.bf16.xpose.msrb.mxu0 %v5451_v54 }
0x15d2   :  { %v2519_v58 = vmul.f32 %v2517_v51, %v2513_v63 }
0x15d4   :  { %v5442_v10 = vadd.f32 %v2523_v56, %v2519_v58 }
0x15d6   :  { %v2532_v3 = vpack.c.bf16 %v5442_v10, %v5440_v41 }
0x15d8   :  { %3661 = vmatmul.msk.bf16.vlgmr.msra.gmra.mxu3 %vm165_vm0, %v2532_v3 }
0x15e4   :  { %v2460_v40 = vpop.xlane.xlu0 %2459 }
0x15e5   :  { %v2466_v27 = vmul.f32 %v2460_v40, %v4602_v36 }
0x15e7   :  { %v2470_v53 = vadd.f32 1e-05, %v2466_v27 }
0x15e9   :  { %4013 = vrsqrt.f32 %v2470_v53  ;;  %vm2498_vm12 = vweird.f32 %v2470_v53 }
0x15ec   :  { %v2463_v12 = vpop.xlane.xlu1 %2462 }
0x15ed   :  { %v2467_v45 = vmul.f32 %v2463_v12, %v4602_v36 }
0x15ef   :  { %v4014_v38 = vpop.eup %4013  ;;  %v2471_v25 = vadd.f32 1e-05, %v2467_v45 }
0x15f0   :  { %v2493_v37 = vmul.f32 %v4014_v38, %v2470_v53  ;;  %vm2499_vm11 = vweird.f32 %v4014_v38 }
0x15f1   :  { %4015 = vrsqrt.f32 %v2471_v25  ;;  %vm2500_vm13 = vmor %vm2498_vm12, %vm2499_vm11  ;;  %vm2508_vm15 = vweird.f32 %v2471_v25 }
0x15f2   :  { %v2494_v24 = vmul.f32 %v4014_v38, %v2493_v37 }
0x15f4   :  { %v2495_v33 = vmul.f32 0.5, %v2494_v24 }
0x15f6   :  { %v2496_v4 = vsub.f32 1.5, %v2495_v33 }
0x15f7   :  { %v4016_v59 = vpop.eup %4015 }
0x15f8   :  { %v2497_v61 = vmul.f32 %v4014_v38, %v2496_v4  ;;  %v2503_v0 = vmul.f32 %v4016_v59, %v2471_v25  ;;  %vm2509_vm14 = vweird.f32 %v4016_v59 }
0x15f9   :  { %vm2510_vm1 = vmor %vm2508_vm15, %vm2509_vm14 }
0x15fa   :  { %v2504_v9 = vmul.f32 %v4016_v59, %v2503_v0  ;;  %v2501_v22 = vsel %vm2500_vm13, %v4014_v38, %v2497_v61 }
0x15fb   :  { %v2514_v16 = vmul.f32 %v2501_v22, %v5427_v15  ;;  %v5767_v15 = vpack.c.bf16 %v5256_v44, %v5244_v43 }
0x15fc   :  { %v2505_v46 = vmul.f32 0.5, %v2504_v9 }
0x15fd   :  { %v2520_v13 = vmul.f32 %v2517_v51, %v2514_v16  ;;  %v5469_v60 = vsel %vm165_vm0, %v5767_v15, 0 }
0x15fe   :  { %v2506_v47 = vsub.f32 1.5, %v2505_v46  ;;  %2656 = vmatpush.bf16.xpose.msrb.mxu2 %v5469_v60  ;;  %2743 = vmatpush.bf16.xpose.msrb.mxu0 %v5469_v60 }
0x15ff   :  { %v5458_v29 = vadd.f32 %v2523_v56, %v2520_v13 }
0x1600   :  { %v2507_v23 = vmul.f32 %v4016_v59, %v2506_v47 }
0x1602   :  { %v2511_v28 = vsel %vm2510_vm1, %v4016_v59, %v2507_v23 }
0x1603   :  { %v2515_v5 = vmul.f32 %v2511_v28, %v5433_v39  ;;  %v2534_v39 = vld [vmem:[#allocation8 + $0x138] sm:$0x1] }
0x1605   :  { %v2521_v42 = vmul.f32 %v2517_v51, %v2515_v5  ;;  %v2535_v51 = vunpack.c.l.bf16 %v2534_v39 }
0x1606   :  { %2891 = vmatpush.bf16.xpose.msra.mxu2 %v5451_v54 }
0x1607   :  { %v5460_v52 = vadd.f32 %v2523_v56, %v2521_v42  ;;  %v2536_v56 = vperm.slane %v2535_v51, 0 }
0x1609   :  { %v2533_v21 = vpack.c.bf16 %v5460_v52, %v5458_v29 }
0x160b   :  { %3662 = vmatmul.msk.bf16.gmra.mxu3 %vm165_vm0, %v2533_v21 }
0x160e   :  { %2892 = vmatpush.bf16.xpose.msra.mxu2 %v5469_v60 }
0x165b   :  { %v2564_v63 = vpop.f32.mrf.mxu3 }
0x165c   :  { %v2565_v58 = vadd.f32 %v2564_v63, %v2536_v56 }
0x165e   :  { %v2617_v3 = vpack.c.bf16 %v2565_v58, %v2565_v58 }
0x1660   :  { %v2627_v43 = vunpack.c.l.bf16 %v2617_v3 }
0x1662   :  { %v2631_v53 = vmul.f32 %v2627_v43, %v4310_v17  ;;  %v2724_v12 = vmul.f32 %v2627_v43, %v4326_v34  ;;  %v2873_v45 = vmul.f32 %v2627_v43, %v4314_v18  ;;  %v5479_v38 = vmul.f32 %v2627_v43, %v4316_v19 }
0x1663   :  { %v2566_v40 = vpop.f32.mrf.mxu3 }
0x1664   :  { %v2567_v27 = vadd.f32 %v2566_v40, %v2536_v56 }
0x1666   :  { %v2618_v44 = vpack.c.bf16 %v2567_v27, %v2567_v27 }
0x1668   :  { %v2628_v14 = vunpack.c.l.bf16 %v2618_v44 }
0x166a   :  { %v2632_v25 = vmul.f32 %v2628_v14, %v4310_v17  ;;  %v2725_v37 = vmul.f32 %v2628_v14, %v4326_v34  ;;  %v2874_v24 = vmul.f32 %v2628_v14, %v4314_v18  ;;  %v5485_v33 = vmul.f32 %v2628_v14, %v4316_v19 }
0x166c   :  { %v2635_v4 = vpack.c.bf16 %v2632_v25, %v2631_v53  ;;  %v2728_v59 = vpack.c.bf16 %v2725_v37, %v2724_v12  ;;  %v2877_v61 = vpack.c.bf16 %v2874_v24, %v2873_v45  ;;  %v2997_v0 = vpack.c.bf16 %v5485_v33, %v5479_v38 }
0x166d   :  { %v5768_v24 = vpack.c.bf16 %v5322_v11, %v5310_v57 }
0x166e   :  { %3673 = vmatmul.msk.bf16.vlgmr.msrb.gmra.mxu2 %vm165_vm0, %v2635_v4  ;;  %3675 = vmatmul.msk.bf16.vlgmr.msrb.gmra.mxu0 %vm165_vm0, %v2728_v59 }
0x168e   :  { %v2569_v9 = vpop.f32.mrf.mxu3 }
0x168f   :  { %v2570_v22 = vadd.f32 %v2569_v9, %v2536_v56 }
0x1691   :  { %v2619_v46 = vpack.c.bf16 %v2570_v22, %v2570_v22 }
0x1693   :  { %v2629_v23 = vunpack.c.l.bf16 %v2619_v46 }
0x1695   :  { %v2633_v13 = vmul.f32 %v2629_v23, %v4310_v17  ;;  %v2726_v42 = vmul.f32 %v2629_v23, %v4326_v34  ;;  %v5496_v39 = vmul.f32 %v2629_v23, %v4316_v19 }
0x1696   :  { %v2571_v47 = vpop.f32.mrf.mxu3 }
0x1697   :  { %v2572_v16 = vadd.f32 %v2571_v47, %v2536_v56 }
0x1699   :  { %v2620_v28 = vpack.c.bf16 %v2572_v16, %v2572_v16 }
0x169b   :  { %v2630_v5 = vunpack.c.l.bf16 %v2620_v28 }
0x169d   :  { %v2634_v21 = vmul.f32 %v2630_v5, %v4310_v17  ;;  %v2727_v15 = vmul.f32 %v2630_v5, %v4326_v34  ;;  %v5499_v51 = vmul.f32 %v2630_v5, %v4316_v19  ;;  %v2876_v17 = vmul.f32 %v2630_v5, %v4314_v18 }
0x169e   :  { %v2875_v34 = vmul.f32 %v2629_v23, %v4314_v18 }
0x169f   :  { %v2636_v63 = vpack.c.bf16 %v2634_v21, %v2633_v13  ;;  %v2729_v58 = vpack.c.bf16 %v2727_v15, %v2726_v42  ;;  %v2998_v56 = vpack.c.bf16 %v5499_v51, %v5496_v39  ;;  %v5769_v21 = vpack.c.bf16 %v5274_v8, %v5265_v62 }
0x16a0   :  { %v2878_v3 = vpack.c.bf16 %v2876_v17, %v2875_v34 }
0x16a1   :  { %3674 = vmatmul.msk.bf16.gmra.mxu2 %vm165_vm0, %v2636_v63  ;;  %3676 = vmatmul.msk.bf16.gmra.mxu0 %vm165_vm0, %v2729_v58 }
0x16b1   :  { %3681 = vmatmul.msk.bf16.vlgmr.msra.gmra.mxu2 %vm165_vm0, %v2877_v61 }
0x16c1   :  { %3682 = vmatmul.msk.bf16.gmra.mxu2 %vm165_vm0, %v2878_v3 }
0x16eb   :  { %v2745_v19 = vpop.f32.mrf.mxu0 }
0x16ec   :  { %v2746_v40 = vadd.f32 %v4320_v20, %v2745_v19 }
0x16ee   :  { %v2755_v27 = vsel %vm165_vm0, %v2746_v40, -inf }
0x16ef   :  { %2756 = vmax.xlane.f32.xlu2 %v2755_v27 }
0x16f1   :  { %v2658_v4 = vpop.f32.mrf.mxu2 }
0x16f3   :  { %v2747_v43 = vpop.f32.mrf.mxu0 }
0x16f4   :  { %v2748_v44 = vadd.f32 %v4320_v20, %v2747_v43 }
0x16f6   :  { %v2758_v14 = vsel %vm165_vm0, %v2748_v44, -inf }
0x16f7   :  { %2759 = vmax.xlane.f32.xlu0 %v2758_v14 }
0x16f9   :  { %v2660_v59 = vpop.f32.mrf.mxu2 }
0x16fa   :  { %v2661_v62 = vadd.f32 %v4320_v20, %v2660_v59 }
0x171e   :  { %v2750_v53 = vpop.f32.mrf.mxu0 }
0x171f   :  { %v2751_v12 = vadd.f32 %v2750_v53, %v4374_v2 }
0x1721   :  { %v2761_v18 = vsel %vm165_vm0, %v2751_v12, -inf }
0x1722   :  { %2762 = vmax.xlane.f32.xlu1 %v2761_v18  ;;  %v2659_v18 = vadd.f32 %v4320_v20, %v2658_v4 }
0x1724   :  { %v2663_v9 = vpop.f32.mrf.mxu2 }
0x1725   :  { %v5522_v47 = vadd.f32 %v2663_v9, %v4374_v2 }
0x1726   :  { %v2752_v45 = vpop.f32.mrf.mxu0 }
0x1727   :  { %v2753_v25 = vadd.f32 %v2752_v45, %v4374_v2  ;;  %v2674_v23 = vsel %vm165_vm0, %v5522_v47, -inf }
0x1729   :  { %v2764_v37 = vsel %vm165_vm0, %v2753_v25, -inf }
0x172a   :  { %2765 = vmax.xlane.f32.xlu2 %v2764_v37  ;;  %v2668_v37 = vsel %vm165_vm0, %v2659_v18, -inf }
0x172c   :  { %v2665_v15 = vpop.f32.mrf.mxu2 }
0x172d   :  { %v2666_v59 = vadd.f32 %v2665_v15, %v4374_v2 }
0x1734   :  { %v2894_v34 = vpop.f32.mrf.mxu2 }
0x1735   :  { %v5546_v9 = vadd.f32 %v4320_v20, %v2894_v34 }
0x1737   :  { %v2904_v4 = vsel %vm165_vm0, %v5546_v9, -inf }
0x1742   :  { %2811 = vrot.lane.b32.xlu2 %v5768_v24, %s4236_s3 }
0x1762   :  { %v2757_v61 = vpop.xlane.xlu2 %2756 }
0x1763   :  { %v2767_v22 = vsub.f32 %v2746_v40, %v2757_v61  ;;  %v2677_v61 = vsel %vm165_vm0, %v2666_v59, -inf }
0x1765   :  { %v2771_v46 = vmul.f32 1.442695, %v2767_v22 }
0x1767   :  { %4017 = vpow2.f32 %v2771_v46  ;;  %v5770_v46 = vpack.c.bf16 %v5325_v48, %v5313_v6 }
0x176a   :  { %v2760_v16 = vpop.xlane.xlu0 %2759 }
0x176b   :  { %v2768_v28 = vsub.f32 %v2748_v44, %v2760_v16  ;;  %2675 = vmax.xlane.f32.xlu2 %v2674_v23  ;;  %v2896_v44 = vpop.f32.mrf.mxu2 }
0x176c   :  { %v5551_v22 = vadd.f32 %v4320_v20, %v2896_v44 }
0x176d   :  { %v4018_v5 = vpop.eup %4017  ;;  %v2773_v13 = vmul.f32 1.442695, %v2768_v28 }
0x176e   :  { %v2779_v57 = vsel %vm165_vm0, %v4018_v5, 0.0  ;;  %v2907_v16 = vsel %vm165_vm0, %v5551_v22, -inf }
0x176f   :  { %4019 = vpow2.f32 %v2773_v13  ;;  %2780 = vadd.xlane.f32.xlu0 %v2779_v57 }
0x1773   :  { %v2899_v45 = vpop.f32.mrf.mxu2 }
0x1775   :  { %v4020_v11 = vpop.eup %4019 }
0x1776   :  { %v2782_v42 = vsel %vm165_vm0, %v4020_v11, 0.0 }
0x1777   :  { %2783 = vadd.xlane.f32.xlu1 %v2782_v42 }
0x177b   :  { %v2901_v23 = vpop.f32.mrf.mxu2 }
0x177c   :  { %v5560_v28 = vadd.f32 %v2901_v23, %v4374_v2 }
0x177e   :  { %v2913_v13 = vsel %vm165_vm0, %v5560_v28, -inf }
0x1783   :  { %2809 = vrot.lane.b32.xlu0 %v5769_v21, %s4236_s3 }
0x1795   :  { %v2763_v63 = vpop.xlane.xlu1 %2762 }
0x1796   :  { %v2769_v58 = vsub.f32 %v2751_v12, %v2763_v63  ;;  %v2671_v12 = vsel %vm165_vm0, %v2661_v62, -inf }
0x1798   :  { %v2775_v17 = vmul.f32 1.442695, %v2769_v58 }
0x179a   :  { %4021 = vpow2.f32 %v2775_v17 }
0x179d   :  { %v2766_v3 = vpop.xlane.xlu2 %2765 }
0x179e   :  { %v2770_v19 = vsub.f32 %v2753_v25, %v2766_v3  ;;  %v5538_v25 = vadd.f32 %v2899_v45, %v4374_v2 }
0x17a0   :  { %v4022_v40 = vpop.eup %4021  ;;  %v2777_v27 = vmul.f32 1.442695, %v2770_v19  ;;  %v2910_v24 = vsel %vm165_vm0, %v5538_v25, -inf }
0x17a1   :  { %v2785_v43 = vsel %vm165_vm0, %v4022_v40, 0.0 }
0x17a2   :  { %4023 = vpow2.f32 %v2777_v27  ;;  %2786 = vadd.xlane.f32.xlu1 %v2785_v43 }
0x17a5   :  { %v2812_v14 = vpop.permute.xlu2 %2811 }
0x17a6   :  { %2827 = vmatpush.bf16.msrb.mxu3 %v2812_v14 }
0x17a8   :  { %v4024_v53 = vpop.eup %4023 }
0x17a9   :  { %v2788_v8 = vsel %vm165_vm0, %v4024_v53, 0.0 }
0x17aa   :  { %2789 = vadd.xlane.f32.xlu1 %v2788_v8 }
0x17ad   :  { %2672 = vmax.xlane.f32.xlu0 %v2671_v12 }
0x17b2   :  { %2669 = vmax.xlane.f32.xlu1 %v2668_v37 }
0x17b5   :  { %2911 = vmax.xlane.f32.xlu0 %v2910_v24 }
0x17ba   :  { %2678 = vmax.xlane.f32.xlu1 %v2677_v61 }
0x17c2   :  { %2905 = vmax.xlane.f32.xlu1 %v2904_v4 }
0x17c9   :  { %2844 = vrot.lane.b32.xlu0 %v5770_v46, %s4236_s3 }
0x17ca   :  { %2908 = vmax.xlane.f32.xlu1 %v2907_v16 }
0x17d2   :  { %2914 = vmax.xlane.f32.xlu1 %v2913_v13 }
0x17de   :  { %v2676_v3 = vpop.xlane.xlu2 %2675 }
0x17e2   :  { %v2781_v57 = vpop.xlane.xlu0 %2780 }
0x17ea   :  { %v2784_v42 = vpop.xlane.xlu1 %2783 }
0x17eb   :  { %4025 = vrcp.f32 %v2784_v42 }
0x17ec   :  { %4027 = vrcp.f32 %v2781_v57 }
0x17f1   :  { %v4026_v21 = vpop.eup %4025 }
0x17f2   :  { %v4028_v15 = vpop.eup %4027  ;;  %v2796_v6 = vmul.f32 %v4026_v21, %v4020_v11  ;;  %v2682_v11 = vsub.f32 %v5522_v47, %v2676_v3 }
0x17f3   :  { %v2795_v48 = vmul.f32 %v4028_v15, %v4018_v5 }
0x17f4   :  { %v2688_v45 = vmul.f32 1.442695, %v2682_v11 }
0x17f5   :  { %v2810_v63 = vpop.permute.xlu0 %2809  ;;  %v2799_v58 = vpack.c.bf16 %v2796_v6, %v2795_v48 }
0x17f6   :  { %2828 = vmatpush.bf16.msrb.mxu3 %v2810_v63 }
0x17f9   :  { %3677 = vmatmul.msk.bf16.vlgmr.msrb.gmra.mxu3 %vm165_vm0, %v2799_v58 }
0x17fa   :  { %3011 = vmatpush.bf16.xpose.msra.mxu3 %v5451_v54 }
0x1802   :  { %3012 = vmatpush.bf16.xpose.msra.mxu3 %v5469_v60 }
0x1815   :  { %v2787_v17 = vpop.xlane.xlu1 %2786 }
0x1816   :  { %4029 = vrcp.f32 %v2787_v17 }
0x181c   :  { %v4030_v43 = vpop.eup %4029 }
0x181d   :  { %v2790_v34 = vpop.xlane.xlu1 %2789  ;;  %v2797_v14 = vmul.f32 %v4030_v43, %v4022_v40 }
0x181e   :  { %4031 = vrcp.f32 %v2790_v34 }
0x1820   :  { %v2673_v19 = vpop.xlane.xlu0 %2672 }
0x1821   :  { %v2681_v27 = vsub.f32 %v2661_v62, %v2673_v19 }
0x1823   :  { %v2686_v5 = vmul.f32 1.442695, %v2681_v27 }
0x1824   :  { %v4032_v44 = vpop.eup %4031 }
0x1825   :  { %v2798_v8 = vmul.f32 %v4032_v44, %v4024_v53  ;;  %4033 = vpow2.f32 %v2686_v5  ;;  %v2670_v54 = vpop.xlane.xlu1 %2669 }
0x1826   :  { %v2680_v12 = vsub.f32 %v2659_v18, %v2670_v54 }
0x1827   :  { %v2800_v37 = vpack.c.bf16 %v2798_v8, %v2797_v14 }
0x1828   :  { %v2684_v60 = vmul.f32 1.442695, %v2680_v12  ;;  %v5577_v46 = vpop.xlane.xlu0 %2911 }
0x1829   :  { %3678 = vmatmul.msk.bf16.gmra.mxu3 %vm165_vm0, %v2800_v37 }
0x182a   :  { %4035 = vpow2.f32 %v2684_v60 }
0x182b   :  { %v5569_v24 = vpop.eup %4033  ;;  %4037 = vpow2.f32 %v2688_v45 }
0x182c   :  { %v2695_v62 = vsel %vm165_vm0, %v5569_v24, 0.0 }
0x182d   :  { %v2679_v47 = vpop.xlane.xlu1 %2678  ;;  %2696 = vadd.xlane.f32.xlu2 %v2695_v62 }
0x182e   :  { %v2683_v61 = vsub.f32 %v2666_v59, %v2679_v47 }
0x1830   :  { %v5573_v40 = vpop.eup %4035  ;;  %v2690_v53 = vmul.f32 1.442695, %v2683_v61  ;;  %v5773_v61 = vpack.c.bf16 %v5277_v50, %v5268_v7  ;;  %v2918_v7 = vsub.f32 %v5538_v25, %v5577_v46 }
0x1831   :  { %v4038_v4 = vpop.eup %4037  ;;  %v2692_v18 = vsel %vm165_vm0, %v5573_v40, 0.0 }
0x1832   :  { %2693 = vadd.xlane.f32.xlu1 %v2692_v18  ;;  %4039 = vpow2.f32 %v2690_v53  ;;  %v2698_v16 = vsel %vm165_vm0, %v4038_v4, 0.0 }
0x1835   :  { %v2906_v23 = vpop.xlane.xlu1 %2905  ;;  %2699 = vadd.xlane.f32.xlu2 %v2698_v16 }
0x1836   :  { %v2916_v13 = vsub.f32 %v5546_v9, %v2906_v23 }
0x1838   :  { %v2920_v57 = vmul.f32 1.442695, %v2916_v13  ;;  %v4040_v42 = vpop.eup %4039 }
0x1839   :  { %3685 = vmatmul.msk.bf16.vlgmr.msra.gmra.mxu3 %vm165_vm0, %v2997_v0  ;;  %v2701_v21 = vsel %vm165_vm0, %v4040_v42, 0.0  ;;  %v5771_v0 = vpack.c.bf16 %v5328_v55, %v5316_v31 }
0x183a   :  { %4041 = vpow2.f32 %v2920_v57 }
0x183b   :  { %v2845_v59 = vpop.permute.xlu0 %2844 }
0x183c   :  { %2860 = vmatpush.bf16.msra.mxu1 %v2845_v59 }
0x183d   :  { %v2909_v15 = vpop.xlane.xlu1 %2908  ;;  %2702 = vadd.xlane.f32.xlu2 %v2701_v21 }
0x183e   :  { %v2917_v6 = vsub.f32 %v5551_v22, %v2909_v15  ;;  %v5772_v22 = vpack.c.bf16 %v5331_v30, %v5319_v32 }
0x1840   :  { %v2922_v48 = vmul.f32 1.442695, %v2917_v6  ;;  %v5587_v63 = vpop.eup %4041 }
0x1841   :  { %v2928_v9 = vsel %vm165_vm0, %v5587_v63, 0.0 }
0x1842   :  { %4043 = vpow2.f32 %v2922_v48 }
0x1845   :  { %2929 = vadd.xlane.f32.xlu2 %v2928_v9  ;;  %v2915_v53 = vpop.xlane.xlu1 %2914 }
0x1848   :  { %v5591_v38 = vpop.eup %4043 }
0x1849   :  { %3686 = vmatmul.msk.bf16.gmra.mxu3 %vm165_vm0, %v2998_v56  ;;  %v2931_v33 = vsel %vm165_vm0, %v5591_v38, 0.0 }
0x184a   :  { %2932 = vadd.xlane.f32.xlu0 %v2931_v33 }
0x185d   :  { %2960 = vrot.lane.b32.xlu2 %v5771_v0, %s4236_s3 }
0x1865   :  { %3080 = vrot.lane.b32.xlu2 %v5772_v22, %s4236_s3 }
0x187c   :  { %v5607_v58 = vpop.f32.mrf.mxu3 }
0x1884   :  { %v5609_v39 = vpop.f32.mrf.mxu3 }
0x18a0   :  { %v2697_v17 = vpop.xlane.xlu2 %2696 }
0x18a8   :  { %v2700_v51 = vpop.xlane.xlu2 %2699 }
0x18a9   :  { %4045 = vrcp.f32 %v2700_v51 }
0x18ac   :  { %v5611_v56 = vpop.f32.mrf.mxu3 }
0x18af   :  { %v4046_v31 = vpop.eup %4045 }
0x18b0   :  { %v2703_v34 = vpop.xlane.xlu2 %2702  ;;  %v5615_v19 = vmul.f32 %v4046_v31, %v4038_v4  ;;  %v2694_v4 = vpop.xlane.xlu1 %2693 }
0x18b1   :  { %4047 = vrcp.f32 %v2703_v34 }
0x18b4   :  { %v5613_v3 = vpop.f32.mrf.mxu3 }
0x18b7   :  { %v4048_v55 = vpop.eup %4047 }
0x18b8   :  { %v5617_v27 = vmul.f32 %v4048_v55, %v4040_v42  ;;  %v5619_v32 = vpop.xlane.xlu2 %2929 }
0x18ba   :  { %v2713_v30 = vpack.c.bf16 %v5617_v27, %v5615_v19 }
0x18bc   :  { %v3014_v43 = vpop.f32.mrf.mxu3 }
0x18bd   :  { %v3015_v11 = vadd.f32 %v4320_v20, %v3014_v43 }
0x18bf   :  { %v3024_v5 = vsel %vm165_vm0, %v3015_v11, -inf }
0x18c0   :  { %3025 = vmax.xlane.f32.xlu1 %v3024_v5  ;;  %v2961_v44 = vpop.permute.xlu2 %2960 }
0x18c1   :  { %2976 = vmatpush.bf16.msra.mxu0 %v2961_v44 }
0x18c4   :  { %v3016_v14 = vpop.f32.mrf.mxu3 }
0x18c5   :  { %v3017_v8 = vadd.f32 %v4320_v20, %v3016_v14  ;;  %v5774_v20 = vpack.c.bf16 %v5280_v35, %v5271_v49  ;;  %v2924_v49 = vmul.f32 1.442695, %v2918_v7  ;;  %v2933_v35 = vpop.xlane.xlu0 %2932 }
0x18c7   :  { %v3027_v54 = vsel %vm165_vm0, %v3017_v8, -inf }
0x18c8   :  { %3028 = vmax.xlane.f32.xlu1 %v3027_v54  ;;  %v3081_v13 = vpop.permute.xlu2 %3080 }
0x18cc   :  { %v3019_v12 = vpop.f32.mrf.mxu3 }
0x18cd   :  { %v3020_v45 = vadd.f32 %v3019_v12, %v4374_v2 }
0x18cf   :  { %v3030_v37 = vsel %vm165_vm0, %v3020_v45, -inf }
0x18d0   :  { %3031 = vmax.xlane.f32.xlu2 %v3030_v37 }
0x18d4   :  { %v3021_v60 = vpop.f32.mrf.mxu3 }
0x18d5   :  { %v3022_v62 = vadd.f32 %v3021_v60, %v4374_v2 }
0x18d7   :  { %v3033_v47 = vsel %vm165_vm0, %v3022_v62, -inf }
0x18d8   :  { %3034 = vmax.xlane.f32.xlu0 %v3033_v47 }
0x18e1   :  { %2842 = vrot.lane.b32.xlu1 %v5773_v61, %s4236_s3 }
0x18ec   :  { %2958 = vrot.lane.b32.xlu0 %v5774_v20, %s4236_s3 }
0x1933   :  { %v3026_v18 = vpop.xlane.xlu1 %3025 }
0x1934   :  { %v3036_v16 = vsub.f32 %v3015_v11, %v3026_v18 }
0x1936   :  { %v3040_v23 = vmul.f32 1.442695, %v3036_v16 }
0x1938   :  { %4049 = vpow2.f32 %v3040_v23 }
0x193b   :  { %v3029_v2 = vpop.xlane.xlu1 %3028 }
0x193c   :  { %v3037_v57 = vsub.f32 %v3017_v8, %v3029_v2 }
0x193e   :  { %v5639_v42 = vpop.eup %4049  ;;  %v3042_v50 = vmul.f32 1.442695, %v3037_v57 }
0x193f   :  { %v3048_v59 = vsel %vm165_vm0, %v5639_v42, 0.0 }
0x1940   :  { %4051 = vpow2.f32 %v3042_v50  ;;  %3049 = vadd.xlane.f32.xlu2 %v3048_v59 }
0x1941   :  { %4053 = vpow2.f32 %v2924_v49 }
0x1942   :  { %4055 = vrcp.f32 %v2694_v4 }
0x1943   :  { %v3032_v21 = vpop.xlane.xlu2 %3031  ;;  %4057 = vrcp.f32 %v2697_v17 }
0x1944   :  { %v3038_v6 = vsub.f32 %v3020_v45, %v3032_v21 }
0x1946   :  { %v4052_v15 = vpop.eup %4051  ;;  %v3044_v9 = vmul.f32 1.442695, %v3038_v6 }
0x1947   :  { %v3051_v48 = vsel %vm165_vm0, %v4052_v15, 0.0  ;;  %v5646_v25 = vpop.eup %4053 }
0x1948   :  { %3052 = vadd.xlane.f32.xlu1 %v3051_v48  ;;  %v4056_v0 = vpop.eup %4055  ;;  %4059 = vpow2.f32 %v3044_v9  ;;  %v2934_v51 = vsel %vm165_vm0, %v5646_v25, 0.0 }
0x1949   :  { %v4058_v34 = vpop.eup %4057  ;;  %v2708_v31 = vmul.f32 %v4056_v0, %v5573_v40  ;;  %v5775_v40 = vpack.c.bf16 %v5283_v1, %v5286_v26  ;;  %v2919_v1 = vsub.f32 %v5560_v28, %v2915_v53 }
0x194a   :  { %v2709_v55 = vmul.f32 %v4058_v34, %v5569_v24 }
0x194b   :  { %v3035_v33 = vpop.xlane.xlu0 %3034  ;;  %v2926_v26 = vmul.f32 1.442695, %v2919_v1 }
0x194c   :  { %v3039_v46 = vsub.f32 %v3022_v62, %v3035_v33  ;;  %v2712_v11 = vpack.c.bf16 %v2709_v55, %v2708_v31 }
0x194e   :  { %v3046_v22 = vmul.f32 1.442695, %v3039_v46  ;;  %v4060_v43 = vpop.eup %4059 }
0x194f   :  { %v3054_v24 = vsel %vm165_vm0, %v4060_v43, 0.0 }
0x1950   :  { %4061 = vpow2.f32 %v3046_v22  ;;  %2935 = vadd.xlane.f32.xlu1 %v2934_v51 }
0x1951   :  { %4063 = vrcp.f32 %v2933_v35  ;;  %v3756_v35 = vld [vmem:[#allocation8 + $0x160] sm:$0xff] }
0x1952   :  { %4065 = vrcp.f32 %v5619_v32  ;;  %3141 = vmatpush.bf16.msrb.mxu2 %v3756_v35 }
0x1953   :  { %v2843_v17 = vpop.permute.xlu1 %2842  ;;  %4067 = vpow2.f32 %v2926_v26 }
0x1954   :  { %2861 = vmatpush.bf16.msra.mxu1 %v2843_v17 }
0x1956   :  { %v4062_v5 = vpop.eup %4061 }
0x1957   :  { %3679 = vmatmul.msk.bf16.vlgmr.msra.gmra.mxu1 %vm165_vm0, %v2712_v11  ;;  %v3057_v44 = vsel %vm165_vm0, %v4062_v5, 0.0  ;;  %v4064_v14 = vpop.eup %4063 }
0x1958   :  { %3096 = vmatpush.bf16.msrb.mxu1 %v3081_v13  ;;  %3058 = vadd.xlane.f32.xlu0 %v3057_v44  ;;  %v4066_v8 = vpop.eup %4065  ;;  %v2945_v54 = vmul.f32 %v4064_v14, %v5591_v38 }
0x1959   :  { %3078 = vrot.lane.b32.xlu2 %v5775_v40, %s4236_s3  ;;  %3055 = vadd.xlane.f32.xlu1 %v3054_v24  ;;  %v2944_v32 = vmul.f32 %v4066_v8, %v5587_v63  ;;  %v4068_v37 = vpop.eup %4067 }
0x195a   :  { %v2937_v60 = vsel %vm165_vm0, %v4068_v37, 0.0 }
0x195b   :  { %v2948_v45 = vpack.c.bf16 %v2945_v54, %v2944_v32  ;;  %v2616_v32 = vld [vmem:[#allocation8 + $0x168] sm:$0x1] }
0x195e   :  { %v2959_v12 = vpop.permute.xlu0 %2958 }
0x195f   :  { %2977 = vmatpush.bf16.msra.mxu0 %v2959_v12  ;;  %v3115_v12 = vunpack.c.l.bf16 %v2616_v32 }
0x1962   :  { %3683 = vmatmul.msk.bf16.vlgmr.msra.gmra.mxu0 %vm165_vm0, %v2948_v45  ;;  %v3116_v45 = vperm.slane %v3115_v12, 0 }
0x1967   :  { %3680 = vmatmul.msk.bf16.gmra.mxu1 %vm165_vm0, %v2713_v30 }
0x1982   :  { %2938 = vadd.xlane.f32.xlu2 %v2937_v60 }
0x19b3   :  { %v3050_v38 = vpop.xlane.xlu2 %3049 }
0x19b4   :  { %4069 = vrcp.f32 %v3050_v38 }
0x19ba   :  { %v4070_v47 = vpop.eup %4069 }
0x19bb   :  { %v3053_v63 = vpop.xlane.xlu1 %3052  ;;  %v3079_v62 = vpop.permute.xlu2 %3078  ;;  %v3064_v19 = vmul.f32 %v4070_v47, %v5639_v42 }
0x19bc   :  { %4071 = vrcp.f32 %v3053_v63  ;;  %3097 = vmatpush.bf16.msrb.mxu1 %v3079_v62 }
0x19c2   :  { %v4072_v61 = vpop.eup %4071 }
0x19c3   :  { %v3065_v27 = vmul.f32 %v4072_v61, %v4052_v15  ;;  %v2936_v30 = vpop.xlane.xlu1 %2935  ;;  %v3755_v15 = vld [vmem:[#allocation8 + $0x158] sm:$0xff] }
0x19c4   :  { %3142 = vmatpush.bf16.msrb.mxu2 %v3755_v15 }
0x19c5   :  { %v3068_v20 = vpack.c.bf16 %v3065_v27, %v3064_v19 }
0x19c7   :  { %3687 = vmatmul.msk.bf16.vlgmr.msrb.gmra.mxu1 %vm165_vm0, %v3068_v20 }
0x19cb   :  { %v3059_v28 = vpop.xlane.xlu0 %3058 }
0x19cc   :  { %4073 = vrcp.f32 %v3059_v28  ;;  %v3056_v53 = vpop.xlane.xlu1 %3055 }
0x19cd   :  { %4075 = vrcp.f32 %v3056_v53 }
0x19ce   :  { %4077 = vrcp.f32 %v2936_v30 }
0x19d2   :  { %v4074_v4 = vpop.eup %4073 }
0x19d3   :  { %v4076_v18 = vpop.eup %4075  ;;  %v3067_v16 = vmul.f32 %v4074_v4, %v4062_v5 }
0x19d4   :  { %v3066_v23 = vmul.f32 %v4076_v18, %v4060_v43  ;;  %v4078_v57 = vpop.eup %4077  ;;  %v2863_v49 = vpop.f32.mrf.mxu1 }
0x19d5   :  { %v2946_v7 = vmul.f32 %v4078_v57, %v5646_v25  ;;  %v2864_v0 = vadd.f32 %v2863_v49, %v5607_v58 }
0x19d6   :  { %v3069_v2 = vpack.c.bf16 %v3067_v16, %v3066_v23 }
0x19d8   :  { %3688 = vmatmul.msk.bf16.gmra.mxu1 %vm165_vm0, %v3069_v2 }
0x19dc   :  { %v2865_v21 = vpop.f32.mrf.mxu1 }
0x19dd   :  { %v2866_v22 = vadd.f32 %v2865_v21, %v5609_v39 }
0x19df   :  { %v2979_v9 = vpop.f32.mrf.mxu0 }
0x19e0   :  { %v2989_v25 = vadd.f32 %v2979_v9, %v2864_v0 }
0x19e4   :  { %v2868_v6 = vpop.f32.mrf.mxu1 }
0x19e5   :  { %v2869_v5 = vadd.f32 %v2868_v6, %v5611_v56 }
0x19e7   :  { %v2981_v46 = vpop.f32.mrf.mxu0 }
0x19e8   :  { %v2990_v51 = vadd.f32 %v2981_v46, %v2866_v22  ;;  %v3757_v46 = vld [vmem:[#allocation8 + $0x180] sm:$0xff] }
0x19ec   :  { %v2870_v48 = vpop.f32.mrf.mxu1 }
0x19ed   :  { %v2871_v44 = vadd.f32 %v2870_v48, %v5613_v3  ;;  %v3758_v48 = vld [vmem:[#allocation8 + $0x188] sm:$0xff] }
0x19ee   :  { %3293 = vmatpush.bf16.msrb.mxu0 %v3758_v48  ;;  %v3762_v48 = vld [vmem:[#allocation8 + $0x1b0] sm:$0xff] }
0x19ef   :  { %3357 = vmatpush.bf16.msrb.mxu3 %v3762_v48 }
0x19f2   :  { %3294 = vmatpush.bf16.msrb.mxu0 %v3757_v46  ;;  %v3266_v46 = vld [vmem:[#allocation8 + $0x190] sm:$0x1] }
0x19f5   :  { %v2939_v13 = vpop.xlane.xlu2 %2938 }
0x19f6   :  { %4079 = vrcp.f32 %v2939_v13 }
0x19fc   :  { %v4080_v42 = vpop.eup %4079 }
0x19fd   :  { %v2947_v50 = vmul.f32 %v4080_v42, %v4068_v37 }
0x19ff   :  { %v2949_v59 = vpack.c.bf16 %v2947_v50, %v2946_v7 }
0x1a01   :  { %3684 = vmatmul.msk.bf16.gmra.mxu0 %vm165_vm0, %v2949_v59 }
0x1a44   :  { %v3099_v33 = vpop.f32.mrf.mxu1 }
0x1a45   :  { %v3109_v31 = vadd.f32 %v3099_v33, %v2989_v25 }
0x1a4c   :  { %v3101_v34 = vpop.f32.mrf.mxu1 }
0x1a4d   :  { %v3110_v55 = vadd.f32 %v3101_v34, %v2990_v51 }
0x1a4f   :  { %v3113_v17 = vpack.c.bf16 %v3110_v55, %v3109_v31 }
0x1a51   :  { %3697 = vmatmul.msk.bf16.vlgmr.msrb.gmra.mxu2 %vm165_vm0, %v3113_v17 }
0x1a55   :  { %v3104_v43 = vpop.f32.mrf.mxu1 }
0x1a5d   :  { %v3106_v58 = vpop.f32.mrf.mxu1 }
0x1a7e   :  { %v2984_v11 = vpop.f32.mrf.mxu0 }
0x1a7f   :  { %v2991_v40 = vadd.f32 %v2984_v11, %v2869_v5  ;;  %v3158_v11 = vld [vmem:[#allocation8 + $0x170] sm:$0x1] }
0x1a81   :  { %v3111_v8 = vadd.f32 %v3104_v43, %v2991_v40 }
0x1a86   :  { %v2986_v24 = vpop.f32.mrf.mxu0 }
0x1a87   :  { %v2992_v14 = vadd.f32 %v2986_v24, %v2871_v44  ;;  %v3248_v24 = vunpack.c.l.bf16 %v3158_v11 }
0x1a89   :  { %v3112_v39 = vadd.f32 %v3106_v58, %v2992_v14  ;;  %v3159_v14 = vld [vmem:[#allocation8 + $0x178] sm:$0x1] }
0x1a8a   :  { %v3254_v32 = vunpack.c.l.bf16 %v3159_v14 }
0x1a8b   :  { %v3114_v54 = vpack.c.bf16 %v3112_v39, %v3111_v8 }
0x1a8d   :  { %3698 = vmatmul.msk.bf16.gmra.mxu2 %vm165_vm0, %v3114_v54  ;;  %v3249_v54 = vperm.slane %v3248_v24, 0 }
0x1ad4   :  { %v3144_v1 = vpop.f32.mrf.mxu2 }
0x1ad5   :  { %v3145_v26 = vadd.f32 %v3144_v1, %v3116_v45 }
0x1ad7   :  { %v3154_v37 = vadd.f32 %v3145_v26, %v5440_v41  ;;  %v3255_v26 = vperm.slane %v3254_v32, 0 }
0x1ad9   :  { %v3160_v56 = vsel %vm165_vm0, %v3154_v37, 0.0 }
0x1ada   :  { %3161 = vadd.xlane.f32.xlu1 %v3160_v56 }
0x1adc   :  { %v3146_v3 = vpop.f32.mrf.mxu2 }
0x1add   :  { %v3147_v60 = vadd.f32 %v3146_v3, %v3116_v45 }
0x1adf   :  { %v3155_v38 = vadd.f32 %v3147_v60, %v5442_v10 }
0x1ae1   :  { %v3163_v63 = vsel %vm165_vm0, %v3155_v38, 0.0 }
0x1ae2   :  { %3164 = vadd.xlane.f32.xlu1 %v3163_v63 }
0x1b10   :  { %v3149_v62 = vpop.f32.mrf.mxu2 }
0x1b11   :  { %v3150_v47 = vadd.f32 %v3149_v62, %v3116_v45 }
0x1b13   :  { %v3156_v61 = vadd.f32 %v3150_v47, %v5458_v29 }
0x1b15   :  { %v3166_v19 = vsel %vm165_vm0, %v3156_v61, 0.0 }
0x1b16   :  { %3167 = vadd.xlane.f32.xlu1 %v3166_v19 }
0x1b18   :  { %v3151_v27 = vpop.f32.mrf.mxu2 }
0x1b19   :  { %v3152_v30 = vadd.f32 %v3151_v27, %v3116_v45 }
0x1b1b   :  { %v3157_v41 = vadd.f32 %v3152_v30, %v5460_v52 }
0x1b1d   :  { %v3169_v20 = vsel %vm165_vm0, %v3157_v41, 0.0 }
0x1b1e   :  { %3170 = vadd.xlane.f32.xlu1 %v3169_v20 }
0x1b4d   :  { %v3162_v28 = vpop.xlane.xlu1 %3161 }
0x1b4e   :  { %v3172_v10 = vmul.f32 %v3162_v28, %v4602_v36 }
0x1b50   :  { %v3176_v53 = vsub.f32 %v3154_v37, %v3172_v10 }
0x1b52   :  { %v3180_v4 = vmul.f32 %v3176_v53, %v3176_v53 }
0x1b54   :  { %v3184_v18 = vsel %vm165_vm0, %v3180_v4, 0.0 }
0x1b55   :  { %3185 = vadd.xlane.f32.xlu2 %v3184_v18  ;;  %v3165_v16 = vpop.xlane.xlu1 %3164 }
0x1b56   :  { %v3173_v29 = vmul.f32 %v3165_v16, %v4602_v36 }
0x1b58   :  { %v3177_v23 = vsub.f32 %v3155_v38, %v3173_v29 }
0x1b5a   :  { %v3181_v2 = vmul.f32 %v3177_v23, %v3177_v23 }
0x1b5c   :  { %v3187_v13 = vsel %vm165_vm0, %v3181_v2, 0.0 }
0x1b5d   :  { %3188 = vadd.xlane.f32.xlu1 %v3187_v13 }
0x1b89   :  { %v3168_v52 = vpop.xlane.xlu1 %3167 }
0x1b8a   :  { %v3174_v57 = vmul.f32 %v3168_v52, %v4602_v36 }
0x1b8c   :  { %v5693_v42 = vsub.f32 %v3156_v61, %v3174_v57 }
0x1b8e   :  { %v3182_v7 = vmul.f32 %v5693_v42, %v5693_v42 }
0x1b90   :  { %v3190_v50 = vsel %vm165_vm0, %v3182_v7, 0.0 }
0x1b91   :  { %3191 = vadd.xlane.f32.xlu2 %v3190_v50  ;;  %v3171_v59 = vpop.xlane.xlu1 %3170 }
0x1b92   :  { %v3175_v49 = vmul.f32 %v3171_v59, %v4602_v36 }
0x1b94   :  { %v5699_v35 = vsub.f32 %v3157_v41, %v3175_v49 }
0x1b96   :  { %v3183_v21 = vmul.f32 %v5699_v35, %v5699_v35 }
0x1b98   :  { %v3193_v15 = vsel %vm165_vm0, %v3183_v21, 0.0 }
0x1b99   :  { %3194 = vadd.xlane.f32.xlu0 %v3193_v15 }
0x1bc8   :  { %v3186_v6 = vpop.xlane.xlu2 %3185 }
0x1bc9   :  { %v3196_v9 = vmul.f32 %v3186_v6, %v4602_v36 }
0x1bcb   :  { %v3200_v33 = vadd.f32 1e-05, %v3196_v9  ;;  %v3761_v9 = vld [vmem:[#allocation8 + $0x1a8] sm:$0xff] }
0x1bcc   :  { %3358 = vmatpush.bf16.msrb.mxu3 %v3761_v9 }
0x1bcd   :  { %4081 = vrsqrt.f32 %v3200_v33  ;;  %vm3210_vm3 = vweird.f32 %v3200_v33 }
0x1bd0   :  { %v3189_v0 = vpop.xlane.xlu1 %3188 }
0x1bd1   :  { %v3197_v22 = vmul.f32 %v3189_v0, %v4602_v36  ;;  %v3267_v0 = vunpack.c.l.bf16 %v3266_v46 }
0x1bd3   :  { %v4082_v25 = vpop.eup %4081  ;;  %v3201_v51 = vadd.f32 1e-05, %v3197_v22 }
0x1bd4   :  { %v3205_v34 = vmul.f32 %v4082_v25, %v3200_v33  ;;  %vm3211_vm2 = vweird.f32 %v4082_v25  ;;  %v3760_v33 = vld [vmem:[#allocation8 + $0x1a0] sm:$0xff] }
0x1bd5   :  { %4083 = vrsqrt.f32 %v3201_v51  ;;  %vm3212_vm4 = vmor %vm3210_vm3, %vm3211_vm2  ;;  %vm3220_vm7 = vweird.f32 %v3201_v51  ;;  %3359 = vmatpush.bf16.msrb.mxu3 %v3760_v33 }
0x1bd6   :  { %v3206_v31 = vmul.f32 %v4082_v25, %v3205_v34 }
0x1bd8   :  { %v3207_v55 = vmul.f32 0.5, %v3206_v31 }
0x1bda   :  { %v3208_v17 = vsub.f32 1.5, %v3207_v55 }
0x1bdb   :  { %v4084_v43 = vpop.eup %4083 }
0x1bdc   :  { %v3209_v5 = vmul.f32 %v4082_v25, %v3208_v17  ;;  %v3215_v44 = vmul.f32 %v4084_v43, %v3201_v51  ;;  %vm3221_vm5 = vweird.f32 %v4084_v43 }
0x1bdd   :  { %vm3222_vm8 = vmor %vm3220_vm7, %vm3221_vm5 }
0x1bde   :  { %v3216_v40 = vmul.f32 %v4084_v43, %v3215_v44  ;;  %v3213_v58 = vsel %vm3212_vm4, %v4082_v25, %v3209_v5  ;;  %v3268_v25 = vperm.slane %v3267_v0, 0  ;;  %v3376_v0 = vld [vmem:[#allocation8 + $0x1c0] sm:$0x1] }
0x1bdf   :  { %v3244_v12 = vmul.f32 %v3213_v58, %v3176_v53  ;;  %v3320_v58 = vld [vmem:[#allocation8 + $0x1b8] sm:$0x1] }
0x1be0   :  { %v3217_v8 = vmul.f32 0.5, %v3216_v40 }
0x1be1   :  { %v3250_v37 = vmul.f32 %v3249_v54, %v3244_v12 }
0x1be2   :  { %v3218_v39 = vsub.f32 1.5, %v3217_v8  ;;  %v3321_v8 = vunpack.c.l.bf16 %v3320_v58 }
0x1be3   :  { %v5706_v60 = vadd.f32 %v3255_v26, %v3250_v37 }
0x1be4   :  { %v3219_v45 = vmul.f32 %v4084_v43, %v3218_v39  ;;  %v3322_v39 = vperm.slane %v3321_v8, 0 }
0x1be6   :  { %v3223_v1 = vsel %vm3222_vm8, %v4084_v43, %v3219_v45 }
0x1be7   :  { %v3245_v56 = vmul.f32 %v3223_v1, %v3177_v23 }
0x1be9   :  { %v3251_v3 = vmul.f32 %v3249_v54, %v3245_v56 }
0x1beb   :  { %v5708_v38 = vadd.f32 %v3255_v26, %v3251_v3 }
0x1bed   :  { %v3264_v63 = vpack.c.bf16 %v5708_v38, %v5706_v60 }
0x1bef   :  { %3707 = vmatmul.msk.bf16.vlgmr.msrb.gmra.mxu0 %vm165_vm0, %v3264_v63 }
0x1c04   :  { %v3192_v62 = vpop.xlane.xlu2 %3191 }
0x1c05   :  { %v3198_v47 = vmul.f32 %v3192_v62, %v4602_v36 }
0x1c07   :  { %v3202_v61 = vadd.f32 1e-05, %v3198_v47 }
0x1c09   :  { %4085 = vrsqrt.f32 %v3202_v61  ;;  %vm3230_vm10 = vweird.f32 %v3202_v61 }
0x1c0c   :  { %v3195_v19 = vpop.xlane.xlu0 %3194 }
0x1c0d   :  { %v3199_v27 = vmul.f32 %v3195_v19, %v4602_v36 }
0x1c0f   :  { %v4086_v30 = vpop.eup %4085  ;;  %v3203_v41 = vadd.f32 1e-05, %v3199_v27 }
0x1c10   :  { %v3225_v20 = vmul.f32 %v4086_v30, %v3202_v61  ;;  %vm3231_vm9 = vweird.f32 %v4086_v30 }
0x1c11   :  { %4087 = vrsqrt.f32 %v3203_v41  ;;  %vm3232_vm11 = vmor %vm3230_vm10, %vm3231_vm9  ;;  %vm3240_vm13 = vweird.f32 %v3203_v41 }
0x1c12   :  { %v3226_v28 = vmul.f32 %v4086_v30, %v3225_v20 }
0x1c14   :  { %v3227_v10 = vmul.f32 0.5, %v3226_v28 }
0x1c16   :  { %v3228_v53 = vsub.f32 1.5, %v3227_v10 }
0x1c17   :  { %v4088_v4 = vpop.eup %4087 }
0x1c18   :  { %v3229_v18 = vmul.f32 %v4086_v30, %v3228_v53  ;;  %v3235_v16 = vmul.f32 %v4088_v4, %v3203_v41  ;;  %vm3241_vm12 = vweird.f32 %v4088_v4 }
0x1c19   :  { %vm3242_vm14 = vmor %vm3240_vm13, %vm3241_vm12 }
0x1c1a   :  { %v3236_v29 = vmul.f32 %v4088_v4, %v3235_v16  ;;  %v3233_v23 = vsel %vm3232_vm11, %v4086_v30, %v3229_v18 }
0x1c1b   :  { %v3246_v52 = vmul.f32 %v3233_v23, %v5693_v42  ;;  %v3759_v42 = vld [vmem:[#allocation8 + $0x198] sm:$0xff] }
0x1c1c   :  { %v3237_v2 = vmul.f32 0.5, %v3236_v29  ;;  %3360 = vmatpush.bf16.msrb.mxu3 %v3759_v42 }
0x1c1d   :  { %v3252_v59 = vmul.f32 %v3249_v54, %v3246_v52 }
0x1c1e   :  { %v3238_v13 = vsub.f32 1.5, %v3237_v2 }
0x1c1f   :  { %v3258_v21 = vadd.f32 %v3255_v26, %v3252_v59 }
0x1c20   :  { %v3239_v57 = vmul.f32 %v4088_v4, %v3238_v13 }
0x1c22   :  { %v3243_v7 = vsel %vm3242_vm14, %v4088_v4, %v3239_v57 }
0x1c23   :  { %v3247_v50 = vmul.f32 %v3243_v7, %v5699_v35 }
0x1c25   :  { %v3253_v49 = vmul.f32 %v3249_v54, %v3247_v50 }
0x1c27   :  { %v3259_v15 = vadd.f32 %v3255_v26, %v3253_v49 }
0x1c29   :  { %v3265_v6 = vpack.c.bf16 %v3259_v15, %v3258_v21 }
0x1c2b   :  { %3708 = vmatmul.msk.bf16.gmra.mxu0 %vm165_vm0, %v3265_v6 }
0x1c6c   :  { %v3296_v22 = vpop.f32.mrf.mxu0 }
0x1c6d   :  { %v3297_v35 = vadd.f32 %v3296_v22, %v3268_v25 }
0x1c6f   :  { %v3306_v31 = vmax.f32 %v3297_v35, 0.0 }
0x1c74   :  { %v3298_v51 = vpop.f32.mrf.mxu0 }
0x1c75   :  { %v3299_v34 = vadd.f32 %v3298_v51, %v3268_v25  ;;  %v3466_v51 = vunpack.c.l.bf16 %v3376_v0 }
0x1c77   :  { %v3307_v55 = vmax.f32 %v3299_v34, 0.0 }
0x1c79   :  { %v3318_v17 = vpack.c.bf16 %v3307_v55, %v3306_v31 }
0x1c7b   :  { %3725 = vmatmul.msk.bf16.vlgmr.msrb.gmra.mxu3 %vm1703_vm6, %v3318_v17 }
0x1ca8   :  { %v3301_v43 = vpop.f32.mrf.mxu0 }
0x1ca9   :  { %v3302_v11 = vadd.f32 %v3301_v43, %v3268_v25 }
0x1cab   :  { %v3308_v40 = vmax.f32 %v3302_v11, 0.0  ;;  %v3467_v11 = vperm.slane %v3466_v51, 0 }
0x1cb0   :  { %v3303_v5 = vpop.f32.mrf.mxu0 }
0x1cb1   :  { %v3304_v44 = vadd.f32 %v3303_v5, %v3268_v25  ;;  %v3377_v25 = vld [vmem:[#allocation8 + $0x1c8] sm:$0x1] }
0x1cb2   :  { %v3472_v55 = vunpack.c.l.bf16 %v3377_v25 }
0x1cb3   :  { %v3309_v24 = vmax.f32 %v3304_v44, 0.0 }
0x1cb5   :  { %v3319_v14 = vpack.c.bf16 %v3309_v24, %v3308_v40  ;;  %v3473_v40 = vperm.slane %v3472_v55, 0 }
0x1cb7   :  { %3726 = vmatmul.msk.bf16.gmra.mxu3 %vm1703_vm6, %v3319_v14 }
0x1cfe   :  { %v3362_v54 = vpop.f32.mrf.mxu3 }
0x1cff   :  { %v3363_v32 = vadd.f32 %v3362_v54, %v3322_v39 }
0x1d01   :  { %v3372_v12 = vadd.f32 %v3363_v32, %v5706_v60 }
0x1d03   :  { %v3378_v45 = vsel %vm165_vm0, %v3372_v12, 0.0 }
0x1d04   :  { %3379 = vadd.xlane.f32.xlu1 %v3378_v45 }
0x1d06   :  { %v3364_v1 = vpop.f32.mrf.mxu3 }
0x1d07   :  { %v3365_v26 = vadd.f32 %v3364_v1, %v3322_v39 }
0x1d09   :  { %v3373_v37 = vadd.f32 %v3365_v26, %v5708_v38 }
0x1d0b   :  { %v3381_v56 = vsel %vm165_vm0, %v3373_v37, 0.0 }
0x1d0c   :  { %3382 = vadd.xlane.f32.xlu2 %v3381_v56 }
0x1d3a   :  { %v3367_v3 = vpop.f32.mrf.mxu3 }
0x1d3b   :  { %v3368_v63 = vadd.f32 %v3367_v3, %v3322_v39 }
0x1d3d   :  { %v3374_v62 = vadd.f32 %v3368_v63, %v3258_v21 }
0x1d3f   :  { %v3384_v47 = vsel %vm165_vm0, %v3374_v62, 0.0 }
0x1d40   :  { %3385 = vadd.xlane.f32.xlu0 %v3384_v47 }
0x1d42   :  { %v3369_v61 = vpop.f32.mrf.mxu3 }
0x1d43   :  { %v3370_v19 = vadd.f32 %v3369_v61, %v3322_v39 }
0x1d45   :  { %v3375_v27 = vadd.f32 %v3370_v19, %v3259_v15 }
0x1d47   :  { %v3387_v60 = vsel %vm165_vm0, %v3375_v27, 0.0 }
0x1d48   :  { %3388 = vadd.xlane.f32.xlu1 %v3387_v60 }
0x1d77   :  { %v3380_v30 = vpop.xlane.xlu1 %3379 }
0x1d78   :  { %v3390_v41 = vmul.f32 %v3380_v30, %v4602_v36 }
0x1d7a   :  { %v3394_v20 = vsub.f32 %v3372_v12, %v3390_v41 }
0x1d7c   :  { %v3398_v38 = vmul.f32 %v3394_v20, %v3394_v20 }
0x1d7e   :  { %v3402_v28 = vsel %vm165_vm0, %v3398_v38, 0.0 }
0x1d7f   :  { %3403 = vadd.xlane.f32.xlu2 %v3402_v28  ;;  %v3383_v10 = vpop.xlane.xlu2 %3382 }
0x1d80   :  { %v3391_v53 = vmul.f32 %v3383_v10, %v4602_v36 }
0x1d82   :  { %v3395_v4 = vsub.f32 %v3373_v37, %v3391_v53 }
0x1d84   :  { %v3399_v18 = vmul.f32 %v3395_v4, %v3395_v4 }
0x1d86   :  { %v3405_v16 = vsel %vm165_vm0, %v3399_v18, 0.0 }
0x1d87   :  { %3406 = vadd.xlane.f32.xlu0 %v3405_v16 }
0x1db3   :  { %v3386_v29 = vpop.xlane.xlu0 %3385 }
0x1db4   :  { %v3392_v23 = vmul.f32 %v3386_v29, %v4602_v36 }
0x1db6   :  { %v5731_v2 = vsub.f32 %v3374_v62, %v3392_v23 }
0x1db8   :  { %v3400_v13 = vmul.f32 %v5731_v2, %v5731_v2 }
0x1dba   :  { %v3408_v52 = vsel %vm165_vm0, %v3400_v13, 0.0 }
0x1dbb   :  { %v3389_v57 = vpop.xlane.xlu1 %3388  ;;  %3409 = vadd.xlane.f32.xlu1 %v3408_v52 }
0x1dbc   :  { %v3393_v7 = vmul.f32 %v3389_v57, %v4602_v36 }
0x1dbe   :  { %v5737_v50 = vsub.f32 %v3375_v27, %v3393_v7 }
0x1dc0   :  { %v3401_v59 = vmul.f32 %v5737_v50, %v5737_v50 }
0x1dc2   :  { %v3411_v49 = vsel %vm165_vm0, %v3401_v59, 0.0 }
0x1dc3   :  { %3412 = vadd.xlane.f32.xlu2 %v3411_v49 }
0x1df2   :  { %v3404_v21 = vpop.xlane.xlu2 %3403 }
0x1df3   :  { %v3414_v15 = vmul.f32 %v3404_v21, %v4602_v36 }
0x1df5   :  { %v3418_v6 = vadd.f32 1e-05, %v3414_v15 }
0x1df7   :  { %4089 = vrsqrt.f32 %v3418_v6  ;;  %vm3428_vm15 = vweird.f32 %v3418_v6 }
0x1dfa   :  { %v3407_v48 = vpop.xlane.xlu0 %3406 }
0x1dfb   :  { %v3415_v9 = vmul.f32 %v3407_v48, %v4602_v36 }
0x1dfd   :  { %v4090_v33 = vpop.eup %4089  ;;  %v3419_v42 = vadd.f32 1e-05, %v3415_v9 }
0x1dfe   :  { %v3423_v46 = vmul.f32 %v4090_v33, %v3418_v6  ;;  %vm3429_vm6 = vweird.f32 %v4090_v33 }
0x1dff   :  { %4091 = vrsqrt.f32 %v3419_v42  ;;  %vm3430_vm1 = vmor %vm3428_vm15, %vm3429_vm6  ;;  %vm3438_vm3 = vweird.f32 %v3419_v42 }
0x1e00   :  { %v3424_v22 = vmul.f32 %v4090_v33, %v3423_v46 }
0x1e02   :  { %v3425_v35 = vmul.f32 0.5, %v3424_v22 }
0x1e04   :  { %v3426_v34 = vsub.f32 1.5, %v3425_v35 }
0x1e05   :  { %v4092_v31 = vpop.eup %4091 }
0x1e06   :  { %v3427_v17 = vmul.f32 %v4090_v33, %v3426_v34  ;;  %v3433_v43 = vmul.f32 %v4092_v31, %v3419_v42  ;;  %vm3439_vm2 = vweird.f32 %v4092_v31 }
0x1e07   :  { %vm3440_vm4 = vmor %vm3438_vm3, %vm3439_vm2 }
0x1e08   :  { %v3431_v5 = vsel %vm3430_vm1, %v4090_v33, %v3427_v17  ;;  %v3434_v44 = vmul.f32 %v4092_v31, %v3433_v43 }
0x1e09   :  { %v3462_v24 = vmul.f32 %v3431_v5, %v3394_v20 }
0x1e0a   :  { %v3435_v14 = vmul.f32 0.5, %v3434_v44 }
0x1e0b   :  { %v3468_v58 = vmul.f32 %v3467_v11, %v3462_v24 }
0x1e0c   :  { %v3436_v8 = vsub.f32 1.5, %v3435_v14 }
0x1e0d   :  { %v3474_v39 = vadd.f32 %v3473_v40, %v3468_v58 }
0x1e0e   :  { %v3437_v54 = vmul.f32 %v4092_v31, %v3436_v8 }
0x1e0f   :  { %3478 = vst.msk [vmem:[#allocation10] sm:$0xff] %vm165_vm0, %v3474_v39 }
0x1e10   :  { %v3441_v32 = vsel %vm3440_vm4, %v4092_v31, %v3437_v54 }
0x1e11   :  { %v3463_v12 = vmul.f32 %v3441_v32, %v3395_v4 }
0x1e13   :  { %v3469_v45 = vmul.f32 %v3467_v11, %v3463_v12 }
0x1e15   :  { %v3475_v1 = vadd.f32 %v3473_v40, %v3469_v45 }
0x1e17   :  { %3479 = vst.msk [vmem:[#allocation10 + $0x8] sm:$0xff] %vm165_vm0, %v3475_v1 }
0x1e2e   :  { %v3410_v26 = vpop.xlane.xlu1 %3409 }
0x1e2f   :  { %v3416_v37 = vmul.f32 %v3410_v26, %v4602_v36 }
0x1e31   :  { %v3420_v56 = vadd.f32 1e-05, %v3416_v37 }
0x1e33   :  { %4093 = vrsqrt.f32 %v3420_v56  ;;  %vm3448_vm7 = vweird.f32 %v3420_v56 }
0x1e36   :  { %v3413_v3 = vpop.xlane.xlu2 %3412 }
0x1e37   :  { %v3417_v63 = vmul.f32 %v3413_v3, %v4602_v36 }
0x1e39   :  { %v4094_v62 = vpop.eup %4093  ;;  %v3421_v47 = vadd.f32 1e-05, %v3417_v63 }
0x1e3a   :  { %v3443_v61 = vmul.f32 %v4094_v62, %v3420_v56  ;;  %vm3449_vm5 = vweird.f32 %v4094_v62 }
0x1e3b   :  { %4095 = vrsqrt.f32 %v3421_v47  ;;  %vm3450_vm8 = vmor %vm3448_vm7, %vm3449_vm5  ;;  %vm3458_vm10 = vweird.f32 %v3421_v47 }
0x1e3c   :  { %v3444_v19 = vmul.f32 %v4094_v62, %v3443_v61 }
0x1e3e   :  { %v3445_v27 = vmul.f32 0.5, %v3444_v19 }
0x1e40   :  { %v3446_v60 = vsub.f32 1.5, %v3445_v27 }
0x1e41   :  { %v4096_v30 = vpop.eup %4095 }
0x1e42   :  { %v3447_v41 = vmul.f32 %v4094_v62, %v3446_v60  ;;  %v3453_v20 = vmul.f32 %v4096_v30, %v3421_v47  ;;  %vm3459_vm9 = vweird.f32 %v4096_v30 }
0x1e43   :  { %vm3460_vm11 = vmor %vm3458_vm10, %vm3459_vm9 }
0x1e44   :  { %v3451_v38 = vsel %vm3450_vm8, %v4094_v62, %v3447_v41  ;;  %v3454_v28 = vmul.f32 %v4096_v30, %v3453_v20 }
0x1e45   :  { %v3464_v10 = vmul.f32 %v3451_v38, %v5731_v2 }
0x1e46   :  { %v3455_v53 = vmul.f32 0.5, %v3454_v28 }
0x1e47   :  { %v3470_v4 = vmul.f32 %v3467_v11, %v3464_v10 }
0x1e48   :  { %v3456_v36 = vsub.f32 1.5, %v3455_v53 }
0x1e49   :  { %v3476_v18 = vadd.f32 %v3473_v40, %v3470_v4 }
0x1e4a   :  { %v3457_v16 = vmul.f32 %v4096_v30, %v3456_v36 }
0x1e4b   :  { %3480 = vst.msk [vmem:[#allocation10 + $0x10] sm:$0xff] %vm165_vm0, %v3476_v18 }
0x1e4c   :  { %v3461_v29 = vsel %vm3460_vm11, %v4096_v30, %v3457_v16 }
0x1e4d   :  { %v3465_v23 = vmul.f32 %v3461_v29, %v5737_v50 }
0x1e4f   :  { %v3471_v2 = vmul.f32 %v3467_v11, %v3465_v23 }
0x1e51   :  { %v3477_v13 = vadd.f32 %v3473_v40, %v3471_v2 }
0x1e53   :  { %3481 = vst.msk [vmem:[#allocation10 + $0x18] sm:$0xff] %vm165_vm0, %v3477_v13 }
0x1e54   :  { %3494 = dma.vmem_to_hbm [thread:$0]  %s3487_s12, 512, %s3489_s15, [#allocation4], %s4228_s23, %s4228_s23, %s4229_s24  }
0x1e55   :  { %4225 = dma.done.wait [#allocation4], 512  }
0x1e56   :  { %4226 = vsyncadd [#allocation4], 4294966784 }
0x1e57   :  { %3499 = vsyncpa [#allocation3], 1 }
0x1e58   :  { %3500 = vsyncpa [#allocation6], 1 }
0x1e59   :  { %3501 = vsyncpa [#allocation9], 1 }
0x1e5a   :  { %3502 = vsyncpa [#allocation4], 1 }

</bundles_post_ra>
